<compile_context>
chip_gen: v7x
topology: tpu7x:2x2x1
jax: 0.10.0
libtpu: 0.0.40
codegen_flags: <defaults>
</compile_context>

<pallas_src>
import functools

import jax
import jax.numpy as jnp
from jax.experimental import pallas as pl
from jax.experimental.pallas import tpu as pltpu

LANE = 128
SUBLANE = 8


def _round_up(v, m):
    return (v + m - 1) // m * m


def _cdiv(a, b):
    return (a + b - 1) // b


def _pick_batch_tile(n, ho, wo, per_image_bytes):
    """Largest divisor of n with decent MXU M, >=2 grid steps, VMEM headroom."""
    best = 1
    for b in range(1, min(n, 8) + 1):
        if n % b:
            continue
        if b * ho * wo > 1024:
            continue
        if b * per_image_bytes > 8 * 1024 * 1024:
            continue
        if n > 1 and n // b < 2:          # keep both TensorCores busy (v7x)
            continue
        best = b
    return best


# ---------------------------------------------------------------------------
# Fused kernel: relu(bn1(x)) -> conv1(3x3, stride s) -> relu(bn2) -> conv2(3x3)
#               + shortcut (1x1 strided conv, or identity) -- all in one step.
# ---------------------------------------------------------------------------
def _preact_block_kernel(*args, stride, H, W, Ho, Wo, Wo8, Cin, PP, B,
                         has_shortcut):
    s = stride
    if has_shortcut:
        (xq_ref, w1_ref, w2_ref, s1_ref, b1_ref, s2_ref, b2_ref, wctr_ref,
         o_ref, y_scr, z_scr) = args
    else:
        (xq_ref, w1_ref, w2_ref, s1_ref, b1_ref, s2_ref, b2_ref,
         o_ref, y_scr, z_scr) = args
        wctr_ref = None

    f32 = jnp.float32
    M = Ho * Wo8                              # Wo padded to sublane multiple ->
    scale1 = s1_ref[...].reshape(1, 1, Cin)   # per-tap reshapes are relayout-free
    bias1 = b1_ref[...].reshape(1, 1, Cin)
    scale2 = s2_ref[...]                      # (1, PP) broadcasts against (M, PP)
    bias2 = b2_ref[...]

    # Re-zero the scratches every grid step (megacore-safe: each TensorCore has
    # its own VMEM scratch, so a "program_id==0 only" init would be wrong).
    # This is only a few hundred vreg stores -- negligible next to 18+ matmuls.
    y_scr[...] = jnp.zeros(y_scr.shape, y_scr.dtype)
    z_scr[...] = jnp.zeros(z_scr.shape, z_scr.dtype)

    for b in range(B):
        # ---- stage 1: y = relu(bn1(x)) computed ONCE (not 9x), stored bf16
        #      into a zero-haloed, phase-decomposed scratch (halo = PyTorch's
        #      post-activation zero padding). ----
        x_raw = None
        for a in range(s):
            for c in range(s):
                xa = xq_ref[b * s * s + a * s + c]        # (He, We, Cin) bf16
                if a == 0 and c == 0:
                    x_raw = xa                            # raw x for identity path
                ya = jnp.maximum(xa.astype(f32) * scale1 + bias1, 0.0)
                ya = ya.astype(y_scr.dtype)
                py, px = (a + 1) % s, (c + 1) % s
                i0 = 1 if py == 0 else 0
                j0 = 1 if px == 0 else 0
                nr = (H - a + s - 1) // s                 # valid rows of this phase
                nc = (W - c + s - 1) // s
                y_scr[b * s * s + py * s + px,
                      pl.ds(i0, nr), pl.ds(j0, nc), :] = ya[:nr, :nc, :]

        # ---- stage 2: conv1 = 9 shifted-tap matmuls; the 1x1 strided shortcut
        #      rides the center tap as one 2*PP-wide matmul. ----
        acc1 = jnp.zeros((M, PP), f32)
        resid = None
        for t in range(9):
            ky, kx = t // 3, t % 3
            win = y_scr[b * s * s + (ky % s) * s + (kx % s),
                        pl.ds(ky // s, Ho), pl.ds(kx // s, Wo8), :]
            win2 = win.reshape(M, Cin)                    # free: Wo8 % 8 == 0
            if has_shortcut and t == 4:
                both = jnp.dot(win2, wctr_ref[...],
                               preferred_element_type=f32)   # (M, 2*PP)
                acc1 = acc1 + both[:, :PP]
                resid = both[:, PP:]
            else:
                acc1 = acc1 + jnp.dot(win2, w1_ref[t],
                                      preferred_element_type=f32)

        # ---- stage 3: z = relu(bn2(conv1)) into a zero-haloed VMEM scratch
        #      (never leaves the chip). ----
        z = jnp.maximum(acc1 * scale2 + bias2, 0.0)
        zb = z.reshape(Ho, Wo8, PP)[:, :Wo, :].astype(z_scr.dtype)
        z_scr[b, pl.ds(1, Ho), pl.ds(1, Wo), :] = zb

        # ---- stage 4: conv2 (3x3, stride 1); the residual seeds the f32 acc ----
        acc2 = resid if has_shortcut else jnp.zeros((M, PP), f32)
        for t in range(9):
            ky, kx = t // 3, t % 3
            win = z_scr[b, pl.ds(ky, Ho), pl.ds(kx, Wo8), :]
            acc2 = acc2 + jnp.dot(win.reshape(M, PP), w2_ref[t],
                                  preferred_element_type=f32)

        out = acc2.reshape(Ho, Wo8, PP)[:, :Wo, :]        # drop junk columns
        o_ref[b] = out.astype(o_ref.dtype)
        if not has_shortcut:
            # identity shortcut (stride==1 and Cin==planes): add raw x into the
            # first Cin lanes of the (still VMEM-resident) output block.
            cur = o_ref[b, :, :, pl.ds(0, Cin)]
            o_ref[b, :, :, pl.ds(0, Cin)] = cur + x_raw.astype(f32)


# ---------------------------------------------------------------------------
# Wrapper: BN folding, weight packing, phase relayout (glue) + 1 pallas_call.
# ---------------------------------------------------------------------------
def preact_block_forward(x_nhwc, params, stride):
    N, H, W, Cin = x_nhwc.shape
    P = params["w1"].shape[-1]
    s = int(stride)
    has_shortcut = (s != 1) or (Cin != P)
    if not has_shortcut:
        assert Cin == P, "identity shortcut requires in_planes == planes"
    Ho = (H - 1) // s + 1
    Wo = (W - 1) // s + 1
    Wo8 = _round_up(Wo, SUBLANE)      # compute a few junk columns, drop at store
    PP = _round_up(P, LANE)           # lane-dense intermediate / output channels
    Hq = Ho + _cdiv(2, s)             # scratch extents (per phase)
    Wq = Wo8 + _cdiv(2, s)
    He = _cdiv(H, s)                  # per-phase input extents
    We = _cdiv(W, s)
    eps = 1e-5
    f32, bf16 = jnp.float32, jnp.bfloat16

    # fold BN running stats into per-channel affine (glue, once)
    s1 = (params["bn1_gamma"] / jnp.sqrt(params["bn1_var"] + eps)).astype(f32)
    b1 = (params["bn1_beta"] - params["bn1_mean"] * s1).astype(f32)
    s2 = params["bn2_gamma"] / jnp.sqrt(params["bn2_var"] + eps)
    b2 = params["bn2_beta"] - params["bn2_mean"] * s2
    s1p = s1.reshape(1, Cin)
    b1p = b1.reshape(1, Cin)
    s2p = jnp.zeros((1, PP), f32).at[0, :P].set(s2)
    b2p = jnp.zeros((1, PP), f32).at[0, :P].set(b2)

    # weights: HWIO -> tap-major bf16; only the OUTPUT channel dim is padded
    # (input channel dim stays raw so no zero lanes are DMA'd from HBM).
    w1p = (jnp.zeros((3, 3, Cin, PP), bf16)
           .at[:, :, :, :P].set(params["w1"].astype(bf16))
           .reshape(9, Cin, PP))
    w2p = (jnp.zeros((3, 3, PP, PP), bf16)
           .at[:, :, :P, :P].set(params["w2"].astype(bf16))
           .reshape(9, PP, PP))

    # bf16 input; for stride>1 a single same-size phase relayout of x so the
    # kernel never needs strided slicing (this is NOT an im2col: same bytes).
    xb = x_nhwc.astype(bf16)
    if s == 1:
        xq = xb
    else:
        Hp, Wp = He * s, We * s
        xq = jnp.pad(xb, ((0, 0), (0, Hp - H), (0, Wp - W), (0, 0)))
        xq = xq.reshape(N, He, s, We, s, Cin).transpose(0, 2, 4, 1, 3, 5)
    xq = xq.reshape(N * s * s, He, We, Cin)

    per_image_bytes = (2 * s * s * He * We * Cin * 2      # x block (dbl-buffered)
                       + s * s * Hq * Wq * Cin * 2        # y scratch
                       + (Ho + 2) * (Wo8 + 2) * PP * 2    # z scratch
                       + 2 * Ho * Wo * PP * 4             # out block (dbl-buffered)
                       + 2 * Ho * Wo8 * PP * 4)           # f32 accumulators
    B = _pick_batch_tile(N, Ho, Wo, per_image_bytes)
    q = B * s * s

    inputs = [xq, w1p, w2p, s1p, b1p, s2p, b2p]
    in_specs = [
        pl.BlockSpec((q, He, We, Cin), lambda n: (n, 0, 0, 0)),
        pl.BlockSpec((9, Cin, PP), lambda n: (0, 0, 0)),
        pl.BlockSpec((9, PP, PP), lambda n: (0, 0, 0)),
        pl.BlockSpec((1, Cin), lambda n: (0, 0)),
        pl.BlockSpec((1, Cin), lambda n: (0, 0)),
        pl.BlockSpec((1, PP), lambda n: (0, 0)),
        pl.BlockSpec((1, PP), lambda n: (0, 0)),
    ]
    if has_shortcut:
        wsc = params["wsc"].reshape(Cin, P).astype(bf16)
        wscp = jnp.zeros((Cin, PP), bf16).at[:, :P].set(wsc)
        # center-tap conv1 weights ++ 1x1 shortcut weights along the output dim:
        # one (M, Cin) @ (Cin, 2*PP) matmul feeds the 256-wide MXU on v6e/v7x.
        wctr = jnp.concatenate([w1p[4], wscp], axis=-1)
        inputs.append(wctr)
        in_specs.append(pl.BlockSpec((Cin, 2 * PP), lambda n: (0, 0)))

    kernel = functools.partial(
        _preact_block_kernel, stride=s, H=H, W=W, Ho=Ho, Wo=Wo, Wo8=Wo8,
        Cin=Cin, PP=PP, B=B, has_shortcut=has_shortcut)

    Mtot = N * Ho * Wo
    flops = 2 * Mtot * Cin * PP * 9 + 2 * Mtot * PP * PP * 9
    if has_shortcut:
        flops += 2 * Mtot * Cin * PP
    cost = pl.CostEstimate(
        flops=int(flops), transcendentals=0,
        bytes_accessed=int(xq.size * 2 + w1p.size * 2 + w2p.size * 2
                           + N * Ho * Wo * PP * 4))

    out = pl.pallas_call(
        kernel,
        grid=(N // B,),
        in_specs=in_specs,
        out_specs=pl.BlockSpec((B, Ho, Wo, PP), lambda n: (n, 0, 0, 0)),
        out_shape=jax.ShapeDtypeStruct((N, Ho, Wo, PP), f32),
        scratch_shapes=[
            pltpu.VMEM((B * s * s, Hq, Wq, Cin), bf16),   # relu(bn1(x)), zero halo
            pltpu.VMEM((B, Ho + 2, Wo8 + 2, PP), bf16),   # relu(bn2(conv1)), halo
        ],
        compiler_params=pltpu.CompilerParams(
            dimension_semantics=("parallel",),
            vmem_limit_bytes=64 * 1024 * 1024),
        cost_estimate=cost,
    )(*inputs)

    return out[:, :, :, :P]   # drop output-channel lane padding (glue)


# ---------------------------------------------------------------------------
# Pure-JAX reference (correctness check)
# ---------------------------------------------------------------------------
def reference(x_nhwc, params, stride):
    eps = 1e-5
    dn = ("NHWC", "HWIO", "NHWC")

    def bn(x, g, b, m, v):
        return (x - m) / jnp.sqrt(v + eps) * g + b

    Cin = x_nhwc.shape[-1]
    P = params["w1"].shape[-1]
    y = jax.nn.relu(bn(x_nhwc, params["bn1_gamma"], params["bn1_beta"],
                       params["bn1_mean"], params["bn1_var"]))
    if (stride != 1) or (Cin != P):
        shortcut = jax.lax.conv_general_dilated(
            y, params["wsc"], (stride, stride), "VALID", dimension_numbers=dn)
    else:
        shortcut = x_nhwc
    o1 = jax.lax.conv_general_dilated(
        y, params["w1"], (stride, stride), ((1, 1), (1, 1)), dimension_numbers=dn)
    z = jax.nn.relu(bn(o1, params["bn2_gamma"], params["bn2_beta"],
                       params["bn2_mean"], params["bn2_var"]))
    o2 = jax.lax.conv_general_dilated(
        z, params["w2"], (1, 1), ((1, 1), (1, 1)), dimension_numbers=dn)
    return o2 + shortcut


if __name__ == "__main__":
    def make_params(key, Cin, P, has_shortcut):
        ks = jax.random.split(key, 11)
        p = {
            "bn1_gamma": 1.0 + 0.1 * jax.random.normal(ks[0], (Cin,), jnp.float32),
            "bn1_beta": 0.1 * jax.random.normal(ks[1], (Cin,), jnp.float32),
            "bn1_mean": 0.1 * jax.random.normal(ks[2], (Cin,), jnp.float32),
            "bn1_var": 0.5 + jax.nn.softplus(jax.random.normal(ks[3], (Cin,), jnp.float32)),
            "w1": 0.1 * jax.random.normal(ks[4], (3, 3, Cin, P), jnp.float32),   # HWIO
            "bn2_gamma": 1.0 + 0.1 * jax.random.normal(ks[5], (P,), jnp.float32),
            "bn2_beta": 0.1 * jax.random.normal(ks[6], (P,), jnp.float32),
            "bn2_mean": 0.1 * jax.random.normal(ks[7], (P,), jnp.float32),
            "bn2_var": 0.5 + jax.nn.softplus(jax.random.normal(ks[8], (P,), jnp.float32)),
            "w2": 0.1 * jax.random.normal(ks[9], (3, 3, P, P), jnp.float32),     # HWIO
        }
        if has_shortcut:
            p["wsc"] = 0.1 * jax.random.normal(ks[10], (1, 1, Cin, P), jnp.float32)
        return p

    key = jax.random.PRNGKey(0)
    k_main, k_id = jax.random.split(key)

    # Config 1: PreActBlock(in_planes=4, planes=8, stride=2) — downsample shortcut.
    N, Cin, H, W, P, stride = 2, 4, 16, 16, 8, 2
    k_x, k_p = jax.random.split(k_main)
    x_nchw = jax.random.normal(k_x, (N, Cin, H, W), jnp.float32)
    x_nhwc = jnp.transpose(x_nchw, (0, 2, 3, 1))          # NCHW -> NHWC layout glue
    params = make_params(k_p, Cin, P, True)
    out = jax.block_until_ready(preact_block_forward(x_nhwc, params, stride))
    ref = reference(x_nhwc, params, stride)
    assert out.shape == ref.shape, (out.shape, ref.shape)
    # bf16 MXU operands / bf16 x in HBM (f32 accumulation) -> loosened tolerance
    assert jnp.allclose(out, ref, atol=3e-2, rtol=3e-2), "mismatch (downsample block)"

    # Config 2: PreActBlock(in_planes=8, planes=8, stride=1) — identity shortcut.
    N2, C2, H2, W2, stride2 = 2, 8, 8, 8, 1
    k_x2, k_p2 = jax.random.split(k_id)
    x2 = jnp.transpose(jax.random.normal(k_x2, (N2, C2, H2, W2), jnp.float32),
                       (0, 2, 3, 1))
    params2 = make_params(k_p2, C2, C2, False)
    out2 = jax.block_until_ready(preact_block_forward(x2, params2, stride2))
    ref2 = reference(x2, params2, stride2)
    assert out2.shape == ref2.shape, (out2.shape, ref2.shape)
    assert jnp.allclose(out2, ref2, atol=3e-2, rtol=3e-2), "mismatch (identity block)"

    print("KERNEL_OK")
</pallas_src>

<mosaic_0001>
module attributes {stable_mosaic.version = 11 : i64} {
  func.func @_preact_block_kernel(%arg0: i32, %arg1: memref<4x8x8x4xbf16, #tpu.memory_space<vmem>>, %arg2: memref<9x4x128xbf16, #tpu.memory_space<vmem>>, %arg3: memref<9x128x128xbf16, #tpu.memory_space<vmem>>, %arg4: memref<1x4xf32, #tpu.memory_space<vmem>>, %arg5: memref<1x4xf32, #tpu.memory_space<vmem>>, %arg6: memref<1x128xf32, #tpu.memory_space<vmem>>, %arg7: memref<1x128xf32, #tpu.memory_space<vmem>>, %arg8: memref<4x256xbf16, #tpu.memory_space<vmem>>, %arg9: memref<1x8x8x128xf32, #tpu.memory_space<vmem>>, %arg10: memref<4x9x9x4xbf16, #tpu.memory_space<vmem>>, %arg11: memref<1x10x10x128xbf16, #tpu.memory_space<vmem>>) attributes {dimension_semantics = [#tpu.dimension_semantics<parallel>], iteration_bounds = array<i64: 2>, scalar_prefetch = 0 : i64, scratch_operands = 2 : i64, tpu.core_type = #tpu.core_type<tc>, window_params = [{transform_indices = @transform_0, window_bounds = array<i64: 4, 8, 8, 4>}, {pipeline_mode = #tpu.pipeline_mode<synchronous>, transform_indices = @transform_1, window_bounds = array<i64: 9, 4, 128>}, {pipeline_mode = #tpu.pipeline_mode<synchronous>, transform_indices = @transform_2, window_bounds = array<i64: 9, 128, 128>}, {pipeline_mode = #tpu.pipeline_mode<synchronous>, transform_indices = @transform_3, window_bounds = array<i64: 1, 4>}, {pipeline_mode = #tpu.pipeline_mode<synchronous>, transform_indices = @transform_4, window_bounds = array<i64: 1, 4>}, {pipeline_mode = #tpu.pipeline_mode<synchronous>, transform_indices = @transform_5, window_bounds = array<i64: 1, 128>}, {pipeline_mode = #tpu.pipeline_mode<synchronous>, transform_indices = @transform_6, window_bounds = array<i64: 1, 128>}, {pipeline_mode = #tpu.pipeline_mode<synchronous>, transform_indices = @transform_7, window_bounds = array<i64: 4, 256>}, {transform_indices = @transform_8, window_bounds = array<i64: 1, 8, 8, 128>}]} {
    %c0 = arith.constant 0 : index
    %c0_0 = arith.constant 0 : index
    %0 = vector.load %arg4[%c0, %c0_0] : memref<1x4xf32, #tpu.memory_space<vmem>>, vector<1x4xf32>
    %1 = vector.shape_cast %0 : vector<1x4xf32> to vector<1x1x4xf32>
    %c0_1 = arith.constant 0 : index
    %c0_2 = arith.constant 0 : index
    %2 = vector.load %arg5[%c0_1, %c0_2] : memref<1x4xf32, #tpu.memory_space<vmem>>, vector<1x4xf32>
    %3 = vector.shape_cast %2 : vector<1x4xf32> to vector<1x1x4xf32>
    %c0_3 = arith.constant 0 : index
    %c0_4 = arith.constant 0 : index
    %4 = vector.load %arg6[%c0_3, %c0_4] : memref<1x128xf32, #tpu.memory_space<vmem>>, vector<1x128xf32>
    %c0_5 = arith.constant 0 : index
    %c0_6 = arith.constant 0 : index
    %5 = vector.load %arg7[%c0_5, %c0_6] : memref<1x128xf32, #tpu.memory_space<vmem>>, vector<1x128xf32>
    %cst = arith.constant 0.000000e+00 : bf16
    %6 = vector.broadcast %cst : bf16 to vector<4x9x9x4xbf16>
    %c0_7 = arith.constant 0 : index
    %c0_8 = arith.constant 0 : index
    %c0_9 = arith.constant 0 : index
    %c0_10 = arith.constant 0 : index
    %7 = vector.load %arg10[%c0_7, %c0_8, %c0_9, %c0_10] : memref<4x9x9x4xbf16, #tpu.memory_space<vmem>>, vector<4x9x9x4xbf16>
    tpu.vector_store %arg10[%c0_7, %c0_8, %c0_9, %c0_10], %6 {strides = array<i32>} : memref<4x9x9x4xbf16, #tpu.memory_space<vmem>>, vector<4x9x9x4xbf16>,
    %cst_11 = arith.constant 0.000000e+00 : bf16
    %8 = vector.broadcast %cst_11 : bf16 to vector<1x10x10x128xbf16>
    %c0_12 = arith.constant 0 : index
    %c0_13 = arith.constant 0 : index
    %c0_14 = arith.constant 0 : index
    %c0_15 = arith.constant 0 : index
    %9 = vector.load %arg11[%c0_12, %c0_13, %c0_14, %c0_15] : memref<1x10x10x128xbf16, #tpu.memory_space<vmem>>, vector<1x10x10x128xbf16>
    tpu.vector_store %arg11[%c0_12, %c0_13, %c0_14, %c0_15], %8 {strides = array<i32>} : memref<1x10x10x128xbf16, #tpu.memory_space<vmem>>, vector<1x10x10x128xbf16>,
    %c0_16 = arith.constant 0 : index
    %c0_17 = arith.constant 0 : index
    %c0_18 = arith.constant 0 : index
    %c0_19 = arith.constant 0 : index
    %10 = vector.load %arg1[%c0_16, %c0_17, %c0_18, %c0_19] : memref<4x8x8x4xbf16, #tpu.memory_space<vmem>>, vector<1x8x8x4xbf16>
    %11 = vector.shape_cast %10 : vector<1x8x8x4xbf16> to vector<8x8x4xbf16>
    %12 = arith.extf %11 : vector<8x8x4xbf16> to vector<8x8x4xf32>
    %13 = vector.broadcast %1 : vector<1x1x4xf32> to vector<8x8x4xf32>
    %14 = arith.mulf %12, %13 : vector<8x8x4xf32>
    %15 = vector.broadcast %3 : vector<1x1x4xf32> to vector<8x8x4xf32>
    %16 = arith.addf %14, %15 : vector<8x8x4xf32>
    %cst_20 = arith.constant 0.000000e+00 : f32
    %17 = vector.broadcast %cst_20 : f32 to vector<8x8x4xf32>
    %18 = arith.maximumf %16, %17 : vector<8x8x4xf32>
    %19 = arith.truncf %18 : vector<8x8x4xf32> to vector<8x8x4xbf16>
    %c3 = arith.constant 3 : index
    %c0_21 = arith.constant 0 : index
    %c0_22 = arith.constant 0 : index
    %c0_23 = arith.constant 0 : index
    %20 = vector.load %arg10[%c3, %c0_21, %c0_22, %c0_23] : memref<4x9x9x4xbf16, #tpu.memory_space<vmem>>, vector<1x8x8x4xbf16>
    %21 = vector.shape_cast %20 : vector<1x8x8x4xbf16> to vector<8x8x4xbf16>
    %22 = vector.shape_cast %19 : vector<8x8x4xbf16> to vector<1x8x8x4xbf16>
    tpu.vector_store %arg10[%c3, %c0_21, %c0_22, %c0_23], %22 {strides = array<i32>} : memref<4x9x9x4xbf16, #tpu.memory_space<vmem>>, vector<1x8x8x4xbf16>,
    %c1 = arith.constant 1 : index
    %c0_24 = arith.constant 0 : index
    %c0_25 = arith.constant 0 : index
    %c0_26 = arith.constant 0 : index
    %23 = vector.load %arg1[%c1, %c0_24, %c0_25, %c0_26] : memref<4x8x8x4xbf16, #tpu.memory_space<vmem>>, vector<1x8x8x4xbf16>
    %24 = vector.shape_cast %23 : vector<1x8x8x4xbf16> to vector<8x8x4xbf16>
    %25 = arith.extf %24 : vector<8x8x4xbf16> to vector<8x8x4xf32>
    %26 = vector.broadcast %1 : vector<1x1x4xf32> to vector<8x8x4xf32>
    %27 = arith.mulf %25, %26 : vector<8x8x4xf32>
    %28 = vector.broadcast %3 : vector<1x1x4xf32> to vector<8x8x4xf32>
    %29 = arith.addf %27, %28 : vector<8x8x4xf32>
    %cst_27 = arith.constant 0.000000e+00 : f32
    %30 = vector.broadcast %cst_27 : f32 to vector<8x8x4xf32>
    %31 = arith.maximumf %29, %30 : vector<8x8x4xf32>
    %32 = arith.truncf %31 : vector<8x8x4xf32> to vector<8x8x4xbf16>
    %c2 = arith.constant 2 : index
    %c0_28 = arith.constant 0 : index
    %c1_29 = arith.constant 1 : index
    %c0_30 = arith.constant 0 : index
    %33 = vector.load %arg10[%c2, %c0_28, %c1_29, %c0_30] : memref<4x9x9x4xbf16, #tpu.memory_space<vmem>>, vector<1x8x8x4xbf16>
    %34 = vector.shape_cast %33 : vector<1x8x8x4xbf16> to vector<8x8x4xbf16>
    %35 = vector.shape_cast %32 : vector<8x8x4xbf16> to vector<1x8x8x4xbf16>
    tpu.vector_store %arg10[%c2, %c0_28, %c1_29, %c0_30], %35 {strides = array<i32>} : memref<4x9x9x4xbf16, #tpu.memory_space<vmem>>, vector<1x8x8x4xbf16>,
    %c2_31 = arith.constant 2 : index
    %c0_32 = arith.constant 0 : index
    %c0_33 = arith.constant 0 : index
    %c0_34 = arith.constant 0 : index
    %36 = vector.load %arg1[%c2_31, %c0_32, %c0_33, %c0_34] : memref<4x8x8x4xbf16, #tpu.memory_space<vmem>>, vector<1x8x8x4xbf16>
    %37 = vector.shape_cast %36 : vector<1x8x8x4xbf16> to vector<8x8x4xbf16>
    %38 = arith.extf %37 : vector<8x8x4xbf16> to vector<8x8x4xf32>
    %39 = vector.broadcast %1 : vector<1x1x4xf32> to vector<8x8x4xf32>
    %40 = arith.mulf %38, %39 : vector<8x8x4xf32>
    %41 = vector.broadcast %3 : vector<1x1x4xf32> to vector<8x8x4xf32>
    %42 = arith.addf %40, %41 : vector<8x8x4xf32>
    %cst_35 = arith.constant 0.000000e+00 : f32
    %43 = vector.broadcast %cst_35 : f32 to vector<8x8x4xf32>
    %44 = arith.maximumf %42, %43 : vector<8x8x4xf32>
    %45 = arith.truncf %44 : vector<8x8x4xf32> to vector<8x8x4xbf16>
    %c1_36 = arith.constant 1 : index
    %c1_37 = arith.constant 1 : index
    %c0_38 = arith.constant 0 : index
    %c0_39 = arith.constant 0 : index
    %46 = vector.load %arg10[%c1_36, %c1_37, %c0_38, %c0_39] : memref<4x9x9x4xbf16, #tpu.memory_space<vmem>>, vector<1x8x8x4xbf16>
    %47 = vector.shape_cast %46 : vector<1x8x8x4xbf16> to vector<8x8x4xbf16>
    %48 = vector.shape_cast %45 : vector<8x8x4xbf16> to vector<1x8x8x4xbf16>
    tpu.vector_store %arg10[%c1_36, %c1_37, %c0_38, %c0_39], %48 {strides = array<i32>} : memref<4x9x9x4xbf16, #tpu.memory_space<vmem>>, vector<1x8x8x4xbf16>,
    %c3_40 = arith.constant 3 : index
    %c0_41 = arith.constant 0 : index
    %c0_42 = arith.constant 0 : index
    %c0_43 = arith.constant 0 : index
    %49 = vector.load %arg1[%c3_40, %c0_41, %c0_42, %c0_43] : memref<4x8x8x4xbf16, #tpu.memory_space<vmem>>, vector<1x8x8x4xbf16>
    %50 = vector.shape_cast %49 : vector<1x8x8x4xbf16> to vector<8x8x4xbf16>
    %51 = arith.extf %50 : vector<8x8x4xbf16> to vector<8x8x4xf32>
    %52 = vector.broadcast %1 : vector<1x1x4xf32> to vector<8x8x4xf32>
    %53 = arith.mulf %51, %52 : vector<8x8x4xf32>
    %54 = vector.broadcast %3 : vector<1x1x4xf32> to vector<8x8x4xf32>
    %55 = arith.addf %53, %54 : vector<8x8x4xf32>
    %cst_44 = arith.constant 0.000000e+00 : f32
    %56 = vector.broadcast %cst_44 : f32 to vector<8x8x4xf32>
    %57 = arith.maximumf %55, %56 : vector<8x8x4xf32>
    %58 = arith.truncf %57 : vector<8x8x4xf32> to vector<8x8x4xbf16>
    %c0_45 = arith.constant 0 : index
    %c1_46 = arith.constant 1 : index
    %c1_47 = arith.constant 1 : index
    %c0_48 = arith.constant 0 : index
    %59 = vector.load %arg10[%c0_45, %c1_46, %c1_47, %c0_48] : memref<4x9x9x4xbf16, #tpu.memory_space<vmem>>, vector<1x8x8x4xbf16>
    %60 = vector.shape_cast %59 : vector<1x8x8x4xbf16> to vector<8x8x4xbf16>
    %61 = vector.shape_cast %58 : vector<8x8x4xbf16> to vector<1x8x8x4xbf16>
    tpu.vector_store %arg10[%c0_45, %c1_46, %c1_47, %c0_48], %61 {strides = array<i32>} : memref<4x9x9x4xbf16, #tpu.memory_space<vmem>>, vector<1x8x8x4xbf16>,
    %cst_49 = arith.constant 0.000000e+00 : f32
    %62 = vector.broadcast %cst_49 : f32 to vector<64x128xf32>
    %c0_50 = arith.constant 0 : index
    %c0_51 = arith.constant 0 : index
    %c0_52 = arith.constant 0 : index
    %c0_53 = arith.constant 0 : index
    %63 = vector.load %arg10[%c0_50, %c0_51, %c0_52, %c0_53] : memref<4x9x9x4xbf16, #tpu.memory_space<vmem>>, vector<1x8x8x4xbf16>
    %64 = vector.shape_cast %63 : vector<1x8x8x4xbf16> to vector<8x8x4xbf16>
    %65 = vector.shape_cast %64 : vector<8x8x4xbf16> to vector<64x4xbf16>
    %c0_54 = arith.constant 0 : index
    %c0_55 = arith.constant 0 : index
    %c0_56 = arith.constant 0 : index
    %66 = vector.load %arg2[%c0_54, %c0_55, %c0_56] : memref<9x4x128xbf16, #tpu.memory_space<vmem>>, vector<1x4x128xbf16>
    %67 = vector.shape_cast %66 : vector<1x4x128xbf16> to vector<4x128xbf16>
    %cst_57 = arith.constant dense<0.000000e+00> : vector<64x128xf32>
    %68 = tpu.matmul %65, %67, %cst_57 {dimension_numbers = #tpu.dot_dimension_numbers<[1], [0], [0], [1], [0, 0, 1, 1], [], []>} : vector<64x4xbf16>, vector<4x128xbf16>, vector<64x128xf32> -> vector<64x128xf32>
    %69 = arith.addf %62, %68 : vector<64x128xf32>
    %c1_58 = arith.constant 1 : index
    %c0_59 = arith.constant 0 : index
    %c0_60 = arith.constant 0 : index
    %c0_61 = arith.constant 0 : index
    %70 = vector.load %arg10[%c1_58, %c0_59, %c0_60, %c0_61] : memref<4x9x9x4xbf16, #tpu.memory_space<vmem>>, vector<1x8x8x4xbf16>
    %71 = vector.shape_cast %70 : vector<1x8x8x4xbf16> to vector<8x8x4xbf16>
    %72 = vector.shape_cast %71 : vector<8x8x4xbf16> to vector<64x4xbf16>
    %c1_62 = arith.constant 1 : index
    %c0_63 = arith.constant 0 : index
    %c0_64 = arith.constant 0 : index
    %73 = vector.load %arg2[%c1_62, %c0_63, %c0_64] : memref<9x4x128xbf16, #tpu.memory_space<vmem>>, vector<1x4x128xbf16>
    %74 = vector.shape_cast %73 : vector<1x4x128xbf16> to vector<4x128xbf16>
    %cst_65 = arith.constant dense<0.000000e+00> : vector<64x128xf32>
    %75 = tpu.matmul %72, %74, %cst_65 {dimension_numbers = #tpu.dot_dimension_numbers<[1], [0], [0], [1], [0, 0, 1, 1], [], []>} : vector<64x4xbf16>, vector<4x128xbf16>, vector<64x128xf32> -> vector<64x128xf32>
    %76 = arith.addf %69, %75 : vector<64x128xf32>
    %c0_66 = arith.constant 0 : index
    %c0_67 = arith.constant 0 : index
    %c1_68 = arith.constant 1 : index
    %c0_69 = arith.constant 0 : index
    %77 = vector.load %arg10[%c0_66, %c0_67, %c1_68, %c0_69] : memref<4x9x9x4xbf16, #tpu.memory_space<vmem>>, vector<1x8x8x4xbf16>
    %78 = vector.shape_cast %77 : vector<1x8x8x4xbf16> to vector<8x8x4xbf16>
    %79 = vector.shape_cast %78 : vector<8x8x4xbf16> to vector<64x4xbf16>
    %c2_70 = arith.constant 2 : index
    %c0_71 = arith.constant 0 : index
    %c0_72 = arith.constant 0 : index
    %80 = vector.load %arg2[%c2_70, %c0_71, %c0_72] : memref<9x4x128xbf16, #tpu.memory_space<vmem>>, vector<1x4x128xbf16>
    %81 = vector.shape_cast %80 : vector<1x4x128xbf16> to vector<4x128xbf16>
    %cst_73 = arith.constant dense<0.000000e+00> : vector<64x128xf32>
    %82 = tpu.matmul %79, %81, %cst_73 {dimension_numbers = #tpu.dot_dimension_numbers<[1], [0], [0], [1], [0, 0, 1, 1], [], []>} : vector<64x4xbf16>, vector<4x128xbf16>, vector<64x128xf32> -> vector<64x128xf32>
    %83 = arith.addf %76, %82 : vector<64x128xf32>
    %c2_74 = arith.constant 2 : index
    %c0_75 = arith.constant 0 : index
    %c0_76 = arith.constant 0 : index
    %c0_77 = arith.constant 0 : index
    %84 = vector.load %arg10[%c2_74, %c0_75, %c0_76, %c0_77] : memref<4x9x9x4xbf16, #tpu.memory_space<vmem>>, vector<1x8x8x4xbf16>
    %85 = vector.shape_cast %84 : vector<1x8x8x4xbf16> to vector<8x8x4xbf16>
    %86 = vector.shape_cast %85 : vector<8x8x4xbf16> to vector<64x4xbf16>
    %c3_78 = arith.constant 3 : index
    %c0_79 = arith.constant 0 : index
    %c0_80 = arith.constant 0 : index
    %87 = vector.load %arg2[%c3_78, %c0_79, %c0_80] : memref<9x4x128xbf16, #tpu.memory_space<vmem>>, vector<1x4x128xbf16>
    %88 = vector.shape_cast %87 : vector<1x4x128xbf16> to vector<4x128xbf16>
    %cst_81 = arith.constant dense<0.000000e+00> : vector<64x128xf32>
    %89 = tpu.matmul %86, %88, %cst_81 {dimension_numbers = #tpu.dot_dimension_numbers<[1], [0], [0], [1], [0, 0, 1, 1], [], []>} : vector<64x4xbf16>, vector<4x128xbf16>, vector<64x128xf32> -> vector<64x128xf32>
    %90 = arith.addf %83, %89 : vector<64x128xf32>
    %c3_82 = arith.constant 3 : index
    %c0_83 = arith.constant 0 : index
    %c0_84 = arith.constant 0 : index
    %c0_85 = arith.constant 0 : index
    %91 = vector.load %arg10[%c3_82, %c0_83, %c0_84, %c0_85] : memref<4x9x9x4xbf16, #tpu.memory_space<vmem>>, vector<1x8x8x4xbf16>
    %92 = vector.shape_cast %91 : vector<1x8x8x4xbf16> to vector<8x8x4xbf16>
    %93 = vector.shape_cast %92 : vector<8x8x4xbf16> to vector<64x4xbf16>
    %c0_86 = arith.constant 0 : index
    %c0_87 = arith.constant 0 : index
    %94 = vector.load %arg8[%c0_86, %c0_87] : memref<4x256xbf16, #tpu.memory_space<vmem>>, vector<4x256xbf16>
    %cst_88 = arith.constant dense<0.000000e+00> : vector<64x256xf32>
    %95 = tpu.matmul %93, %94, %cst_88 {dimension_numbers = #tpu.dot_dimension_numbers<[1], [0], [0], [1], [0, 0, 1, 1], [], []>} : vector<64x4xbf16>, vector<4x256xbf16>, vector<64x256xf32> -> vector<64x256xf32>
    %96 = vector.extract_strided_slice %95 {offsets = [0, 0], sizes = [64, 128], strides = [1, 1]} : vector<64x256xf32> to vector<64x128xf32>
    %97 = arith.addf %90, %96 : vector<64x128xf32>
    %98 = vector.extract_strided_slice %95 {offsets = [0, 128], sizes = [64, 128], strides = [1, 1]} : vector<64x256xf32> to vector<64x128xf32>
    %c2_89 = arith.constant 2 : index
    %c0_90 = arith.constant 0 : index
    %c1_91 = arith.constant 1 : index
    %c0_92 = arith.constant 0 : index
    %99 = vector.load %arg10[%c2_89, %c0_90, %c1_91, %c0_92] : memref<4x9x9x4xbf16, #tpu.memory_space<vmem>>, vector<1x8x8x4xbf16>
    %100 = vector.shape_cast %99 : vector<1x8x8x4xbf16> to vector<8x8x4xbf16>
    %101 = vector.shape_cast %100 : vector<8x8x4xbf16> to vector<64x4xbf16>
    %c5 = arith.constant 5 : index
    %c0_93 = arith.constant 0 : index
    %c0_94 = arith.constant 0 : index
    %102 = vector.load %arg2[%c5, %c0_93, %c0_94] : memref<9x4x128xbf16, #tpu.memory_space<vmem>>, vector<1x4x128xbf16>
    %103 = vector.shape_cast %102 : vector<1x4x128xbf16> to vector<4x128xbf16>
    %cst_95 = arith.constant dense<0.000000e+00> : vector<64x128xf32>
    %104 = tpu.matmul %101, %103, %cst_95 {dimension_numbers = #tpu.dot_dimension_numbers<[1], [0], [0], [1], [0, 0, 1, 1], [], []>} : vector<64x4xbf16>, vector<4x128xbf16>, vector<64x128xf32> -> vector<64x128xf32>
    %105 = arith.addf %97, %104 : vector<64x128xf32>
    %c0_96 = arith.constant 0 : index
    %c1_97 = arith.constant 1 : index
    %c0_98 = arith.constant 0 : index
    %c0_99 = arith.constant 0 : index
    %106 = vector.load %arg10[%c0_96, %c1_97, %c0_98, %c0_99] : memref<4x9x9x4xbf16, #tpu.memory_space<vmem>>, vector<1x8x8x4xbf16>
    %107 = vector.shape_cast %106 : vector<1x8x8x4xbf16> to vector<8x8x4xbf16>
    %108 = vector.shape_cast %107 : vector<8x8x4xbf16> to vector<64x4xbf16>
    %c6 = arith.constant 6 : index
    %c0_100 = arith.constant 0 : index
    %c0_101 = arith.constant 0 : index
    %109 = vector.load %arg2[%c6, %c0_100, %c0_101] : memref<9x4x128xbf16, #tpu.memory_space<vmem>>, vector<1x4x128xbf16>
    %110 = vector.shape_cast %109 : vector<1x4x128xbf16> to vector<4x128xbf16>
    %cst_102 = arith.constant dense<0.000000e+00> : vector<64x128xf32>
    %111 = tpu.matmul %108, %110, %cst_102 {dimension_numbers = #tpu.dot_dimension_numbers<[1], [0], [0], [1], [0, 0, 1, 1], [], []>} : vector<64x4xbf16>, vector<4x128xbf16>, vector<64x128xf32> -> vector<64x128xf32>
    %112 = arith.addf %105, %111 : vector<64x128xf32>
    %c1_103 = arith.constant 1 : index
    %c1_104 = arith.constant 1 : index
    %c0_105 = arith.constant 0 : index
    %c0_106 = arith.constant 0 : index
    %113 = vector.load %arg10[%c1_103, %c1_104, %c0_105, %c0_106] : memref<4x9x9x4xbf16, #tpu.memory_space<vmem>>, vector<1x8x8x4xbf16>
    %114 = vector.shape_cast %113 : vector<1x8x8x4xbf16> to vector<8x8x4xbf16>
    %115 = vector.shape_cast %114 : vector<8x8x4xbf16> to vector<64x4xbf16>
    %c7 = arith.constant 7 : index
    %c0_107 = arith.constant 0 : index
    %c0_108 = arith.constant 0 : index
    %116 = vector.load %arg2[%c7, %c0_107, %c0_108] : memref<9x4x128xbf16, #tpu.memory_space<vmem>>, vector<1x4x128xbf16>
    %117 = vector.shape_cast %116 : vector<1x4x128xbf16> to vector<4x128xbf16>
    %cst_109 = arith.constant dense<0.000000e+00> : vector<64x128xf32>
    %118 = tpu.matmul %115, %117, %cst_109 {dimension_numbers = #tpu.dot_dimension_numbers<[1], [0], [0], [1], [0, 0, 1, 1], [], []>} : vector<64x4xbf16>, vector<4x128xbf16>, vector<64x128xf32> -> vector<64x128xf32>
    %119 = arith.addf %112, %118 : vector<64x128xf32>
    %c0_110 = arith.constant 0 : index
    %c1_111 = arith.constant 1 : index
    %c1_112 = arith.constant 1 : index
    %c0_113 = arith.constant 0 : index
    %120 = vector.load %arg10[%c0_110, %c1_111, %c1_112, %c0_113] : memref<4x9x9x4xbf16, #tpu.memory_space<vmem>>, vector<1x8x8x4xbf16>
    %121 = vector.shape_cast %120 : vector<1x8x8x4xbf16> to vector<8x8x4xbf16>
    %122 = vector.shape_cast %121 : vector<8x8x4xbf16> to vector<64x4xbf16>
    %c8 = arith.constant 8 : index
    %c0_114 = arith.constant 0 : index
    %c0_115 = arith.constant 0 : index
    %123 = vector.load %arg2[%c8, %c0_114, %c0_115] : memref<9x4x128xbf16, #tpu.memory_space<vmem>>, vector<1x4x128xbf16>
    %124 = vector.shape_cast %123 : vector<1x4x128xbf16> to vector<4x128xbf16>
    %cst_116 = arith.constant dense<0.000000e+00> : vector<64x128xf32>
    %125 = tpu.matmul %122, %124, %cst_116 {dimension_numbers = #tpu.dot_dimension_numbers<[1], [0], [0], [1], [0, 0, 1, 1], [], []>} : vector<64x4xbf16>, vector<4x128xbf16>, vector<64x128xf32> -> vector<64x128xf32>
    %126 = arith.addf %119, %125 : vector<64x128xf32>
    %127 = vector.broadcast %4 : vector<1x128xf32> to vector<64x128xf32>
    %128 = arith.mulf %126, %127 : vector<64x128xf32>
    %129 = vector.broadcast %5 : vector<1x128xf32> to vector<64x128xf32>
    %130 = arith.addf %128, %129 : vector<64x128xf32>
    %cst_117 = arith.constant 0.000000e+00 : f32
    %131 = vector.broadcast %cst_117 : f32 to vector<64x128xf32>
    %132 = arith.maximumf %130, %131 : vector<64x128xf32>
    %133 = vector.shape_cast %132 : vector<64x128xf32> to vector<8x8x128xf32>
    %134 = arith.truncf %133 : vector<8x8x128xf32> to vector<8x8x128xbf16>
    %c0_118 = arith.constant 0 : index
    %c1_119 = arith.constant 1 : index
    %c1_120 = arith.constant 1 : index
    %c0_121 = arith.constant 0 : index
    %135 = vector.load %arg11[%c0_118, %c1_119, %c1_120, %c0_121] : memref<1x10x10x128xbf16, #tpu.memory_space<vmem>>, vector<1x8x8x128xbf16>
    %136 = vector.shape_cast %135 : vector<1x8x8x128xbf16> to vector<8x8x128xbf16>
    %137 = vector.shape_cast %134 : vector<8x8x128xbf16> to vector<1x8x8x128xbf16>
    tpu.vector_store %arg11[%c0_118, %c1_119, %c1_120, %c0_121], %137 {strides = array<i32>} : memref<1x10x10x128xbf16, #tpu.memory_space<vmem>>, vector<1x8x8x128xbf16>,
    %c0_122 = arith.constant 0 : index
    %c0_123 = arith.constant 0 : index
    %c0_124 = arith.constant 0 : index
    %c0_125 = arith.constant 0 : index
    %138 = vector.load %arg11[%c0_122, %c0_123, %c0_124, %c0_125] : memref<1x10x10x128xbf16, #tpu.memory_space<vmem>>, vector<1x8x8x128xbf16>
    %139 = vector.shape_cast %138 : vector<1x8x8x128xbf16> to vector<8x8x128xbf16>
    %140 = vector.shape_cast %139 : vector<8x8x128xbf16> to vector<64x128xbf16>
    %c0_126 = arith.constant 0 : index
    %c0_127 = arith.constant 0 : index
    %c0_128 = arith.constant 0 : index
    %141 = vector.load %arg3[%c0_126, %c0_127, %c0_128] : memref<9x128x128xbf16, #tpu.memory_space<vmem>>, vector<1x128x128xbf16>
    %142 = vector.shape_cast %141 : vector<1x128x128xbf16> to vector<128x128xbf16>
    %cst_129 = arith.constant dense<0.000000e+00> : vector<64x128xf32>
    %143 = tpu.matmul %140, %142, %cst_129 {dimension_numbers = #tpu.dot_dimension_numbers<[1], [0], [0], [1], [0, 0, 1, 1], [], []>} : vector<64x128xbf16>, vector<128x128xbf16>, vector<64x128xf32> -> vector<64x128xf32>
    %144 = arith.addf %98, %143 : vector<64x128xf32>
    %c0_130 = arith.constant 0 : index
    %c0_131 = arith.constant 0 : index
    %c1_132 = arith.constant 1 : index
    %c0_133 = arith.constant 0 : index
    %145 = vector.load %arg11[%c0_130, %c0_131, %c1_132, %c0_133] : memref<1x10x10x128xbf16, #tpu.memory_space<vmem>>, vector<1x8x8x128xbf16>
    %146 = vector.shape_cast %145 : vector<1x8x8x128xbf16> to vector<8x8x128xbf16>
    %147 = vector.shape_cast %146 : vector<8x8x128xbf16> to vector<64x128xbf16>
    %c1_134 = arith.constant 1 : index
    %c0_135 = arith.constant 0 : index
    %c0_136 = arith.constant 0 : index
    %148 = vector.load %arg3[%c1_134, %c0_135, %c0_136] : memref<9x128x128xbf16, #tpu.memory_space<vmem>>, vector<1x128x128xbf16>
    %149 = vector.shape_cast %148 : vector<1x128x128xbf16> to vector<128x128xbf16>
    %cst_137 = arith.constant dense<0.000000e+00> : vector<64x128xf32>
    %150 = tpu.matmul %147, %149, %cst_137 {dimension_numbers = #tpu.dot_dimension_numbers<[1], [0], [0], [1], [0, 0, 1, 1], [], []>} : vector<64x128xbf16>, vector<128x128xbf16>, vector<64x128xf32> -> vector<64x128xf32>
    %151 = arith.addf %144, %150 : vector<64x128xf32>
    %c0_138 = arith.constant 0 : index
    %c0_139 = arith.constant 0 : index
    %c2_140 = arith.constant 2 : index
    %c0_141 = arith.constant 0 : index
    %152 = vector.load %arg11[%c0_138, %c0_139, %c2_140, %c0_141] : memref<1x10x10x128xbf16, #tpu.memory_space<vmem>>, vector<1x8x8x128xbf16>
    %153 = vector.shape_cast %152 : vector<1x8x8x128xbf16> to vector<8x8x128xbf16>
    %154 = vector.shape_cast %153 : vector<8x8x128xbf16> to vector<64x128xbf16>
    %c2_142 = arith.constant 2 : index
    %c0_143 = arith.constant 0 : index
    %c0_144 = arith.constant 0 : index
    %155 = vector.load %arg3[%c2_142, %c0_143, %c0_144] : memref<9x128x128xbf16, #tpu.memory_space<vmem>>, vector<1x128x128xbf16>
    %156 = vector.shape_cast %155 : vector<1x128x128xbf16> to vector<128x128xbf16>
    %cst_145 = arith.constant dense<0.000000e+00> : vector<64x128xf32>
    %157 = tpu.matmul %154, %156, %cst_145 {dimension_numbers = #tpu.dot_dimension_numbers<[1], [0], [0], [1], [0, 0, 1, 1], [], []>} : vector<64x128xbf16>, vector<128x128xbf16>, vector<64x128xf32> -> vector<64x128xf32>
    %158 = arith.addf %151, %157 : vector<64x128xf32>
    %c0_146 = arith.constant 0 : index
    %c1_147 = arith.constant 1 : index
    %c0_148 = arith.constant 0 : index
    %c0_149 = arith.constant 0 : index
    %159 = vector.load %arg11[%c0_146, %c1_147, %c0_148, %c0_149] : memref<1x10x10x128xbf16, #tpu.memory_space<vmem>>, vector<1x8x8x128xbf16>
    %160 = vector.shape_cast %159 : vector<1x8x8x128xbf16> to vector<8x8x128xbf16>
    %161 = vector.shape_cast %160 : vector<8x8x128xbf16> to vector<64x128xbf16>
    %c3_150 = arith.constant 3 : index
    %c0_151 = arith.constant 0 : index
    %c0_152 = arith.constant 0 : index
    %162 = vector.load %arg3[%c3_150, %c0_151, %c0_152] : memref<9x128x128xbf16, #tpu.memory_space<vmem>>, vector<1x128x128xbf16>
    %163 = vector.shape_cast %162 : vector<1x128x128xbf16> to vector<128x128xbf16>
    %cst_153 = arith.constant dense<0.000000e+00> : vector<64x128xf32>
    %164 = tpu.matmul %161, %163, %cst_153 {dimension_numbers = #tpu.dot_dimension_numbers<[1], [0], [0], [1], [0, 0, 1, 1], [], []>} : vector<64x128xbf16>, vector<128x128xbf16>, vector<64x128xf32> -> vector<64x128xf32>
    %165 = arith.addf %158, %164 : vector<64x128xf32>
    %c0_154 = arith.constant 0 : index
    %c1_155 = arith.constant 1 : index
    %c1_156 = arith.constant 1 : index
    %c0_157 = arith.constant 0 : index
    %166 = vector.load %arg11[%c0_154, %c1_155, %c1_156, %c0_157] : memref<1x10x10x128xbf16, #tpu.memory_space<vmem>>, vector<1x8x8x128xbf16>
    %167 = vector.shape_cast %166 : vector<1x8x8x128xbf16> to vector<8x8x128xbf16>
    %168 = vector.shape_cast %167 : vector<8x8x128xbf16> to vector<64x128xbf16>
    %c4 = arith.constant 4 : index
    %c0_158 = arith.constant 0 : index
    %c0_159 = arith.constant 0 : index
    %169 = vector.load %arg3[%c4, %c0_158, %c0_159] : memref<9x128x128xbf16, #tpu.memory_space<vmem>>, vector<1x128x128xbf16>
    %170 = vector.shape_cast %169 : vector<1x128x128xbf16> to vector<128x128xbf16>
    %cst_160 = arith.constant dense<0.000000e+00> : vector<64x128xf32>
    %171 = tpu.matmul %168, %170, %cst_160 {dimension_numbers = #tpu.dot_dimension_numbers<[1], [0], [0], [1], [0, 0, 1, 1], [], []>} : vector<64x128xbf16>, vector<128x128xbf16>, vector<64x128xf32> -> vector<64x128xf32>
    %172 = arith.addf %165, %171 : vector<64x128xf32>
    %c0_161 = arith.constant 0 : index
    %c1_162 = arith.constant 1 : index
    %c2_163 = arith.constant 2 : index
    %c0_164 = arith.constant 0 : index
    %173 = vector.load %arg11[%c0_161, %c1_162, %c2_163, %c0_164] : memref<1x10x10x128xbf16, #tpu.memory_space<vmem>>, vector<1x8x8x128xbf16>
    %174 = vector.shape_cast %173 : vector<1x8x8x128xbf16> to vector<8x8x128xbf16>
    %175 = vector.shape_cast %174 : vector<8x8x128xbf16> to vector<64x128xbf16>
    %c5_165 = arith.constant 5 : index
    %c0_166 = arith.constant 0 : index
    %c0_167 = arith.constant 0 : index
    %176 = vector.load %arg3[%c5_165, %c0_166, %c0_167] : memref<9x128x128xbf16, #tpu.memory_space<vmem>>, vector<1x128x128xbf16>
    %177 = vector.shape_cast %176 : vector<1x128x128xbf16> to vector<128x128xbf16>
    %cst_168 = arith.constant dense<0.000000e+00> : vector<64x128xf32>
    %178 = tpu.matmul %175, %177, %cst_168 {dimension_numbers = #tpu.dot_dimension_numbers<[1], [0], [0], [1], [0, 0, 1, 1], [], []>} : vector<64x128xbf16>, vector<128x128xbf16>, vector<64x128xf32> -> vector<64x128xf32>
    %179 = arith.addf %172, %178 : vector<64x128xf32>
    %c0_169 = arith.constant 0 : index
    %c2_170 = arith.constant 2 : index
    %c0_171 = arith.constant 0 : index
    %c0_172 = arith.constant 0 : index
    %180 = vector.load %arg11[%c0_169, %c2_170, %c0_171, %c0_172] : memref<1x10x10x128xbf16, #tpu.memory_space<vmem>>, vector<1x8x8x128xbf16>
    %181 = vector.shape_cast %180 : vector<1x8x8x128xbf16> to vector<8x8x128xbf16>
    %182 = vector.shape_cast %181 : vector<8x8x128xbf16> to vector<64x128xbf16>
    %c6_173 = arith.constant 6 : index
    %c0_174 = arith.constant 0 : index
    %c0_175 = arith.constant 0 : index
    %183 = vector.load %arg3[%c6_173, %c0_174, %c0_175] : memref<9x128x128xbf16, #tpu.memory_space<vmem>>, vector<1x128x128xbf16>
    %184 = vector.shape_cast %183 : vector<1x128x128xbf16> to vector<128x128xbf16>
    %cst_176 = arith.constant dense<0.000000e+00> : vector<64x128xf32>
    %185 = tpu.matmul %182, %184, %cst_176 {dimension_numbers = #tpu.dot_dimension_numbers<[1], [0], [0], [1], [0, 0, 1, 1], [], []>} : vector<64x128xbf16>, vector<128x128xbf16>, vector<64x128xf32> -> vector<64x128xf32>
    %186 = arith.addf %179, %185 : vector<64x128xf32>
    %c0_177 = arith.constant 0 : index
    %c2_178 = arith.constant 2 : index
    %c1_179 = arith.constant 1 : index
    %c0_180 = arith.constant 0 : index
    %187 = vector.load %arg11[%c0_177, %c2_178, %c1_179, %c0_180] : memref<1x10x10x128xbf16, #tpu.memory_space<vmem>>, vector<1x8x8x128xbf16>
    %188 = vector.shape_cast %187 : vector<1x8x8x128xbf16> to vector<8x8x128xbf16>
    %189 = vector.shape_cast %188 : vector<8x8x128xbf16> to vector<64x128xbf16>
    %c7_181 = arith.constant 7 : index
    %c0_182 = arith.constant 0 : index
    %c0_183 = arith.constant 0 : index
    %190 = vector.load %arg3[%c7_181, %c0_182, %c0_183] : memref<9x128x128xbf16, #tpu.memory_space<vmem>>, vector<1x128x128xbf16>
    %191 = vector.shape_cast %190 : vector<1x128x128xbf16> to vector<128x128xbf16>
    %cst_184 = arith.constant dense<0.000000e+00> : vector<64x128xf32>
    %192 = tpu.matmul %189, %191, %cst_184 {dimension_numbers = #tpu.dot_dimension_numbers<[1], [0], [0], [1], [0, 0, 1, 1], [], []>} : vector<64x128xbf16>, vector<128x128xbf16>, vector<64x128xf32> -> vector<64x128xf32>
    %193 = arith.addf %186, %192 : vector<64x128xf32>
    %c0_185 = arith.constant 0 : index
    %c2_186 = arith.constant 2 : index
    %c2_187 = arith.constant 2 : index
    %c0_188 = arith.constant 0 : index
    %194 = vector.load %arg11[%c0_185, %c2_186, %c2_187, %c0_188] : memref<1x10x10x128xbf16, #tpu.memory_space<vmem>>, vector<1x8x8x128xbf16>
    %195 = vector.shape_cast %194 : vector<1x8x8x128xbf16> to vector<8x8x128xbf16>
    %196 = vector.shape_cast %195 : vector<8x8x128xbf16> to vector<64x128xbf16>
    %c8_189 = arith.constant 8 : index
    %c0_190 = arith.constant 0 : index
    %c0_191 = arith.constant 0 : index
    %197 = vector.load %arg3[%c8_189, %c0_190, %c0_191] : memref<9x128x128xbf16, #tpu.memory_space<vmem>>, vector<1x128x128xbf16>
    %198 = vector.shape_cast %197 : vector<1x128x128xbf16> to vector<128x128xbf16>
    %cst_192 = arith.constant dense<0.000000e+00> : vector<64x128xf32>
    %199 = tpu.matmul %196, %198, %cst_192 {dimension_numbers = #tpu.dot_dimension_numbers<[1], [0], [0], [1], [0, 0, 1, 1], [], []>} : vector<64x128xbf16>, vector<128x128xbf16>, vector<64x128xf32> -> vector<64x128xf32>
    %200 = arith.addf %193, %199 : vector<64x128xf32>
    %201 = vector.shape_cast %200 : vector<64x128xf32> to vector<8x8x128xf32>
    %c0_193 = arith.constant 0 : index
    %c0_194 = arith.constant 0 : index
    %c0_195 = arith.constant 0 : index
    %c0_196 = arith.constant 0 : index
    %202 = vector.load %arg9[%c0_193, %c0_194, %c0_195, %c0_196] : memref<1x8x8x128xf32, #tpu.memory_space<vmem>>, vector<1x8x8x128xf32>
    %203 = vector.shape_cast %202 : vector<1x8x8x128xf32> to vector<8x8x128xf32>
    %204 = vector.shape_cast %201 : vector<8x8x128xf32> to vector<1x8x8x128xf32>
    tpu.vector_store %arg9[%c0_193, %c0_194, %c0_195, %c0_196], %204 {strides = array<i32>} : memref<1x8x8x128xf32, #tpu.memory_space<vmem>>, vector<1x8x8x128xf32>,
    return
  }
  func.func @transform_0(%arg0: i32) -> (i32, i32, i32, i32) {
    %c0_i32 = arith.constant 0 : i32
    %c0_i32_0 = arith.constant 0 : i32
    %c0_i32_1 = arith.constant 0 : i32
    %c0_i32_2 = arith.constant 0 : i32
    return %arg0, %c0_i32, %c0_i32_0, %c0_i32_1 : i32, i32, i32, i32
  }
  func.func @transform_1(%arg0: i32) -> (i32, i32, i32) {
    %c0_i32 = arith.constant 0 : i32
    %c0_i32_0 = arith.constant 0 : i32
    %c0_i32_1 = arith.constant 0 : i32
    %c0_i32_2 = arith.constant 0 : i32
    return %c0_i32, %c0_i32_0, %c0_i32_1 : i32, i32, i32
  }
  func.func @transform_2(%arg0: i32) -> (i32, i32, i32) {
    %c0_i32 = arith.constant 0 : i32
    %c0_i32_0 = arith.constant 0 : i32
    %c0_i32_1 = arith.constant 0 : i32
    %c0_i32_2 = arith.constant 0 : i32
    return %c0_i32, %c0_i32_0, %c0_i32_1 : i32, i32, i32
  }
  func.func @transform_3(%arg0: i32) -> (i32, i32) {
    %c0_i32 = arith.constant 0 : i32
    %c0_i32_0 = arith.constant 0 : i32
    %c0_i32_1 = arith.constant 0 : i32
    return %c0_i32, %c0_i32_0 : i32, i32
  }
  func.func @transform_4(%arg0: i32) -> (i32, i32) {
    %c0_i32 = arith.constant 0 : i32
    %c0_i32_0 = arith.constant 0 : i32
    %c0_i32_1 = arith.constant 0 : i32
    return %c0_i32, %c0_i32_0 : i32, i32
  }
  func.func @transform_5(%arg0: i32) -> (i32, i32) {
    %c0_i32 = arith.constant 0 : i32
    %c0_i32_0 = arith.constant 0 : i32
    %c0_i32_1 = arith.constant 0 : i32
    return %c0_i32, %c0_i32_0 : i32, i32
  }
  func.func @transform_6(%arg0: i32) -> (i32, i32) {
    %c0_i32 = arith.constant 0 : i32
    %c0_i32_0 = arith.constant 0 : i32
    %c0_i32_1 = arith.constant 0 : i32
    return %c0_i32, %c0_i32_0 : i32, i32
  }
  func.func @transform_7(%arg0: i32) -> (i32, i32) {
    %c0_i32 = arith.constant 0 : i32
    %c0_i32_0 = arith.constant 0 : i32
    %c0_i32_1 = arith.constant 0 : i32
    return %c0_i32, %c0_i32_0 : i32, i32
  }
  func.func @transform_8(%arg0: i32) -> (i32, i32, i32, i32) {
    %c0_i32 = arith.constant 0 : i32
    %c0_i32_0 = arith.constant 0 : i32
    %c0_i32_1 = arith.constant 0 : i32
    %c0_i32_2 = arith.constant 0 : i32
    return %arg0, %c0_i32, %c0_i32_0, %c0_i32_1 : i32, i32, i32, i32
  }
}

</mosaic_0001>

<bundles_post_ra>
// kernel: tpu_custom_call.1
= control target key start
LH: loop header
LB: loop body
LE: loop exit
PB: predicated region body
PF: predicated region fallthrough
CT: control target
= control target key end

     0   :  { %13 = vsyncpa [#allocation5], 0  ;;  %s7674_s0 = inlined_call_operand.hbm [shape: bf16[8,8,8,4], index: 0, kind: input, shape index: {}]   ;;  %s7675_s1 = inlined_call_operand.hbm [shape: bf16[9,4,128], index: 1, kind: input, shape index: {}]   ;;  %s7676_s2 = inlined_call_operand.hbm [shape: bf16[9,128,128], index: 2, kind: input, shape index: {}]   ;;  %s7677_s3 = inlined_call_operand.hbm [shape: f32[1,4], index: 3, kind: input, shape index: {}]   ;;  %s7678_s4 = inlined_call_operand.hbm [shape: f32[1,4], index: 4, kind: input, shape index: {}]   ;;  %s7679_s5 = inlined_call_operand.hbm [shape: f32[1,128], index: 5, kind: input, shape index: {}]   ;;  %s7680_s6 = inlined_call_operand.hbm [shape: f32[1,128], index: 6, kind: input, shape index: {}]   ;;  %s7681_s7 = inlined_call_operand.hbm [shape: bf16[4,256], index: 7, kind: input, shape index: {}]   ;;  %s7682_s8 = inlined_call_operand.hbm [shape: f32[2,8,8,128], index: 8, kind: output, shape index: {}]  }
   0x1   :  { %15 = vsyncpa [#allocation5 + $0x1], 0 }
   0x2   :  { %16 = vsyncpa [#allocation8], 0 }
   0x3   :  { %17 = vsyncpa [#allocation11], 0 }
   0x4   :  { %18 = vsyncpa [#allocation14], 0 }
   0x5   :  { %19 = vsyncpa [#allocation17], 0 }
   0x6   :  { %20 = vsyncpa [#allocation6], 0 }
   0x7   :  { %22 = vsyncpa [#allocation6 + $0x1], 0  ;;  %s6358_s27 = smov 0   ;;  %s6360_s28 = smov 0  }
   0x8   :  { %s6362_s29 = smov 0   ;;  %s6364_s30 = smov 0  }
   0x9 LB: > { %s6297_s9 = smov [#allocation7]   ;;  %s6379_s11 = sadd.s32 4294967295, %s6295_s30   ;;  %s6295_s30 = sphi %s6364_s30, %s7725_s30   ;;  %s6291_s29 = sphi %s6362_s29, %s7724_s29   ;;  %s6287_s28 = sphi %s6360_s28, %s7723_s28   ;;  %s6283_s27 = sphi %s6358_s27, %s7722_s27  }
   0xa   : > { %s244_s10 = sshll.u32 %s6297_s9, 4  ;;  %p4884_p0 = scmp.ge.s32.totalorder %s6295_s30, 1  ;;  %s6384_s10 = int_to_ptr.vmem [resolvable:$true] %s244_s10 }
   0xb   : > { %p7683_p1 = scmp.eq.s32.totalorder %s6379_s11, 0  ;;  %p232_p2 = scmp.lt.s32.totalorder %s6295_s30, 3 }
   0xc   : > { %s6298_s13 = smov [#allocation10]   ;;  %s6299_s16 = smov [#allocation13]  }
   0xd   : > { %p6386_p3 = pnand %p4884_p0, %p232_p2  ;;  %s271_s14 = sshll.u32 %s6298_s13, 4  ;;  %s6399_s14 = int_to_ptr.vmem [resolvable:$true] %s271_s14 }
   0xe   : > { %s293_s17 = sshll.u32 %s6299_s16, 4  ;;  %s5987_s20 = scalar_lea.hbm %s7675_s1, 288  ;;  %s6401_s17 = int_to_ptr.vmem [resolvable:$true] %s293_s17 }
   0xf   : > { %s7688_s12 = scalar_select %p6386_p3, 1, 0 }
  0x10   : > { %p5784_p5 = pneg %p6386_p3  ;;  %p5988_p7 = scmp.ne.s32.totalorder %s7675_s1, %s5987_s20 }
  0x11   : > { %p5994_p11 = scmp.lt.u32.totalorder %s5987_s20, %s7675_s1 }
  0x12   : > { %p6395_p6 = pnand %p5784_p5, %p7683_p1 }
  0x14   : > { %p6411_p8 = pneg %p6395_p6 }
  0x16   : > { %p5990_p9 = pnand %p6411_p8, %p5988_p7 }
  0x18   : > { %p5991_p10 = pneg %p5990_p9 }
  0x1a   : > { %p5996_p12 = pnand %p5994_p11, %p5991_p10 }
  0x1c   : > { %5999 = shalt.err (!%p5996_p12)
}
  0x1d   : > { %s6000_s26 = scalar_lea.vmem %s6384_s10, 288  ;;  %p6008_p5 = scmp.lt.s32.totalorder %s6384_s10, %s6384_s10 }
  0x1e   : > { %p6001_p13 = scmp.ne.s32.totalorder %s6384_s10, %s6000_s26  ;;  %p6009_p4 = scmp.lt.s32.totalorder %s6000_s26, %s6000_s26 }
  0x20   : > { %p6003_p0 = pnand %p6001_p13, %p6411_p8  ;;  %p6010_p7 = por %p6009_p4, %p6008_p5 }
  0x22   : > { %p6004_p2 = pneg %p6003_p0 }
  0x24   : > { %p6011_p9 = pnand %p6010_p7, %p6004_p2 }
  0x26   : > { %6014 = shalt.err (!%p6011_p9)
}
  0x27   : > { %s6300_s9 = smov 32   ;;  %s6301_s13 = smov 2  }
  0x28   : > { %5787 = dma.hbm_to_vmem [thread:$0]  (!%p6395_p6), %s7675_s1, 288, %s6384_s10, [#allocation8], %s6300_s9, %s6300_s9, %s6301_s13  }
  0x29   : > { %s6015_s21 = scalar_lea.hbm %s7677_s3, 16 }
  0x2a   : > { %p6016_p4 = scmp.ne.s32.totalorder %s7677_s3, %s6015_s21  ;;  %p6022_p12 = scmp.lt.u32.totalorder %s6015_s21, %s7677_s3 }
  0x2c   : > { %p6018_p10 = pnand %p6016_p4, %p6411_p8 }
  0x2e   : > { %p6019_p11 = pneg %p6018_p10 }
  0x30   : > { %p6024_p13 = pnand %p6022_p12, %p6019_p11 }
  0x32   : > { %6027 = shalt.err (!%p6024_p13)
}
  0x33   : > { %s6028_s10 = scalar_lea.vmem %s6399_s14, 16  ;;  %s6035_s9 = scalar_lea.vmem %s6399_s14, 32 }
  0x34   : > { %p6029_p0 = scmp.ne.s32.totalorder %s6399_s14, %s6028_s10  ;;  %p6036_p7 = scmp.lt.s32.totalorder %s6399_s14, %s6399_s14 }
  0x35   : > { %p6037_p9 = scmp.lt.s32.totalorder %s6035_s9, %s6028_s10 }
  0x36   : > { %p6031_p2 = pnand %p6029_p0, %p6411_p8 }
  0x37   : > { %p6038_p4 = por %p6037_p9, %p6036_p7 }
  0x38   : > { %p6032_p5 = pneg %p6031_p2 }
  0x3a   : > { %p6039_p10 = pnand %p6038_p4, %p6032_p5 }
  0x3c   : > { %6042 = shalt.err (!%p6039_p10)
}
  0x3d   : > { %5793 = dma.hbm_to_vmem [thread:$0]  (!%p6395_p6), %s7677_s3, 16, %s6399_s14, [#allocation11]  }
  0x3e   : > { %s6043_s20 = scalar_lea.hbm %s7679_s5, 16 }
  0x3f   : > { %p6044_p11 = scmp.ne.s32.totalorder %s7679_s5, %s6043_s20  ;;  %p6050_p0 = scmp.lt.u32.totalorder %s6043_s20, %s7679_s5 }
  0x41   : > { %p6046_p12 = pnand %p6044_p11, %p6411_p8 }
  0x43   : > { %p6047_p13 = pneg %p6046_p12 }
  0x45   : > { %p6052_p2 = pnand %p6050_p0, %p6047_p13 }
  0x47   : > { %6055 = shalt.err (!%p6052_p2)
}
  0x48   : > { %s6056_s14 = scalar_lea.vmem %s6401_s17, 16  ;;  %s6063_s26 = scalar_lea.vmem %s6401_s17, 32 }
  0x49   : > { %p6057_p5 = scmp.ne.s32.totalorder %s6401_s17, %s6056_s14  ;;  %p6064_p4 = scmp.lt.s32.totalorder %s6401_s17, %s6401_s17 }
  0x4a   : > { %p6065_p10 = scmp.lt.s32.totalorder %s6063_s26, %s6056_s14 }
  0x4b   : > { %p6059_p7 = pnand %p6057_p5, %p6411_p8 }
  0x4c   : > { %p6066_p11 = por %p6065_p10, %p6064_p4 }
  0x4d   : > { %p6060_p9 = pneg %p6059_p7 }
  0x4f   : > { %p6067_p12 = pnand %p6066_p11, %p6060_p9 }
  0x51   : > { %6070 = shalt.err (!%p6067_p12)
}
  0x52   : > { %5799 = dma.hbm_to_vmem [thread:$0]  (!%p6395_p6), %s7679_s5, 16, %s6401_s17, [#allocation14]  }
  0x53   : > { %s6302_s13 = smov [#allocation9]   ;;  %s6071_s20 = scalar_lea.hbm %s7676_s2, 9216 }
  0x54   : > { %s257_s16 = sshll.u32 %s6302_s13, 4  ;;  %p6072_p13 = scmp.ne.s32.totalorder %s7676_s2, %s6071_s20  ;;  %s258_s16 = int_to_ptr.vmem [resolvable:$true] %s257_s16 }
  0x55   : > { %p6078_p5 = scmp.lt.u32.totalorder %s6071_s20, %s7676_s2 }
  0x56   : > { %p6074_p0 = pnand %p6072_p13, %p6411_p8 }
  0x58   : > { %p6075_p2 = pneg %p6074_p0 }
  0x5a   : > { %p6080_p7 = pnand %p6078_p5, %p6075_p2 }
  0x5c   : > { %6083 = shalt.err (!%p6080_p7)
}
  0x5d   : > { %s6084_s17 = scalar_lea.vmem %s258_s16, 9216  ;;  %p6092_p11 = scmp.lt.s32.totalorder %s258_s16, %s258_s16 }
  0x5e   : > { %p6085_p9 = scmp.ne.s32.totalorder %s258_s16, %s6084_s17  ;;  %p6093_p12 = scmp.lt.s32.totalorder %s6084_s17, %s6084_s17 }
  0x60   : > { %p6087_p4 = pnand %p6085_p9, %p6411_p8  ;;  %p6094_p1 = por %p6093_p12, %p6092_p11 }
  0x62   : > { %p6088_p10 = pneg %p6087_p4 }
  0x64   : > { %p6095_p3 = pnand %p6094_p1, %p6088_p10 }
  0x66   : > { %6098 = shalt.err (!%p6095_p3)
}
  0x67   : > { %s7685_s14 = smov 64   ;;  %s7686_s26 = smov 4  }
  0x68   : > { %5790 = dma.hbm_to_vmem [thread:$0]  (!%p6395_p6), %s7676_s2, 9216, %s258_s16, [#allocation8], %s7685_s14, %s7685_s14, %s7686_s26  }
  0x69   : > { %s6305_s13 = smov [#allocation12]   ;;  %s6306_s19 = smov [#allocation15]  }
  0x6a   : > { %s282_s18 = sshll.u32 %s6305_s13, 4  ;;  %s304_s20 = sshll.u32 %s6306_s19, 4  ;;  %s283_s18 = int_to_ptr.vmem [resolvable:$true] %s282_s18  ;;  %s6501_s20 = int_to_ptr.vmem [resolvable:$true] %s304_s20 }
  0x6b   : > { %s6099_s24 = scalar_lea.hbm %s7678_s4, 16 }
  0x6c   : > { %p6100_p1 = scmp.ne.s32.totalorder %s7678_s4, %s6099_s24  ;;  %p6106_p0 = scmp.lt.u32.totalorder %s6099_s24, %s7678_s4 }
  0x6e   : > { %p6102_p3 = pnand %p6100_p1, %p6411_p8 }
  0x70   : > { %p6103_p13 = pneg %p6102_p3 }
  0x72   : > { %p6108_p2 = pnand %p6106_p0, %p6103_p13 }
  0x74   : > { %6111 = shalt.err (!%p6108_p2)
}
  0x75   : > { %s6112_s9 = scalar_lea.vmem %s283_s18, 16  ;;  %s6119_s13 = scalar_lea.vmem %s283_s18, 32 }
  0x76   : > { %p6113_p5 = scmp.ne.s32.totalorder %s283_s18, %s6112_s9  ;;  %p6120_p4 = scmp.lt.s32.totalorder %s283_s18, %s283_s18 }
  0x77   : > { %p6121_p10 = scmp.lt.s32.totalorder %s6119_s13, %s6112_s9 }
  0x78   : > { %p6115_p7 = pnand %p6113_p5, %p6411_p8 }
  0x79   : > { %p6122_p11 = por %p6121_p10, %p6120_p4 }
  0x7a   : > { %p6116_p9 = pneg %p6115_p7 }
  0x7c   : > { %p6123_p12 = pnand %p6122_p11, %p6116_p9 }
  0x7e   : > { %6126 = shalt.err (!%p6123_p12)
}
  0x7f   : > { %5796 = dma.hbm_to_vmem [thread:$0]  (!%p6395_p6), %s7678_s4, 16, %s283_s18, [#allocation11]  }
  0x80   : > { %s6127_s25 = scalar_lea.hbm %s7680_s6, 16 }
  0x81   : > { %p6128_p1 = scmp.ne.s32.totalorder %s7680_s6, %s6127_s25  ;;  %p6134_p0 = scmp.lt.u32.totalorder %s6127_s25, %s7680_s6 }
  0x83   : > { %p6130_p3 = pnand %p6128_p1, %p6411_p8 }
  0x85   : > { %p6131_p13 = pneg %p6130_p3 }
  0x87   : > { %p6136_p2 = pnand %p6134_p0, %p6131_p13 }
  0x89   : > { %6139 = shalt.err (!%p6136_p2)
}
  0x8a   : > { %s6140_s18 = scalar_lea.vmem %s6501_s20, 16  ;;  %s6147_s13 = scalar_lea.vmem %s6501_s20, 32 }
  0x8b   : > { %p6141_p5 = scmp.ne.s32.totalorder %s6501_s20, %s6140_s18  ;;  %p6148_p4 = scmp.lt.s32.totalorder %s6501_s20, %s6501_s20 }
  0x8c   : > { %p6149_p10 = scmp.lt.s32.totalorder %s6147_s13, %s6140_s18 }
  0x8d   : > { %p6143_p7 = pnand %p6141_p5, %p6411_p8 }
  0x8e   : > { %p6150_p11 = por %p6149_p10, %p6148_p4 }
  0x8f   : > { %p6144_p9 = pneg %p6143_p7 }
  0x91   : > { %p6151_p12 = pnand %p6150_p11, %p6144_p9 }
  0x93   : > { %6154 = shalt.err (!%p6151_p12)
}
  0x94   : > { %5802 = dma.hbm_to_vmem [thread:$0]  (!%p6395_p6), %s7680_s6, 16, %s6501_s20, [#allocation14]  }
  0x95   : > { %s6307_s22 = smov [#allocation16]   ;;  %s6155_s10 = scalar_lea.hbm %s7681_s7, 64 }
  0x96   : > { %s315_s24 = sshll.u32 %s6307_s22, 4  ;;  %p6156_p1 = scmp.ne.s32.totalorder %s7681_s7, %s6155_s10  ;;  %s316_s24 = int_to_ptr.vmem [resolvable:$true] %s315_s24 }
  0x97   : > { %p6162_p0 = scmp.lt.u32.totalorder %s6155_s10, %s7681_s7 }
  0x98   : > { %p6158_p3 = pnand %p6156_p1, %p6411_p8 }
  0x9a   : > { %p6159_p13 = pneg %p6158_p3 }
  0x9c   : > { %p6164_p2 = pnand %p6162_p0, %p6159_p13 }
  0x9e   : > { %6167 = shalt.err (!%p6164_p2)
}
  0x9f   : > { %s6168_s20 = scalar_lea.vmem %s316_s24, 64  ;;  %p6176_p4 = scmp.lt.s32.totalorder %s316_s24, %s316_s24 }
  0xa0   : > { %p6169_p5 = scmp.ne.s32.totalorder %s316_s24, %s6168_s20  ;;  %p6177_p10 = scmp.lt.s32.totalorder %s6168_s20, %s6168_s20 }
  0xa2   : > { %p6171_p7 = pnand %p6169_p5, %p6411_p8  ;;  %p6178_p11 = por %p6177_p10, %p6176_p4 }
  0xa4   : > { %p6172_p9 = pneg %p6171_p7 }
  0xa6   : > { %p6179_p12 = pnand %p6178_p11, %p6172_p9 }
  0xa8   : > { %6182 = shalt.err (!%p6179_p12)
}
  0xa9   : > { %5805 = dma.hbm_to_vmem [thread:$0]  (!%p6395_p6), %s7681_s7, 64, %s316_s24, [#allocation17]  }
  0xaa   : > { %s4883_s23 = sadd.s32 4294967294, %s6295_s30   ;;  %s6565_s15 = sadd.s32 1, %s6295_s30  }
  0xab   : > { %s35_s22 = sadd.s32 1, %s6291_s29  ;;  %s32_s25 = ssub.s32 %s6295_s30, %s6565_s15 }
  0xac   : > { %p42_p8 = scmp.ne.s32.totalorder %s6291_s29, %s6287_s28  ;;  %p33_p1 = scmp.eq.s32.totalorder %s32_s25, 0 }
  0xad   : > { %p43_p3 = scmp.eq.s32.totalorder %s6295_s30, 0  ;;  %p48_p13 = scmp.ne.s32.totalorder %s6287_s28, %s6283_s27 }
  0xae   : > { %p219_p0 = scmp.eq.s32.totalorder %s6379_s11, 1  ;;  %p7691_p5 = scmp.eq.s32.totalorder %s6379_s11, 0 }
  0xaf   : > { %s6577_s17 = scalar_select %p33_p1, %s6291_s29, %s35_s22  }
  0xb0   : > { %p44_p2 = por %p43_p3, %p42_p8  ;;  %p6581_p7 = por %p7691_p5, %p48_p13 }
  0xb1   : > { %p6585_p6 = por %p219_p0, %p42_p8  ;;  %p225_p9 = scmp.eq.s32.totalorder %s4883_s23, 1 }
  0xb2   : > { %p5821_p4 = scmp.lt.s32.totalorder %s6295_s30, 2  ;;  %s326_s16 = sand.u32 1, %s6291_s29  }
  0xb3   : > { %s7693_s24 = scalar_select %p6585_p6, 1, 0 }
  0xb4   : > { %p6591_p10 = por %p225_p9, %p48_p13  ;;  %s4893_s18 = sshll.u32 %s326_s16, 7 }
  0xb5   : > { %s5171_s13 = sshll.u32 %s6295_s30, 11  ;;  %s330_s22 = scalar_lea.vmem [#allocation4], %s4893_s18 }
  0xb6   : > { %s7694_s9 = scalar_select %p6591_p10, 1, 0 }
  0xb7   : > { %s6599_s21 = scalar_lea.hbm %s7674_s0, %s5171_s13  ;;  %s338_s25 = sshll.u32 %s330_s22, 4  ;;  %s6605_s25 = int_to_ptr.vmem [resolvable:$true] %s338_s25 }
  0xb8   : > { %p6601_p11 = pnand %p5821_p4, %p44_p2  ;;  %s6607_s14 = scalar_lea.sflag [#allocation5], %s326_s16 }
  0xb9   : > { %s6183_s26 = scalar_lea.hbm %s6599_s21, 2048  ;;  %s6188_s20 = scalar_lea.hbm %s7674_s0, 4096 }
  0xba   : > { %p6184_p12 = scmp.ne.s32.totalorder %s6599_s21, %s6183_s26  ;;  %p6185_p8 = pneg %p6601_p11 }
  0xbb   : > { %p6189_p13 = scmp.lt.u32.totalorder %s6599_s21, %s7674_s0  ;;  %p6190_p0 = scmp.lt.u32.totalorder %s6188_s20, %s6183_s26 }
  0xbc   : > { %p6186_p1 = pnand %p6185_p8, %p6184_p12  ;;  %p6192_p5 = scmp.lt.u32.totalorder %s6183_s26, %s6599_s21 }
  0xbd   : > { %p6191_p2 = por %p6190_p0, %p6189_p13 }
  0xbe   : > { %p6187_p3 = pneg %p6186_p1 }
  0xbf   : > { %p6193_p9 = por %p6192_p5, %p6191_p2 }
  0xc1   : > { %p6194_p4 = pnand %p6193_p9, %p6187_p3 }
  0xc3   : > { %6197 = shalt.err (!%p6194_p4)
}
  0xc4   : > { %s6198_s16 = scalar_lea.vmem %s6605_s25, 2048  ;;  %s6308_s18 = smov [#allocation4]  }
  0xc5   : > { %p6199_p12 = scmp.ne.s32.totalorder %s6605_s25, %s6198_s16  ;;  %s6203_s13 = sshll.u32 %s6308_s18, 4  ;;  %s6204_s13 = int_to_ptr.vmem [resolvable:$false] %s6203_s13 }
  0xc6   : > { %s6205_s19 = scalar_lea.vmem %s6204_s13, 4096  ;;  %p6206_p6 = scmp.lt.s32.totalorder %s6605_s25, %s6204_s13 }
  0xc7   : > { %p6201_p1 = pnand %p6199_p12, %p6185_p8  ;;  %p6207_p13 = scmp.lt.s32.totalorder %s6205_s19, %s6198_s16 }
  0xc9   : > { %p6202_p10 = pneg %p6201_p1  ;;  %p6208_p0 = por %p6207_p13, %p6206_p6 }
  0xcb   : > { %p6209_p2 = pnand %p6208_p0, %p6202_p10 }
  0xcd   : > { %6212 = shalt.err (!%p6209_p2)
}
  0xce   : > { %s7696_s26 = smov 4   ;;  %s7697_s20 = smov 64  }
  0xcf   : > { %5809 = dma.hbm_to_vmem [thread:$0]  (!%p6601_p11), %s6599_s21, 2048, %s6605_s25, %s6607_s14, %s7697_s20, %s7697_s20, %s7696_s26  }
  0xd0   : > { %p7698_p8 = scmp.ne.s32.totalorder %s7688_s12, 0 }
  0xd1   : > { %s6641_s22 = sand.u32 (!%p7698_p8), 1, %s6287_s28  }
  0xd2   : > { %350 = sbr.rel (%p7698_p8) target bundleno = 1023 (0x3ff), region = 52  ;;  %s4898_s16 = sshll.u32 (!%p7698_p8), %s6641_s22, 7 }
  0xd3   : > { %s353_s18 = scalar_lea.sflag (!%p7698_p8), [#allocation5], %s6641_s22  ;;  %s6645_s13 = scalar_lea.vmem (!%p7698_p8), [#allocation4], %s4898_s16 }
  0xd9   : > { %6258 = dma.done.wait (%p6581_p7), %s353_s18, 2048  }
  0xda   : > { %6260 = vsyncadd (%p6581_p7), %s353_s18, 4294965248  ;;  %p7699_p6 = scmp.eq.s32.totalorder %s6379_s11, 0 }
  0xdc   : > { %6262 = dma.done.wait (%p7699_p6), [#allocation8], 9504   ;;  %p7700_p10 = pmov %p7699_p6 }
  0xdd   : > { %p7701_p11 = pmov %p7699_p6 }
  0xde   : > { %6264 = vsyncadd (%p7700_p10), [#allocation8], 4294957792 }
  0xdf   : > { %6266 = dma.done.wait (%p7701_p11), [#allocation11], 32   ;;  %p7702_p3 = pmov %p7699_p6 }
  0xe1   : > { %6268 = vsyncadd (%p7702_p3), [#allocation11], 4294967264  ;;  %p7703_p5 = pmov %p7702_p3 }
  0xe2   : > { %p7704_p9 = pmov %p7702_p3 }
  0xe3   : > { %6270 = dma.done.wait (%p7703_p5), [#allocation14], 32  }
  0xe4   : > { %6272 = vsyncadd (%p7704_p9), [#allocation14], 4294967264  ;;  %p7705_p7 = pmov %p7702_p3 }
  0xe5   : > { %p7706_p4 = pmov %p7702_p3 }
  0xe6   : > { %6274 = dma.done.wait (%p7705_p7), [#allocation17], 64  }
  0xe7   : > { %6276 = vsyncadd (%p7706_p4), [#allocation17], 4294967232  ;;  %vm423_vm0 = vcmask 27648   ;;  %v6309_v0 = vmov 0   ;;  %vm425_vm1 = vcmask 24576   ;;  %vm1178_vm4 = vcmask 1041408  }
  0xe8   : > { %424 = vst.msk [vmem:[#allocation2] sm:$0xf] %vm423_vm0, %v6309_v0  ;;  %431 = vst.msk [vmem:[#allocation2 + $0x8] sm:$0xf] %vm423_vm0, %v6309_v0  ;;  %vm426_vm2 = vsmask.f32 256 }
  0xe9   : > { %435 = vst.msk [vmem:[#allocation2 + $0x10] sm:$0xf] %vm423_vm0, %v6309_v0  ;;  %439 = vst.msk [vmem:[#allocation2 + $0x18] sm:$0xf] %vm423_vm0, %v6309_v0  ;;  %v464_v2 = vld [vmem:[#allocation2 + $0x4c] sm:$0x1] }
  0xea   : > { %443 = vst.msk [vmem:[#allocation2 + $0x20] sm:$0xf] %vm423_vm0, %v6309_v0  ;;  %447 = vst.msk [vmem:[#allocation2 + $0x28] sm:$0xf] %vm423_vm0, %v6309_v0  ;;  %v468_v3 = vld [vmem:[#allocation2 + $0x54] sm:$0x1] }
  0xeb   : > { %451 = vst.msk [vmem:[#allocation2 + $0x30] sm:$0xf] %vm423_vm0, %v6309_v0  ;;  %455 = vst.msk [vmem:[#allocation2 + $0x38] sm:$0xf] %vm423_vm0, %v6309_v0  ;;  %v472_v4 = vld [vmem:[#allocation2 + $0x5c] sm:$0x1] }
  0xec   : > { %459 = vst.msk [vmem:[#allocation2 + $0x40] sm:$0xf] %vm423_vm0, %v6309_v0  ;;  %463 = vst.msk [vmem:[#allocation2 + $0x48] sm:$0xf] %vm423_vm0, %v6309_v0  ;;  %v476_v8 = vld [vmem:[#allocation2 + $0x64] sm:$0x1] }
  0xed   : > { %467 = vst.msk [vmem:[#allocation2 + $0x50] sm:$0xf] %vm423_vm0, %v6309_v0  ;;  %471 = vst.msk [vmem:[#allocation2 + $0x58] sm:$0xf] %vm423_vm0, %v6309_v0  ;;  %v6767_v9 = vld [vmem:[%s6645_s13 + $0x40] sm:$0xff]   ;;  %v5269_v13 = vld [vmem:[%s6645_s13 + $0x48] sm:$0xff]  }
  0xee   : > { %475 = vst.msk [vmem:[#allocation2 + $0x60] sm:$0xf] %vm423_vm0, %v6309_v0  ;;  %479 = vst.msk [vmem:[#allocation2 + $0x68] sm:$0xf] %vm423_vm0, %v6309_v0  ;;  %v480_v11 = vld [vmem:[#allocation2 + $0x6c] sm:$0x1]  ;;  %v5231_v30 = vunpack.c.l.bf16 %v6767_v9  ;;  %v5232_v31 = vunpack.c.h.bf16 %v6767_v9  ;;  %v5235_v36 = vunpack.c.l.bf16 %v5269_v13  ;;  %v5236_v37 = vunpack.c.h.bf16 %v5269_v13 }
  0xef   : > { %483 = vst.msk [vmem:[#allocation2 + $0x70] sm:$0xf] %vm423_vm0, %v6309_v0  ;;  %487 = vst.msk [vmem:[#allocation2 + $0x78] sm:$0xf] %vm423_vm0, %v6309_v0  ;;  %v484_v12 = vld [vmem:[#allocation2 + $0x74] sm:$0x1] }
  0xf0   : > { %491 = vst.msk [vmem:[#allocation2 + $0x80] sm:$0xf] %vm423_vm0, %v6309_v0  ;;  %495 = vst.msk [vmem:[#allocation2 + $0x88] sm:$0xf] %vm423_vm0, %v6309_v0  ;;  %v488_v16 = vld [vmem:[#allocation2 + $0x7c] sm:$0x1] }
  0xf1   : > { %499 = vst.msk [vmem:[#allocation2 + $0x90] sm:$0xf] %vm423_vm0, %v6309_v0  ;;  %503 = vst.msk [vmem:[#allocation2 + $0x98] sm:$0xf] %vm423_vm0, %v6309_v0  ;;  %v492_v17 = vld [vmem:[#allocation2 + $0x84] sm:$0x1] }
  0xf2   : > { %507 = vst.msk [vmem:[#allocation2 + $0xa0] sm:$0xf] %vm423_vm0, %v6309_v0  ;;  %511 = vst.msk [vmem:[#allocation2 + $0xa8] sm:$0xf] %vm423_vm0, %v6309_v0  ;;  %v496_v20 = vld [vmem:[#allocation2 + $0x8c] sm:$0x1] }
  0xf3   : > { %515 = vst.msk [vmem:[#allocation2 + $0xb0] sm:$0xf] %vm423_vm0, %v6309_v0  ;;  %519 = vst.msk [vmem:[#allocation2 + $0xb8] sm:$0xf] %vm423_vm0, %v6309_v0  ;;  %v532_v21 = vld [vmem:[#allocation2 + $0xd4] sm:$0x1] }
  0xf4   : > { %523 = vst.msk [vmem:[#allocation2 + $0xc0] sm:$0xf] %vm423_vm0, %v6309_v0  ;;  %527 = vst.msk [vmem:[#allocation2 + $0xc8] sm:$0xf] %vm423_vm0, %v6309_v0  ;;  %v536_v24 = vld [vmem:[#allocation2 + $0xdc] sm:$0x1] }
  0xf5   : > { %535 = vst.msk [vmem:[#allocation2 + $0xd8] sm:$0xf] %vm423_vm0, %v6309_v0  ;;  %539 = vst.msk [vmem:[#allocation2 + $0xe0] sm:$0xf] %vm423_vm0, %v6309_v0  ;;  %v540_v25 = vld [vmem:[#allocation2 + $0xe4] sm:$0x1] }
  0xf6   : > { %543 = vst.msk [vmem:[#allocation2 + $0xe8] sm:$0xf] %vm423_vm0, %v6309_v0  ;;  %547 = vst.msk [vmem:[#allocation2 + $0xf0] sm:$0xf] %vm423_vm0, %v6309_v0  ;;  %v544_v28 = vld [vmem:[#allocation2 + $0xec] sm:$0x1] }
  0xf7   : > { %551 = vst.msk [vmem:[#allocation2 + $0xf8] sm:$0xf] %vm423_vm0, %v6309_v0  ;;  %555 = vst.msk [vmem:[#allocation2 + $0x100] sm:$0xf] %vm423_vm0, %v6309_v0  ;;  %v548_v29 = vld [vmem:[#allocation2 + $0xf4] sm:$0x1] }
  0xf8   : > { %559 = vst.msk [vmem:[#allocation2 + $0x108] sm:$0xf] %vm423_vm0, %v6309_v0  ;;  %563 = vst.msk [vmem:[#allocation2 + $0x110] sm:$0xf] %vm423_vm0, %v6309_v0  ;;  %v552_v34 = vld [vmem:[#allocation2 + $0xfc] sm:$0x1] }
  0xf9   : > { %571 = vst [vmem:[#allocation3] sm:$0xf] %v6309_v0  ;;  %572 = vst [vmem:[#allocation3 + $0x4] sm:$0x1] %v6309_v0  ;;  %v556_v35 = vld [vmem:[#allocation2 + $0x104] sm:$0x1] }
  0xfa   : > { %573 = vst [vmem:[#allocation3 + $0x8] sm:$0xf] %v6309_v0  ;;  %574 = vst [vmem:[#allocation3 + $0xc] sm:$0x1] %v6309_v0  ;;  %v560_v40 = vld [vmem:[#allocation2 + $0x10c] sm:$0x1] }
  0xfb   : > { %575 = vst [vmem:[#allocation3 + $0x10] sm:$0xf] %v6309_v0  ;;  %576 = vst [vmem:[#allocation3 + $0x14] sm:$0x1] %v6309_v0  ;;  %v564_v41 = vld [vmem:[#allocation2 + $0x114] sm:$0x1] }
  0xfc   : > { %577 = vst [vmem:[#allocation3 + $0x18] sm:$0xf] %v6309_v0  ;;  %578 = vst [vmem:[#allocation3 + $0x1c] sm:$0x1] %v6309_v0  ;;  %v568_v44 = vld [vmem:[#allocation2 + $0x11c] sm:$0x1] }
  0xfd   : > { %579 = vst [vmem:[#allocation3 + $0x20] sm:$0xf] %v6309_v0  ;;  %580 = vst [vmem:[#allocation3 + $0x24] sm:$0x1] %v6309_v0  ;;  %v1144_v45 = vld [vmem:[#allocation7 + $0x2] sm:$0x3] }
  0xfe   : > { %581 = vst [vmem:[#allocation3 + $0x28] sm:$0xf] %v6309_v0  ;;  %582 = vst [vmem:[#allocation3 + $0x2c] sm:$0x1] %v6309_v0  ;;  %5744 = vmatprep.subr.msk.bf16.mxu1 %vm1178_vm4, %v1144_v45  ;;  %v1180_v47 = vsel %vm1178_vm4, %v1144_v45, 0  ;;  %v5272_v59 = vld [vmem:[%s6645_s13 + $0x60] sm:$0xff]  }
  0xff   : > { %583 = vst [vmem:[#allocation3 + $0x30] sm:$0xf] %v6309_v0  ;;  %584 = vst [vmem:[#allocation3 + $0x34] sm:$0x1] %v6309_v0  ;;  %v6806_v48 = vld [vmem:[#allocation10] ss:$0 sm:$0xff]  ;;  %5425 = vmatpush3.bf16.msra.mxu1 %v1180_v47 }
 0x100   : > { %585 = vst [vmem:[#allocation3 + $0x38] sm:$0xf] %v6309_v0  ;;  %586 = vst [vmem:[#allocation3 + $0x3c] sm:$0x1] %v6309_v0  ;;  %v6808_v49 = vld [vmem:[#allocation12] ss:$0 sm:$0xff]  ;;  %v882_v50 = vmul.f32 %v5231_v30, %v6806_v48  ;;  %v883_v52 = vmul.f32 %v5232_v31, %v6806_v48  ;;  %v884_v53 = vmul.f32 %v5235_v36, %v6806_v48 }
 0x101   : > { %587 = vst [vmem:[#allocation3 + $0x40] sm:$0xf] %v6309_v0  ;;  %588 = vst [vmem:[#allocation3 + $0x44] sm:$0x1] %v6309_v0  ;;  %v885_v54 = vmul.f32 %v5236_v37, %v6806_v48  ;;  %v1133_v57 = vld [vmem:[#allocation7] sm:$0x3] }
 0x102   : > { %589 = vst [vmem:[#allocation3 + $0x48] sm:$0xf] %v6309_v0  ;;  %590 = vst [vmem:[#allocation3 + $0x4c] sm:$0x1] %v6309_v0  ;;  %v432_v58 = vld [vmem:[#allocation2 + $0xc] sm:$0x1]  ;;  %v890_v60 = vadd.f32 %v6808_v49, %v882_v50  ;;  %v891_v61 = vadd.f32 %v6808_v49, %v883_v52  ;;  %v892_v62 = vadd.f32 %v6808_v49, %v884_v53  ;;  %5745 = vmatprep.subr.msk.bf16.mxu0 %vm1178_vm4, %v1133_v57 }
 0x103   : > { %vm6756_vm3 = vmand %vm425_vm1, %vm426_vm2  ;;  %v4985_v51 = vld.sshfl [vmem:[#allocation16] sm:$0x33 pattern:$0x76325410]  ;;  %v1280_v63 = vsel %vm1178_vm4, %v1133_v57, 0  ;;  %v5273_v13 = vld [vmem:[%s6645_s13 + $0x68] sm:$0xff]  }
 0x104   : > { %v465_v5 = vsel %vm6756_vm3, 0, %v464_v2  ;;  %v469_v6 = vsel %vm6756_vm3, 0, %v468_v3  ;;  %v473_v7 = vsel %vm6756_vm3, 0, %v472_v4  ;;  %v477_v10 = vsel %vm6756_vm3, 0, %v476_v8  ;;  %v5270_v2 = vld [vmem:[%s6645_s13 + $0x50] sm:$0xff]   ;;  %5435 = vmatpush3.bf16.msra.mxu0 %v1280_v63  ;;  %v6865_v52 = vld [vmem:[%s6645_s13] sm:$0xff]  }
 0x105   : > { %466 = vst [vmem:[#allocation2 + $0x4c] sm:$0x1] %v465_v5  ;;  %470 = vst [vmem:[#allocation2 + $0x54] sm:$0x1] %v469_v6  ;;  %v481_v14 = vsel %vm6756_vm3, 0, %v480_v11  ;;  %v485_v15 = vsel %vm6756_vm3, 0, %v484_v12  ;;  %v1735_v55 = vcombine.high %v4985_v51, %v4985_v51  ;;  %v5247_v4 = vunpack.c.l.bf16 %v5272_v59 }
 0x106   : > { %474 = vst [vmem:[#allocation2 + $0x5c] sm:$0x1] %v473_v7  ;;  %478 = vst [vmem:[#allocation2 + $0x64] sm:$0x1] %v477_v10  ;;  %v489_v18 = vsel %vm6756_vm3, 0, %v488_v16  ;;  %v493_v19 = vsel %vm6756_vm3, 0, %v492_v17  ;;  %v5248_v5 = vunpack.c.h.bf16 %v5272_v59  ;;  %v5239_v6 = vunpack.c.l.bf16 %v5270_v2 }
 0x107   : > { %482 = vst [vmem:[#allocation2 + $0x6c] sm:$0x1] %v481_v14  ;;  %486 = vst [vmem:[#allocation2 + $0x74] sm:$0x1] %v485_v15  ;;  %v497_v22 = vsel %vm6756_vm3, 0, %v496_v20  ;;  %v533_v23 = vsel %vm6756_vm3, 0, %v532_v21  ;;  %4986 = vmatprep.subr.msk.bf16.mxu1 %vm1178_vm4, %v1735_v55  ;;  %v893_v12 = vadd.f32 %v6808_v49, %v885_v54  ;;  %v940_v14 = vmul.f32 %v5247_v4, %v6806_v48 }
 0x108   : > { %490 = vst [vmem:[#allocation2 + $0x7c] sm:$0x1] %v489_v18  ;;  %494 = vst [vmem:[#allocation2 + $0x84] sm:$0x1] %v493_v19  ;;  %v537_v26 = vsel %vm6756_vm3, 0, %v536_v24  ;;  %v541_v27 = vsel %vm6756_vm3, 0, %v540_v25  ;;  %v886_v15 = vmul.f32 %v5239_v6, %v6806_v48  ;;  %v5251_v25 = vunpack.c.l.bf16 %v5273_v13 }
 0x109   : > { %498 = vst [vmem:[#allocation2 + $0x8c] sm:$0x1] %v497_v22  ;;  %534 = vst [vmem:[#allocation2 + $0xd4] sm:$0x1] %v533_v23  ;;  %v545_v32 = vsel %vm6756_vm3, 0, %v544_v28  ;;  %v549_v33 = vsel %vm6756_vm3, 0, %v548_v29  ;;  %v948_v23 = vadd.f32 %v6808_v49, %v940_v14  ;;  %v5240_v29 = vunpack.c.h.bf16 %v5270_v2 }
 0x10a   : > { %538 = vst [vmem:[#allocation2 + $0xdc] sm:$0x1] %v537_v26  ;;  %542 = vst [vmem:[#allocation2 + $0xe4] sm:$0x1] %v541_v27  ;;  %v553_v38 = vsel %vm6756_vm3, 0, %v552_v34  ;;  %v557_v39 = vsel %vm6756_vm3, 0, %v556_v35  ;;  %v894_v24 = vadd.f32 %v6808_v49, %v886_v15  ;;  %v941_v26 = vmul.f32 %v5248_v5, %v6806_v48 }
 0x10b   : > { %546 = vst [vmem:[#allocation2 + $0xec] sm:$0x1] %v545_v32  ;;  %550 = vst [vmem:[#allocation2 + $0xf4] sm:$0x1] %v549_v33  ;;  %v561_v42 = vsel %vm6756_vm3, 0, %v560_v40  ;;  %v565_v43 = vsel %vm6756_vm3, 0, %v564_v41  ;;  %v5252_v31 = vunpack.c.h.bf16 %v5273_v13  ;;  %v942_v35 = vmul.f32 %v5251_v25, %v6806_v48 }
 0x10c   : > { %554 = vst [vmem:[#allocation2 + $0xfc] sm:$0x1] %v553_v38  ;;  %558 = vst [vmem:[#allocation2 + $0x104] sm:$0x1] %v557_v39  ;;  %v569_v46 = vsel %vm6756_vm3, 0, %v568_v44  ;;  %v6815_v56 = vsel %vm1178_vm4, %v4985_v51, 0  ;;  %v949_v36 = vadd.f32 %v6808_v49, %v941_v26  ;;  %v887_v37 = vmul.f32 %v5240_v29, %v6806_v48 }
 0x10d   : > { %562 = vst [vmem:[#allocation2 + $0x10c] sm:$0x1] %v561_v42  ;;  %566 = vst [vmem:[#allocation2 + $0x114] sm:$0x1] %v565_v43  ;;  %v433_v3 = vsel %vm6756_vm3, 0, %v432_v58  ;;  %v898_v9 = vmax.f32 %v890_v60, 0.0  ;;  %v943_v40 = vmul.f32 %v5252_v31, %v6806_v48  ;;  %v950_v43 = vadd.f32 %v6808_v49, %v942_v35 }
 0x10e   : > { %570 = vst [vmem:[#allocation2 + $0x11c] sm:$0x1] %v569_v46  ;;  %v436_v7 = vld [vmem:[#allocation2 + $0x14] sm:$0x1]  ;;  %v440_v8 = vld [vmem:[#allocation2 + $0x1c] sm:$0x1]  ;;  %v895_v45 = vadd.f32 %v6808_v49, %v887_v37 }
 0x10f   : > { %v899_v10 = vmax.f32 %v891_v61, 0.0  ;;  %v900_v11 = vmax.f32 %v892_v62, 0.0  ;;  %434 = vst [vmem:[#allocation2 + $0xc] sm:$0x1] %v433_v3  ;;  %v437_v16 = vsel %vm6756_vm3, 0, %v436_v7  ;;  %v441_v17 = vsel %vm6756_vm3, 0, %v440_v8 }
 0x110   : > { %v5271_v18 = vld [vmem:[%s6645_s13 + $0x58] sm:$0xff]   ;;  %v906_v19 = vpack.c.bf16 %v898_v9, %v898_v9  ;;  %vm1165_vm5 = vcmask 31744   ;;  %vm815_vm6 = vsmask.f32 7938  ;;  %v901_v22 = vmax.f32 %v893_v12, 0.0  ;;  %v6840_v27 = vld [vmem:[%s6645_s13 + $0x70] sm:$0xff]  }
 0x111   : > { %v907_v20 = vpack.c.bf16 %v899_v10, %v899_v10  ;;  %v908_v21 = vpack.c.bf16 %v900_v11, %v900_v11  ;;  %438 = vst [vmem:[#allocation2 + $0x14] sm:$0x1] %v437_v16  ;;  %442 = vst [vmem:[#allocation2 + $0x1c] sm:$0x1] %v441_v17  ;;  %v5243_v30 = vunpack.c.l.bf16 %v5271_v18  ;;  %v6845_v32 = vld [vmem:[#allocation7 + $0x4] sm:$0x3]  ;;  %v5255_v39 = vunpack.c.l.bf16 %v6840_v27 }
 0x112   : > { %915 = vst.msk [vmem:[#allocation2 + $0x50] sm:$0xf] %vm423_vm0, %v906_v19  ;;  %v909_v28 = vpack.c.bf16 %v901_v22, %v901_v22  ;;  %v956_v33 = vmax.f32 %v948_v23, 0.0  ;;  %v902_v34 = vmax.f32 %v894_v24, 0.0  ;;  %5746 = vmatprep.subr.msk.bf16.mxu0 %vm1178_vm4, %v6845_v32  ;;  %v957_v44 = vmax.f32 %v949_v36, 0.0  ;;  %v6862_v51 = vld [vmem:[%s6645_s13 + $0x78] sm:$0xff]   ;;  %vm6877_vm7 = vmand %vm423_vm0, %vm815_vm6 }
 0x113   : > { %916 = vst.msk [vmem:[#allocation2 + $0x58] sm:$0xf] %vm423_vm0, %v907_v20  ;;  %917 = vst.msk [vmem:[#allocation2 + $0x60] sm:$0xf] %vm423_vm0, %v908_v21  ;;  %v888_v38 = vmul.f32 %v5243_v30, %v6806_v48  ;;  %v944_v47 = vmul.f32 %v5255_v39, %v6806_v48  ;;  %v951_v50 = vadd.f32 %v6808_v49, %v943_v40  ;;  %v958_v55 = vmax.f32 %v950_v43, 0.0  ;;  %v6899_v43 = vld [vmem:[%s6645_s13 + $0x8] sm:$0xff]  }
 0x114   : > { %918 = vst.msk [vmem:[#allocation2 + $0x68] sm:$0xf] %vm423_vm0, %v909_v28  ;;  %v5180_v41 = vpack.c.bf16 %v956_v33, %v956_v33  ;;  %v910_v42 = vpack.c.bf16 %v902_v34, %v902_v34  ;;  %v5181_v57 = vpack.c.bf16 %v957_v44, %v957_v44  ;;  %v903_v58 = vmax.f32 %v895_v45, 0.0  ;;  %v1077_v63 = vld [vmem:[#allocation2 + $0x8] sm:$0xf]  ;;  %s4906_s12 = sshll.u32 %s6641_s22, 6 }
 0x115   : > { %v896_v46 = vadd.f32 %v6808_v49, %v888_v38  ;;  %v952_v60 = vadd.f32 %v6808_v49, %v944_v47  ;;  %v959_v61 = vmax.f32 %v951_v50, 0.0  ;;  %v5182_v3 = vpack.c.bf16 %v958_v55, %v958_v55  ;;  %v6871_v6 = vld [vmem:[#allocation7 + $0xa] sm:$0x3]  ;;  %v1083_v21 = vld [vmem:[#allocation2 + $0x10] sm:$0xf]  ;;  %s416_s14 = scalar_lea.vmem [#allocation18], %s4906_s12 }
 0x116   : > { %v997_v53 = vshrl.u32 %v5180_v41, 16  ;;  %v1000_v54 = vshll.u32 %v5180_v41, 16  ;;  %919 = vst.msk [vmem:[#allocation2 + $0x70] sm:$0xf] %vm423_vm0, %v910_v42  ;;  %v1080_v2 = vld [vmem:[#allocation2 + $0xc] sm:$0x1]  ;;  %v5256_v4 = vunpack.c.h.bf16 %v6840_v27  ;;  %v5259_v5 = vunpack.c.l.bf16 %v6862_v51 }
 0x117   : > { %v904_v59 = vmax.f32 %v896_v46, 0.0  ;;  %v5199_v7 = vunpack.c.l.bf16 %v6865_v52  ;;  %v1005_v10 = vshrl.u32 %v5181_v57, 16  ;;  %v911_v11 = vpack.c.bf16 %v903_v58, %v903_v58  ;;  %v1089_v22 = vld [vmem:[#allocation2 + $0x18] sm:$0xf]  ;;  %s4743_s10 = sshll.u32 %s416_s14, 4  ;;  %s5196_s21 = sshll.u32 %s6379_s11, 10  ;;  %s7625_s10 = int_to_ptr.vmem [resolvable:$true] %s4743_s10 }
 0x118   : > { %v999_v9 = vrot.slane %v997_v53, 7  ;;  %v1008_v14 = vshll.u32 %v5181_v57, 16  ;;  %v1013_v15 = vshrl.u32 %v5182_v3, 16  ;;  %v1016_v16 = vshll.u32 %v5182_v3, 16  ;;  %v1086_v25 = vld [vmem:[#allocation2 + $0x14] sm:$0x1]  ;;  %s7630_s19 = scalar_lea.hbm %s7682_s8, %s5196_s21 }
 0x119   : > { %v5876_v62 = vld [vmem:[#allocation2 + $0x48] ss:$8 sps:$4 sm:$0xff]   ;;  %v912_v12 = vpack.c.bf16 %v904_v59, %v904_v59  ;;  %v960_v17 = vmax.f32 %v952_v60, 0.0  ;;  %v1007_v20 = vrot.slane %v1005_v10, 7  ;;  %920 = vst.msk [vmem:[#allocation2 + $0x78] sm:$0xf] %vm423_vm0, %v911_v11  ;;  %v5183_v23 = vpack.c.bf16 %v959_v61, %v959_v61 }
 0x11a   : > { %v5877_v8 = vld [vmem:[#allocation2 + $0x58] ss:$8 sps:$4 sm:$0xff]   ;;  %5426 = vmatprep.mubr.msk.bf16.mxu1 %vm1165_vm5, %v5876_v62  ;;  %v1002_v18 = vor.u32 %v1000_v54, %v999_v9  ;;  %v1003_v19 = vrot.slane %v999_v9, 4  ;;  %v1015_v24 = vrot.slane %v1013_v15, 7  ;;  %v1092_v26 = vld [vmem:[#allocation2 + $0x1c] sm:$0x1]  ;;  %v945_v28 = vmul.f32 %v5256_v4, %v6806_v48 }
 0x11b   : > { %5427 = vmatmul.mubr.msk.bf16.vlgmr.msra.gmra.mrb[0].mxu1 %vm1165_vm5, %v5877_v8  ;;  %921 = vst.msk [vmem:[#allocation2 + $0x80] sm:$0xf] %vm423_vm0, %v912_v12  ;;  %v5184_v27 = vpack.c.bf16 %v960_v17, %v960_v17  ;;  %v946_v29 = vmul.f32 %v5259_v5, %v6806_v48  ;;  %v1010_v34 = vor.u32 %v1008_v14, %v1007_v20  ;;  %v1011_v35 = vrot.slane %v1007_v20, 4  ;;  %v1095_v53 = vld [vmem:[#allocation2 + $0x20] sm:$0xf]  ;;  %s4730_s11 = scalar_lea.sflag [#allocation6], %s6641_s22 }
 0x11c   : > { %1755 = vmatpush1.bf16.msra.mxu1 %v6815_v56  ;;  %v1078_v30 = vsel %vm6877_vm7, %v1002_v18, %v1077_v63  ;;  %v1081_v31 = vsel %vm6756_vm3, %v1003_v19, %v1080_v2  ;;  %v1018_v56 = vor.u32 %v1016_v16, %v1015_v24  ;;  %v1019_v36 = vrot.slane %v1015_v24, 4  ;;  %v1101_v54 = vld [vmem:[#allocation2 + $0x28] sm:$0xf]  ;;  %v428_v5 = vld [vmem:[#allocation2 + $0x4] sm:$0x1]  ;;  %s6213_s26 = scalar_lea.vmem %s7625_s10, 1024 }
 0x11d   : > { %v5879_v33 = vld [vmem:[#allocation2 + $0x68] ss:$8 sps:$4 sm:$0xff]   ;;  %5748 = vmatprep.subr.msk.bf16.mxu1 %vm1178_vm4, %v6871_v6  ;;  %1079 = vst [vmem:[#allocation2 + $0x8] sm:$0xf] %v1078_v30  ;;  %1082 = vst [vmem:[#allocation2 + $0xc] sm:$0x1] %v1081_v31  ;;  %v1084_v39 = vsel %vm6877_vm7, %v1010_v34, %v1083_v21  ;;  %v1087_v40 = vsel %vm6756_vm3, %v1011_v35, %v1086_v25  ;;  %v953_v47 = vadd.f32 %v6808_v49, %v945_v28  ;;  %p6214_p12 = scmp.ne.s32.totalorder %s7625_s10, %s6213_s26 }
 0x11e   : > { %v1021_v37 = vshrl.u32 %v5183_v23, 16  ;;  %v1024_v38 = vshll.u32 %v5183_v23, 16  ;;  %5430 = vmatprep.mubr.msk.bf16.mxu1 %vm1165_vm5, %v5879_v33  ;;  %v1029_v41 = vshrl.u32 %v5184_v27, 16  ;;  %v1032_v42 = vshll.u32 %v5184_v27, 16  ;;  %1085 = vst [vmem:[#allocation2 + $0x10] sm:$0xf] %v1084_v39 }
 0x11f   : > { %v1090_v44 = vsel %vm6877_vm7, %v1018_v56, %v1089_v22  ;;  %v1093_v45 = vsel %vm6756_vm3, %v1019_v36, %v1092_v26  ;;  %1088 = vst [vmem:[#allocation2 + $0x14] sm:$0x1] %v1087_v40  ;;  %v954_v55 = vadd.f32 %v6808_v49, %v946_v29  ;;  %v5200_v57 = vunpack.c.h.bf16 %v6865_v52  ;;  %v1347_v10 = vld [vmem:[#allocation2] sm:$0xf]  ;;  %v6937_v26 = vld [vmem:[#allocation7 + $0x6] sm:$0x3] }
 0x120   : > { %v6905_v46 = vrot.slane %v1021_v37, 7  ;;  %1091 = vst [vmem:[#allocation2 + $0x18] sm:$0xf] %v1090_v44  ;;  %1094 = vst [vmem:[#allocation2 + $0x1c] sm:$0x1] %v1093_v45  ;;  %v6908_v50 = vrot.slane %v1029_v41, 7  ;;  %v613_v58 = vmul.f32 %v5199_v7, %v6806_v48  ;;  %v5203_v61 = vunpack.c.l.bf16 %v6899_v43 }
 0x121   : > { %v5204_v62 = vunpack.c.h.bf16 %v6899_v43  ;;  %v961_v4 = vmax.f32 %v953_v47, 0.0  ;;  %v962_v7 = vmax.f32 %v954_v55, 0.0  ;;  %v614_v8 = vmul.f32 %v5200_v57, %v6806_v48  ;;  %v1107_v29 = vld [vmem:[#allocation2 + $0x30] sm:$0xf]  ;;  %v1113_v34 = vld [vmem:[#allocation2 + $0x38] sm:$0xf] }
 0x122   : > { %v5881_v59 = vld [vmem:[#allocation2 + $0x78] ss:$8 sps:$4 sm:$0xff]   ;;  %v1026_v60 = vor.u32 %v1024_v38, %v6905_v46  ;;  %v1027_v63 = vrot.slane %v6905_v46, 4  ;;  %v1034_v2 = vor.u32 %v1032_v42, %v6908_v50  ;;  %v1035_v3 = vrot.slane %v6908_v50, 4  ;;  %p7719_p1 = scmp.ne.s32.totalorder %s7693_s24, 0  ;;  %s6310_s20 = smov [#allocation18]  }
 0x123   : > { %5431 = vmatmul.mubr.msk.bf16.gmra.mrb[4].mxu1 %vm1165_vm5, %v5881_v59  ;;  %v627_v9 = vadd.f32 %v6808_v49, %v613_v58  ;;  %vm1363_vm8 = vsmask.f32 3328  ;;  %vm1364_vm9 = vsmask.f32 7440  ;;  %v5185_v14 = vpack.c.bf16 %v961_v4, %v961_v4  ;;  %s6217_s16 = sshll.u32 %s6310_s20, 4  ;;  %s6218_s16 = int_to_ptr.vmem [resolvable:$false] %s6217_s16 }
 0x124   : > { %v1096_v52 = vsel %vm6877_vm7, %v1026_v60, %v1095_v53  ;;  %v5878_v11 = vld [vmem:[#allocation2] ss:$8 sps:$4 sm:$0xff]   ;;  %v1102_v12 = vsel %vm6877_vm7, %v1034_v2, %v1101_v54  ;;  %1786 = vmatprep.mubr.bf16.mxu1 %v6309_v0  ;;  %v6929_v15 = vsel %vm1178_vm4, %v6871_v6, 0  ;;  %v1505_v16 = vsel %vm1178_vm4, %v6845_v32, 0  ;;  %v1350_v22 = vld [vmem:[#allocation2 + $0xc] sm:$0x1]  ;;  %vm6963_vm10 = vmor %vm1363_vm8, %vm1364_vm9  ;;  %p6215_p13 = pnand %p6214_p12, %p7719_p1  ;;  %p6220_p2 = scmp.lt.s32.totalorder %s7625_s10, %s6218_s16 }
 0x125   : > { %1097 = vst [vmem:[#allocation2 + $0x20] sm:$0xf] %v1096_v52  ;;  %1103 = vst [vmem:[#allocation2 + $0x28] sm:$0xf] %v1102_v12  ;;  %v5186_v17 = vpack.c.bf16 %v962_v7, %v962_v7  ;;  %v628_v18 = vadd.f32 %v6808_v49, %v614_v8  ;;  %v635_v19 = vmax.f32 %v627_v9, 0.0  ;;  %v429_v20 = vsel %vm6756_vm3, 0, %v428_v5  ;;  %5436 = vmatprep.mubr.msk.bf16.mxu0 %vm1165_vm5, %v5878_v11 }
 0x126   : > { %v1349_v21 = vld [vmem:[#allocation2 + $0x8] sm:$0xf]  ;;  %v1037_v23 = vshrl.u32 %v5185_v14, 16  ;;  %v1040_v24 = vshll.u32 %v5185_v14, 16  ;;  %430 = vst [vmem:[#allocation2 + $0x4] sm:$0x1] %v429_v20  ;;  %v615_v31 = vmul.f32 %v5203_v61, %v6806_v48  ;;  %v616_v52 = vmul.f32 %v5204_v62, %v6806_v48  ;;  %p6216_p0 = pneg %p6215_p13 }
 0x127   : > { %v1367_v6 = vshrl.u32 %v1347_v10, 16  ;;  %v1370_v25 = vshll.u32 %v1347_v10, 16  ;;  %v5880_v32 = vld [vmem:[#allocation2 + $0x10] ss:$8 sps:$4 sm:$0xff]   ;;  %v1045_v27 = vshrl.u32 %v5186_v17, 16  ;;  %v1048_v28 = vshll.u32 %v5186_v17, 16 }
 0x128   : > { %v643_v30 = vpack.c.bf16 %v635_v19, %v635_v19  ;;  %v6940_v33 = vrot.slane %v1037_v23, 7  ;;  %v636_v35 = vmax.f32 %v628_v18, 0.0  ;;  %v1351_v37 = vld [vmem:[#allocation2 + $0x10] sm:$0xf]  ;;  %5437 = vmatmul.mubr.msk.bf16.vlgmr.msra.gmra.mrb[0].mxu0 %vm1165_vm5, %v5880_v32  ;;  %v1381_v39 = vshrl.u32 %v1349_v21, 16  ;;  %v6968_v18 = vld [vmem:[%s6645_s13 + $0x10] sm:$0xff]  }
 0x129   : > { %v1369_v56 = vrot.slane %v1367_v6, 4  ;;  %v1372_v36 = vrot.slane %v1370_v25, 5  ;;  %v6943_v38 = vrot.slane %v1045_v27, 7  ;;  %v1384_v40 = vshll.u32 %v1349_v21, 16  ;;  %v1352_v42 = vld [vmem:[#allocation2 + $0x14] sm:$0x1]  ;;  %5445 = vmatpush3.bf16.msra.mxu0 %v1505_v16 }
 0x12a   : > { %652 = vst.msk [vmem:[#allocation2 + $0xd8] sm:$0xf] %vm423_vm0, %v643_v30  ;;  %v1390_v41 = vshll.u32 %v1350_v22, 16  ;;  %v1042_v44 = vor.u32 %v1040_v24, %v6940_v33  ;;  %v1043_v45 = vrot.slane %v6940_v33, 4  ;;  %v644_v47 = vpack.c.bf16 %v636_v35, %v636_v35  ;;  %v1353_v54 = vld [vmem:[#allocation2 + $0x18] sm:$0xf]  ;;  %5747 = vmatprep.subr.msk.bf16.mxu0 %vm1178_vm4, %v6937_v26 }
 0x12b   : > { %v1373_v53 = vor.u32 %v1372_v36, %v1369_v56  ;;  %v1354_v55 = vld [vmem:[#allocation2 + $0x1c] sm:$0x1]  ;;  %v1050_v57 = vor.u32 %v1048_v28, %v6943_v38  ;;  %v1051_v58 = vrot.slane %v6943_v38, 4  ;;  %v1383_v59 = vrot.slane %v1381_v39, 4  ;;  %v444_v12 = vld [vmem:[#allocation2 + $0x24] sm:$0x1] }
 0x12c   : > { %v1386_v60 = vrot.slane %v1384_v40, 5  ;;  %v5882_v61 = vld [vmem:[#allocation2 + $0x20] ss:$8 sps:$4 sm:$0xff]   ;;  %v1108_v2 = vsel %vm6877_vm7, %v1042_v44, %v1107_v29  ;;  %653 = vst.msk [vmem:[#allocation2 + $0xe0] sm:$0xf] %vm423_vm0, %v644_v47  ;;  %v1392_v5 = vrot.slane %v1390_v41, 5  ;;  %v629_v30 = vadd.f32 %v6808_v49, %v615_v31 }
 0x12d   : > { %v1374_v4 = vrot.slane %v1373_v53, 4  ;;  %1109 = vst [vmem:[#allocation2 + $0x30] sm:$0xf] %v1108_v2  ;;  %v1114_v7 = vsel %vm6877_vm7, %v1050_v57, %v1113_v34  ;;  %v1348_v8 = vld [vmem:[#allocation2 + $0x4] sm:$0x1]  ;;  %v1395_v10 = vshrl.u32 %v1351_v37, 16  ;;  %5440 = vmatprep.mubr.msk.bf16.mxu0 %vm1165_vm5, %v5882_v61  ;;  %v630_v36 = vadd.f32 %v6808_v49, %v616_v52 }
 0x12e   : > { %v1387_v9 = vor.u32 %v1386_v60, %v1383_v59  ;;  %v1398_v11 = vshll.u32 %v1351_v37, 16  ;;  %1115 = vst [vmem:[#allocation2 + $0x38] sm:$0xf] %v1114_v7  ;;  %v1376_v43 = vshll.u32 %v1348_v8, 16  ;;  %v1404_v62 = vshll.u32 %v1352_v42, 16  ;;  %s6219_s18 = scalar_lea.vmem %s6218_s16, 2048 }
 0x12f   : > { %v1409_v16 = vshrl.u32 %v1353_v54, 16  ;;  %v1412_v17 = vshll.u32 %v1353_v54, 16  ;;  %v1397_v20 = vrot.slane %v1395_v10, 4  ;;  %v1418_v22 = vshll.u32 %v1354_v55, 16  ;;  %v448_v23 = vld [vmem:[#allocation2 + $0x2c] sm:$0x1]  ;;  %p6221_p8 = scmp.lt.s32.totalorder %s6219_s18, %s6213_s26 }
 0x130   : > { %v1388_v19 = vrot.slane %v1387_v9, 4  ;;  %v1400_v21 = vrot.slane %v1398_v11, 5  ;;  %v1378_v24 = vrot.slane %v1376_v43, 5  ;;  %v6970_v6 = vrot.slane %v1404_v62, 5  ;;  %v1355_v34 = vld [vmem:[#allocation2 + $0x20] sm:$0xf] }
 0x131   : > { %v1411_v25 = vrot.slane %v1409_v16, 4  ;;  %v1414_v32 = vrot.slane %v1412_v17, 5  ;;  %v1420_v29 = vrot.slane %v1418_v22, 5  ;;  %v445_v37 = vsel %vm6756_vm3, 0, %v444_v12  ;;  %v1357_v39 = vld [vmem:[#allocation2 + $0x28] sm:$0xf]  ;;  %p6222_p6 = por %p6221_p8, %p6220_p2 }
 0x132   : > { %v1393_v27 = vsel %vm6963_vm10, %v1388_v19, %v1392_v5  ;;  %v1401_v28 = vor.u32 %v1400_v21, %v1397_v20  ;;  %v1379_v35 = vsel %vm6963_vm10, %v1374_v4, %v1378_v24  ;;  %v452_v40 = vld [vmem:[#allocation2 + $0x34] sm:$0x1]  ;;  %v6980_v41 = vld [vmem:[#allocation7 + $0xc] sm:$0x3]  ;;  %v637_v53 = vmax.f32 %v629_v30, 0.0 }
 0x133   : > { %v1415_v56 = vor.u32 %v1414_v32, %v1411_v25  ;;  %v5884_v42 = vld [vmem:[#allocation2 + $0xd8] ss:$8 sps:$4 sm:$0xff]   ;;  %v4965_v44 = vcombine.low %v1379_v35, %v1393_v27  ;;  %446 = vst [vmem:[#allocation2 + $0x24] sm:$0x1] %v445_v37  ;;  %v456_v31 = vld [vmem:[#allocation2 + $0x3c] sm:$0x1]  ;;  %v5207_v54 = vunpack.c.l.bf16 %v6968_v18  ;;  %v5208_v52 = vunpack.c.h.bf16 %v6968_v18  ;;  %p6223_p10 = pnand %p6222_p6, %p6216_p0 }
 0x134   : > { %v1402_v47 = vrot.slane %v1401_v28, 4  ;;  %v638_v57 = vmax.f32 %v630_v36, 0.0  ;;  %v449_v59 = vsel %vm6756_vm3, 0, %v448_v23  ;;  %v1423_v60 = vshrl.u32 %v1355_v34, 16  ;;  %4987 = vmatmul.mubr.msk.bf16.vlgmr.msra.gmra.mrb[8].mxu1 %vm1165_vm5, %v5884_v42  ;;  %v1359_v11 = vld [vmem:[#allocation2 + $0x30] sm:$0xf] }
 0x135   : > { %v1416_v55 = vrot.slane %v1415_v56, 4  ;;  %v5883_v61 = vld [vmem:[#allocation2 + $0x30] ss:$8 sps:$4 sm:$0xff]   ;;  %v645_v2 = vpack.c.bf16 %v637_v53, %v637_v53  ;;  %450 = vst [vmem:[#allocation2 + $0x2c] sm:$0x1] %v449_v59  ;;  %v1426_v4 = vshll.u32 %v1355_v34, 16  ;;  %5465 = vmatpush3.bf16.msra.mxu1 %v6929_v15  ;;  %1796 = vmatprep.mubr.bf16.mxu1 %v6309_v0  ;;  %v617_v24 = vmul.f32 %v5207_v54, %v6806_v48 }
 0x136   : > { %v1437_v5 = vshrl.u32 %v1357_v39, 16  ;;  %v1407_v7 = vsel %vm6963_vm10, %v1402_v47, %v6970_v6  ;;  %v646_v8 = vpack.c.bf16 %v638_v57, %v638_v57  ;;  %v1425_v9 = vrot.slane %v1423_v60, 4  ;;  %v1361_v12 = vld [vmem:[#allocation2 + $0x38] sm:$0xf]  ;;  %5441 = vmatmul.mubr.msk.bf16.gmra.mrb[4].mxu0 %vm1165_vm5, %v5883_v61  ;;  %5749 = vmatprep.subr.msk.bf16.mxu1 %vm1178_vm4, %v6980_v41  ;;  %v5264_v6 = vld [vmem:[%s6645_s13 + $0x20] sm:$0xff]   ;;  %v5263_v47 = vld [vmem:[%s6645_s13 + $0x18] sm:$0xff]  }
 0x137   : > { %v1440_v10 = vshll.u32 %v1357_v39, 16  ;;  %v1421_v43 = vsel %vm6963_vm10, %v1416_v55, %v1420_v29  ;;  %654 = vst.msk [vmem:[#allocation2 + $0xe8] sm:$0xf] %vm423_vm0, %v645_v2  ;;  %v1428_v62 = vrot.slane %v1426_v4, 5  ;;  %v453_v16 = vsel %vm6756_vm3, 0, %v452_v40  ;;  %5446 = vmatprep.mubr.msk.bf16.mxu0 %vm1165_vm5, %v4965_v44  ;;  %v5265_v44 = vld [vmem:[%s6645_s13 + $0x28] sm:$0xff]  }
 0x138   : > { %v1439_v15 = vrot.slane %v1437_v5, 4  ;;  %655 = vst.msk [vmem:[#allocation2 + $0xf0] sm:$0xf] %vm423_vm0, %v646_v8  ;;  %454 = vst [vmem:[#allocation2 + $0x34] sm:$0x1] %v453_v16  ;;  %v457_v18 = vsel %vm6756_vm3, 0, %v456_v31  ;;  %v618_v29 = vmul.f32 %v5208_v52, %v6806_v48  ;;  %v4966_v30 = vcombine.low %v1407_v7, %v1421_v43 }
 0x139   : > { %v1442_v17 = vrot.slane %v1440_v10, 5  ;;  %v1451_v19 = vshrl.u32 %v1359_v11, 16  ;;  %v1454_v20 = vshll.u32 %v1359_v11, 16  ;;  %v1429_v21 = vor.u32 %v1428_v62, %v1425_v9  ;;  %458 = vst [vmem:[#allocation2 + $0x3c] sm:$0x1] %v457_v18  ;;  %v7026_v54 = vld [vmem:[%s6645_s13 + $0x30] sm:$0xff]  }
 0x13a   : > { %v1465_v22 = vshrl.u32 %v1361_v12, 16  ;;  %v1468_v23 = vshll.u32 %v1361_v12, 16  ;;  %v1098_v25 = vld [vmem:[#allocation2 + $0x24] sm:$0x1]  ;;  %v631_v40 = vadd.f32 %v6808_v49, %v617_v24  ;;  %v632_v42 = vadd.f32 %v6808_v49, %v618_v29  ;;  %v7028_v61 = vld [vmem:[#allocation7 + $0xe] sm:$0x3] }
 0x13b   : > { %v1443_v32 = vor.u32 %v1442_v17, %v1439_v15  ;;  %v1453_v27 = vrot.slane %v1451_v19, 4  ;;  %v1456_v28 = vrot.slane %v1454_v20, 5  ;;  %v1099_v34 = vsel %vm6756_vm3, %v1027_v63, %v1098_v25 }
 0x13c   : > { %v1467_v35 = vrot.slane %v1465_v22, 4  ;;  %v1470_v56 = vrot.slane %v1468_v23, 5  ;;  %1100 = vst [vmem:[#allocation2 + $0x24] sm:$0x1] %v1099_v34  ;;  %v1104_v36 = vld [vmem:[#allocation2 + $0x2c] sm:$0x1]  ;;  %v5215_v31 = vunpack.c.l.bf16 %v5264_v6  ;;  %v5216_v60 = vunpack.c.h.bf16 %v5264_v6 }
 0x13d   : > { %v7011_v37 = vrot.slane %v1429_v21, 4  ;;  %v1457_v39 = vor.u32 %v1456_v28, %v1453_v27  ;;  %v1105_v46 = vsel %vm6756_vm3, %v1035_v3, %v1104_v36  ;;  %v7021_v53 = vrot.slane %v1443_v32, 4 }
 0x13e   : > { %v1623_v63 = vsel %vm1178_vm4, %v6937_v26, 0  ;;  %1106 = vst [vmem:[#allocation2 + $0x2c] sm:$0x1] %v1105_v46  ;;  %v1471_v55 = vor.u32 %v1470_v56, %v1467_v35  ;;  %v639_v57 = vmax.f32 %v631_v40, 0.0  ;;  %v640_v59 = vmax.f32 %v632_v42, 0.0  ;;  %5447 = vmatmul.mubr.msk.bf16.vlgmr.msra.gmra.mrb[0].mxu0 %vm1165_vm5, %v4966_v30 }
 0x13f   : > { %v5885_v50 = vld [vmem:[#allocation2 + $0xe8] ss:$8 sps:$4 sm:$0xff]   ;;  %v1110_v2 = vld [vmem:[#allocation2 + $0x34] sm:$0x1]  ;;  %v677_v3 = vmul.f32 %v5215_v31, %v6806_v48  ;;  %v5219_v4 = vunpack.c.l.bf16 %v5265_v44  ;;  %v5220_v5 = vunpack.c.h.bf16 %v5265_v44  ;;  %v5211_v52 = vunpack.c.l.bf16 %v5263_v47  ;;  %5455 = vmatpush3.bf16.msra.mxu0 %v1623_v63 }
 0x140   : > { %v1111_v26 = vsel %vm6756_vm3, %v1043_v45, %v1110_v2  ;;  %v1116_v7 = vld [vmem:[#allocation2 + $0x3c] sm:$0x1]  ;;  %v7036_v8 = vrot.slane %v1457_v39, 4  ;;  %v647_v9 = vpack.c.bf16 %v639_v57, %v639_v57  ;;  %v648_v10 = vpack.c.bf16 %v640_v59, %v640_v59  ;;  %4988 = vmatmul.mubr.msk.bf16.gmra.mrb[12].mxu1 %vm1165_vm5, %v5885_v50  ;;  %5750 = vmatprep.subr.msk.bf16.mxu0 %vm1178_vm4, %v7028_v61 }
 0x141   : > { %1112 = vst [vmem:[#allocation2 + $0x34] sm:$0x1] %v1111_v26  ;;  %v1117_v11 = vsel %vm6756_vm3, %v1051_v58, %v1116_v7  ;;  %v678_v12 = vmul.f32 %v5216_v60, %v6806_v48  ;;  %v685_v33 = vadd.f32 %v6808_v49, %v677_v3  ;;  %v679_v45 = vmul.f32 %v5219_v4, %v6806_v48 }
 0x142   : > { %1118 = vst [vmem:[#allocation2 + $0x3c] sm:$0x1] %v1117_v11  ;;  %1806 = vmatprep.mubr.bf16.mxu1 %v6309_v0  ;;  %656 = vst.msk [vmem:[#allocation2 + $0xf8] sm:$0xf] %vm423_vm0, %v647_v9  ;;  %v680_v43 = vmul.f32 %v5220_v5, %v6806_v48  ;;  %v5212_v62 = vunpack.c.h.bf16 %v5263_v47  ;;  %v619_v38 = vmul.f32 %v5211_v52, %v6806_v48  ;;  %v5223_v58 = vunpack.c.l.bf16 %v7026_v54  ;;  %v817_v47 = vld [vmem:[#allocation2 + $0x90] sm:$0xf] }
 0x143   : > { %657 = vst.msk [vmem:[#allocation2 + $0x100] sm:$0xf] %vm423_vm0, %v648_v10  ;;  %v1356_v15 = vld [vmem:[#allocation2 + $0x24] sm:$0x1]  ;;  %v1472_v16 = vrot.slane %v1471_v55, 4  ;;  %v686_v17 = vadd.f32 %v6808_v49, %v678_v12  ;;  %v693_v18 = vmax.f32 %v685_v33, 0.0  ;;  %v687_v19 = vadd.f32 %v6808_v49, %v679_v45 }
 0x144   : > { %v1432_v20 = vshll.u32 %v1356_v15, 16  ;;  %v688_v21 = vadd.f32 %v6808_v49, %v680_v43  ;;  %v620_v22 = vmul.f32 %v5212_v62, %v6806_v48  ;;  %v633_v23 = vadd.f32 %v6808_v49, %v619_v38  ;;  %v823_v33 = vld [vmem:[#allocation2 + $0x98] sm:$0xf]  ;;  %v829_v15 = vld [vmem:[#allocation2 + $0xa0] sm:$0xf] }
 0x145   : > { %v1358_v24 = vld [vmem:[#allocation2 + $0x2c] sm:$0x1]  ;;  %v694_v6 = vmax.f32 %v686_v17, 0.0  ;;  %v5172_v25 = vpack.c.bf16 %v693_v18, %v693_v18  ;;  %v695_v32 = vmax.f32 %v687_v19, 0.0  ;;  %v5224_v27 = vunpack.c.h.bf16 %v7026_v54  ;;  %v835_v17 = vld [vmem:[#allocation2 + $0xa8] sm:$0xf] }
 0x146   : > { %v1434_v28 = vrot.slane %v1432_v20, 5  ;;  %v1446_v29 = vshll.u32 %v1358_v24, 16  ;;  %v696_v30 = vmax.f32 %v688_v21, 0.0  ;;  %v681_v34 = vmul.f32 %v5223_v58, %v6806_v48  ;;  %v5267_v21 = vld [vmem:[%s6645_s13 + $0x38] sm:$0xff]   ;;  %v2308_v13 = vld [vmem:[#allocation2 + $0x24] sm:$0x1] }
 0x147   : > { %v5173_v35 = vpack.c.bf16 %v694_v6, %v694_v6  ;;  %v734_v56 = vshrl.u32 %v5172_v25, 16  ;;  %v737_v36 = vshll.u32 %v5172_v25, 16  ;;  %v634_v39 = vadd.f32 %v6808_v49, %v620_v22  ;;  %v500_v22 = vld [vmem:[#allocation2 + $0x94] sm:$0x1]  ;;  %v504_v6 = vld [vmem:[#allocation2 + $0x9c] sm:$0x1] }
 0x148   : > { %v1435_v40 = vsel %vm6963_vm10, %v7011_v37, %v1434_v28  ;;  %v1448_v42 = vrot.slane %v1446_v29, 5  ;;  %v1360_v44 = vld [vmem:[#allocation2 + $0x34] sm:$0x1]  ;;  %v5174_v46 = vpack.c.bf16 %v695_v32, %v695_v32  ;;  %v641_v63 = vmax.f32 %v633_v23, 0.0  ;;  %v508_v25 = vld [vmem:[#allocation2 + $0xa4] sm:$0x1] }
 0x149   : > { %v1362_v31 = vld [vmem:[#allocation2 + $0x3c] sm:$0x1]  ;;  %v1460_v54 = vshll.u32 %v1360_v44, 16  ;;  %v7065_v55 = vrot.slane %v734_v56, 7  ;;  %v5175_v57 = vpack.c.bf16 %v696_v30, %v696_v30  ;;  %v682_v59 = vmul.f32 %v5224_v27, %v6806_v48 }
 0x14a   : > { %v1449_v60 = vsel %vm6963_vm10, %v7021_v53, %v1448_v42  ;;  %v1474_v50 = vshll.u32 %v1362_v31, 16  ;;  %v5886_v2 = vld [vmem:[#allocation2 + $0xf8] ss:$8 sps:$4 sm:$0xff]   ;;  %v742_v3 = vshrl.u32 %v5173_v35, 16  ;;  %v649_v37 = vpack.c.bf16 %v641_v63, %v641_v63 }
 0x14b   : > { %v4967_v4 = vcombine.low %v1435_v40, %v1449_v60  ;;  %v1462_v5 = vrot.slane %v1460_v54, 5  ;;  %v739_v52 = vor.u32 %v737_v36, %v7065_v55  ;;  %v689_v26 = vadd.f32 %v6808_v49, %v681_v34  ;;  %4989 = vmatmul.mubr.msk.bf16.gmra.mrb[16].mxu1 %vm1165_vm5, %v5886_v2  ;;  %v512_v36 = vld [vmem:[#allocation2 + $0xac] sm:$0x1]  ;;  %v7113_v2 = vld [vmem:[#allocation12] ss:$0 sm:$0xff] }
 0x14c   : > { %v1476_v7 = vrot.slane %v1474_v50, 5  ;;  %v7074_v9 = vrot.slane %v742_v3, 7  ;;  %v745_v10 = vshll.u32 %v5173_v35, 16  ;;  %v750_v11 = vshrl.u32 %v5174_v46, 16  ;;  %658 = vst.msk [vmem:[#allocation2 + $0x108] sm:$0xf] %vm423_vm0, %v649_v37  ;;  %1816 = vmatprep.mubr.bf16.mxu1 %v6309_v0 }
 0x14d   : > { %5450 = vmatprep.mubr.msk.bf16.mxu0 %vm1165_vm5, %v4967_v4  ;;  %v1463_v53 = vsel %vm6963_vm10, %v7036_v8, %v1462_v5  ;;  %v818_v12 = vsel %vm6877_vm7, %v739_v52, %v817_v47  ;;  %v753_v45 = vshll.u32 %v5174_v46, 16  ;;  %v758_v43 = vshrl.u32 %v5175_v57, 16  ;;  %v841_v50 = vld [vmem:[#allocation2 + $0xb0] sm:$0xf] }
 0x14e   : > { %v1477_v62 = vsel %vm6963_vm10, %v1472_v16, %v1476_v7  ;;  %v747_v38 = vor.u32 %v745_v10, %v7074_v9  ;;  %819 = vst [vmem:[#allocation2 + $0x90] sm:$0xf] %v818_v12  ;;  %v7087_v58 = vrot.slane %v750_v11, 7  ;;  %v761_v19 = vshll.u32 %v5175_v57, 16 }
 0x14f   : > { %v4968_v8 = vcombine.low %v1463_v53, %v1477_v62  ;;  %v7089_v18 = vrot.slane %v758_v43, 7  ;;  %v642_v20 = vmax.f32 %v634_v39, 0.0  ;;  %v740_v23 = vrot.slane %v7065_v55, 4 }
 0x150   : > { %v824_v0 = vsel %vm6877_vm7, %v747_v38, %v823_v33  ;;  %v755_v16 = vor.u32 %v753_v45, %v7087_v58  ;;  %v690_v24 = vadd.f32 %v6808_v49, %v682_v59  ;;  %v748_v32 = vrot.slane %v7074_v9, 4 }
 0x151   : > { %5451 = vmatmul.mubr.msk.bf16.gmra.mrb[4].mxu0 %vm1165_vm5, %v4968_v8  ;;  %825 = vst [vmem:[#allocation2 + $0x98] sm:$0xf] %v824_v0  ;;  %v763_v27 = vor.u32 %v761_v19, %v7089_v18  ;;  %v650_v28 = vpack.c.bf16 %v642_v20, %v642_v20  ;;  %v697_v29 = vmax.f32 %v689_v26, 0.0  ;;  %v5227_v35 = vunpack.c.l.bf16 %v5267_v21 }
 0x152   : > { %v830_v30 = vsel %vm6877_vm7, %v755_v16, %v829_v15  ;;  %v698_v34 = vmax.f32 %v690_v24, 0.0  ;;  %v5228_v56 = vunpack.c.h.bf16 %v5267_v21  ;;  %v501_v40 = vsel %vm6756_vm3, 0, %v500_v22 }
 0x153   : > { %831 = vst [vmem:[#allocation2 + $0xa0] sm:$0xf] %v830_v30  ;;  %v836_v49 = vsel %vm6877_vm7, %v763_v27, %v835_v17  ;;  %659 = vst.msk [vmem:[#allocation2 + $0x110] sm:$0xf] %vm423_vm0, %v650_v28  ;;  %v5176_v39 = vpack.c.bf16 %v697_v29, %v697_v29  ;;  %v505_v42 = vsel %vm6756_vm3, 0, %v504_v6  ;;  %v683_v47 = vmul.f32 %v5227_v35, %v6806_v48 }
 0x154   : > { %837 = vst [vmem:[#allocation2 + $0xa8] sm:$0xf] %v836_v49  ;;  %v5177_v44 = vpack.c.bf16 %v698_v34, %v698_v34  ;;  %v684_v46 = vmul.f32 %v5228_v56, %v6806_v48  ;;  %502 = vst [vmem:[#allocation2 + $0x94] sm:$0x1] %v501_v40  ;;  %v509_v63 = vsel %vm6756_vm3, 0, %v508_v25  ;;  %v513_v26 = vsel %vm6756_vm3, 0, %v512_v36 }
 0x155   : > { %506 = vst [vmem:[#allocation2 + $0x9c] sm:$0x1] %v505_v42  ;;  %v766_v31 = vshrl.u32 %v5176_v39, 16  ;;  %v769_v54 = vshll.u32 %v5176_v39, 16  ;;  %v1835_v57 = vld [vmem:[#allocation2 + $0x90] sm:$0xf]  ;;  %v691_v3 = vadd.f32 %v7113_v2, %v683_v47  ;;  %v5260_v24 = vunpack.c.h.bf16 %v6862_v51 }
 0x156   : > { %510 = vst [vmem:[#allocation2 + $0xa4] sm:$0x1] %v509_v63  ;;  %v774_v59 = vshrl.u32 %v5177_v44, 16  ;;  %v777_v60 = vshll.u32 %v5177_v44, 16  ;;  %v692_v37 = vadd.f32 %v7113_v2, %v684_v46  ;;  %v847_v48 = vld [vmem:[#allocation2 + $0xb8] sm:$0xf] }
 0x157   : > { %v7117_v4 = vrot.slane %v766_v31, 7  ;;  %v1852_v5 = vshrl.u32 %v1835_v57, 16  ;;  %v1855_v52 = vshll.u32 %v1835_v57, 16  ;;  %v699_v11 = vmax.f32 %v691_v3, 0.0  ;;  %514 = vst [vmem:[#allocation2 + $0xac] sm:$0x1] %v513_v26 }
 0x158   : > { %v5887_v7 = vld [vmem:[#allocation2 + $0x90] ss:$8 sps:$4 sm:$0xff]   ;;  %v7121_v10 = vrot.slane %v774_v59, 7  ;;  %v756_v53 = vrot.slane %v7087_v58, 4  ;;  %v764_v12 = vrot.slane %v7089_v18, 4  ;;  %v700_v45 = vmax.f32 %v692_v37, 0.0 }
 0x159   : > { %v771_v33 = vor.u32 %v769_v54, %v7117_v4  ;;  %v1837_v43 = vld [vmem:[#allocation2 + $0x98] sm:$0xf]  ;;  %5456 = vmatprep.mubr.msk.bf16.mxu0 %vm1165_vm5, %v5887_v7  ;;  %v5178_v15 = vpack.c.bf16 %v699_v11, %v699_v11  ;;  %v1854_v20 = vrot.slane %v1852_v5, 4  ;;  %v1857_v21 = vrot.slane %v1855_v52, 5  ;;  %v853_v27 = vld [vmem:[#allocation2 + $0xc0] sm:$0xf] }
 0x15a   : > { %v5889_v62 = vld [vmem:[#allocation2 + $0x108] ss:$8 sps:$4 sm:$0xff]   ;;  %v779_v38 = vor.u32 %v777_v60, %v7121_v10  ;;  %v5179_v19 = vpack.c.bf16 %v700_v45, %v700_v45  ;;  %v1839_v34 = vld [vmem:[#allocation2 + $0xa0] sm:$0xf]  ;;  %v1866_v56 = vshrl.u32 %v1837_v43, 16  ;;  %v1869_v36 = vshll.u32 %v1837_v43, 16 }
 0x15b   : > { %v5888_v17 = vld [vmem:[#allocation2 + $0xa0] ss:$8 sps:$4 sm:$0xff]   ;;  %v842_v8 = vsel %vm6877_vm7, %v771_v33, %v841_v50  ;;  %4990 = vmatmul.mubr.msk.bf16.gmra.mrb[20].mxu1 %vm1165_vm5, %v5889_v62  ;;  %v782_v18 = vshrl.u32 %v5178_v15, 16  ;;  %v785_v22 = vshll.u32 %v5178_v15, 16  ;;  %v820_v0 = vld [vmem:[#allocation2 + $0x94] sm:$0x1]  ;;  %v1858_v57 = vor.u32 %v1857_v21, %v1854_v20 }
 0x15c   : > { %843 = vst [vmem:[#allocation2 + $0xb0] sm:$0xf] %v842_v8  ;;  %v848_v58 = vsel %vm6877_vm7, %v779_v38, %v847_v48  ;;  %v826_v16 = vld [vmem:[#allocation2 + $0x9c] sm:$0x1]  ;;  %5457 = vmatmul.mubr.msk.bf16.vlgmr.msra.gmra.mrb[0].mxu0 %vm1165_vm5, %v5888_v17  ;;  %v790_v6 = vshrl.u32 %v5179_v19, 16  ;;  %v793_v25 = vshll.u32 %v5179_v19, 16  ;;  %v821_v28 = vsel %vm6756_vm3, %v740_v23, %v820_v0 }
 0x15d   : > { %849 = vst [vmem:[#allocation2 + $0xb8] sm:$0xf] %v848_v58  ;;  %v827_v29 = vsel %vm6756_vm3, %v748_v32, %v826_v16  ;;  %v832_v30 = vld [vmem:[#allocation2 + $0xa4] sm:$0x1]  ;;  %v7143_v51 = vrot.slane %v782_v18, 7  ;;  %v5985_v39 = vld [vmem:[%s6645_s13 + $0x58] sm:$0xff]  }
 0x15e   : > { %v859_v35 = vld [vmem:[#allocation2 + $0xc8] sm:$0xf]  ;;  %822 = vst [vmem:[#allocation2 + $0x94] sm:$0x1] %v821_v28  ;;  %828 = vst [vmem:[#allocation2 + $0x9c] sm:$0x1] %v827_v29  ;;  %v5244_v55 = vunpack.c.h.bf16 %v5985_v39  ;;  %v833_v9 = vsel %vm6756_vm3, %v756_v53, %v832_v30 }
 0x15f   : > { %v1841_v49 = vld [vmem:[#allocation2 + $0xa8] sm:$0xf]  ;;  %v7146_v40 = vrot.slane %v790_v6, 7  ;;  %v838_v23 = vld [vmem:[#allocation2 + $0xac] sm:$0x1]  ;;  %v1880_v42 = vshrl.u32 %v1839_v34, 16  ;;  %v787_v63 = vor.u32 %v785_v22, %v7143_v51 }
 0x160   : > { %v1883_v32 = vshll.u32 %v1839_v34, 16  ;;  %v516_v44 = vld [vmem:[#allocation2 + $0xb4] sm:$0x1]  ;;  %v772_v47 = vrot.slane %v7117_v4, 4  ;;  %v780_v46 = vrot.slane %v7121_v10, 4  ;;  %v1868_v31 = vrot.slane %v1866_v56, 4 }
 0x161   : > { %834 = vst [vmem:[#allocation2 + $0xa4] sm:$0x1] %v833_v9  ;;  %v795_v54 = vor.u32 %v793_v25, %v7146_v40  ;;  %v1871_v59 = vrot.slane %v1869_v36, 5  ;;  %v839_v60 = vsel %vm6756_vm3, %v764_v12, %v838_v23  ;;  %v520_v50 = vld [vmem:[#allocation2 + $0xbc] sm:$0x1]  ;;  %v854_v3 = vsel %vm6877_vm7, %v787_v63, %v853_v27 }
 0x162   : > { %840 = vst [vmem:[#allocation2 + $0xac] sm:$0x1] %v839_v60  ;;  %v1882_v37 = vrot.slane %v1880_v42, 4  ;;  %v1885_v48 = vrot.slane %v1883_v32, 5  ;;  %v1894_v5 = vshrl.u32 %v1841_v49, 16  ;;  %v788_v52 = vrot.slane %v7143_v51, 4 }
 0x163   : > { %855 = vst [vmem:[#allocation2 + $0xc0] sm:$0xf] %v854_v3  ;;  %v860_v26 = vsel %vm6877_vm7, %v795_v54, %v859_v35  ;;  %v1872_v7 = vor.u32 %v1871_v59, %v1868_v31  ;;  %v1897_v11 = vshll.u32 %v1841_v49, 16  ;;  %v1843_v53 = vld [vmem:[#allocation2 + $0xb0] sm:$0xf]  ;;  %v517_v43 = vsel %vm6756_vm3, 0, %v516_v44 }
 0x164   : > { %v5890_v33 = vld [vmem:[#allocation2 + $0xb0] ss:$8 sps:$4 sm:$0xff]   ;;  %861 = vst [vmem:[#allocation2 + $0xc8] sm:$0xf] %v860_v26  ;;  %v1886_v12 = vor.u32 %v1885_v48, %v1882_v37  ;;  %v1896_v45 = vrot.slane %v1894_v5, 4  ;;  %v1859_v15 = vrot.slane %v1858_v57, 4 }
 0x165   : > { %v1836_v62 = vld [vmem:[#allocation2 + $0x94] sm:$0x1]  ;;  %v1838_v38 = vld [vmem:[#allocation2 + $0x9c] sm:$0x1]  ;;  %v1899_v17 = vrot.slane %v1897_v11, 5  ;;  %5460 = vmatprep.mubr.msk.bf16.mxu0 %vm1165_vm5, %v5890_v33  ;;  %v1873_v58 = vrot.slane %v1872_v7, 4 }
 0x166   : > { %518 = vst [vmem:[#allocation2 + $0xb4] sm:$0x1] %v517_v43  ;;  %v5986_v8 = vld [vmem:[#allocation10] ss:$0 sm:$0xff]  ;;  %v1861_v21 = vshll.u32 %v1836_v62, 16  ;;  %v1875_v18 = vshll.u32 %v1838_v38, 16 }
 0x167   : > { %v947_v19 = vmul.f32 %v5986_v8, %v5260_v24  ;;  %v889_v20 = vmul.f32 %v5986_v8, %v5244_v55  ;;  %v521_v22 = vsel %vm6756_vm3, 0, %v520_v50  ;;  %v1845_v0 = vld [vmem:[#allocation2 + $0xb8] sm:$0xf]  ;;  %v524_v16 = vld [vmem:[#allocation2 + $0xc4] sm:$0x1]  ;;  %v1900_v25 = vor.u32 %v1899_v17, %v1896_v45 }
 0x168   : > { %v1840_v6 = vld [vmem:[#allocation2 + $0xa4] sm:$0x1]  ;;  %v7168_v27 = vsel %vm1178_vm4, %v6980_v41, 0  ;;  %522 = vst [vmem:[#allocation2 + $0xbc] sm:$0x1] %v521_v22  ;;  %v1908_v28 = vshrl.u32 %v1843_v53, 16 }
 0x169   : > { %v1911_v24 = vshll.u32 %v1843_v53, 16  ;;  %v528_v29 = vld [vmem:[#allocation2 + $0xcc] sm:$0x1]  ;;  %v1863_v30 = vrot.slane %v1861_v21, 5  ;;  %v1877_v34 = vrot.slane %v1875_v18, 5  ;;  %v1887_v35 = vrot.slane %v1886_v12, 4 }
 0x16a   : > { %v1889_v56 = vshll.u32 %v1840_v6, 16  ;;  %v5894_v36 = vld [vmem:[#allocation2 + $0x50] ss:$8 sps:$4 sm:$0xff]   ;;  %v1842_v49 = vld [vmem:[#allocation2 + $0xac] sm:$0x1]  ;;  %v1901_v39 = vrot.slane %v1900_v25, 4  ;;  %v955_v5 = vadd.f32 %v7113_v2, %v947_v19  ;;  %v897_v53 = vadd.f32 %v7113_v2, %v889_v20 }
 0x16b   : > { %v7170_v55 = vrot.slane %v1908_v28, 4  ;;  %v1922_v9 = vshrl.u32 %v1845_v0, 16  ;;  %v1925_v23 = vshll.u32 %v1845_v0, 16  ;;  %v1864_v42 = vsel %vm6963_vm10, %v1859_v15, %v1863_v30  ;;  %v1847_v63 = vld [vmem:[#allocation2 + $0xc0] sm:$0xf] }
 0x16c   : > { %v1878_v41 = vsel %vm6963_vm10, %v1873_v58, %v1877_v34  ;;  %v1891_v32 = vrot.slane %v1889_v56, 5  ;;  %v1903_v44 = vshll.u32 %v1842_v49, 16  ;;  %v5891_v31 = vld [vmem:[#allocation2 + $0xc0] ss:$8 sps:$4 sm:$0xff]   ;;  %v7176_v57 = vrot.slane %v1911_v24, 5 }
 0x16d   : > { %v4991_v54 = vcombine.low %v1864_v42, %v1878_v41  ;;  %v525_v59 = vsel %vm6756_vm3, 0, %v524_v16  ;;  %v844_v3 = vld [vmem:[#allocation2 + $0xb4] sm:$0x1]  ;;  %v529_v37 = vsel %vm6756_vm3, 0, %v528_v29  ;;  %v1849_v48 = vld [vmem:[#allocation2 + $0xc8] sm:$0xf]  ;;  %5461 = vmatmul.mubr.msk.bf16.gmra.mrb[4].mxu0 %vm1165_vm5, %v5891_v31 }
 0x16e   : > { %v1892_v60 = vsel %vm6963_vm10, %v1887_v35, %v1891_v32  ;;  %v1905_v50 = vrot.slane %v1903_v44, 5  ;;  %526 = vst [vmem:[#allocation2 + $0xc4] sm:$0x1] %v525_v59  ;;  %v845_v26 = vsel %vm6756_vm3, %v772_v47, %v844_v3  ;;  %v1924_v7 = vrot.slane %v1922_v9, 4  ;;  %530 = vst [vmem:[#allocation2 + $0xcc] sm:$0x1] %v529_v37  ;;  %5486 = vmatprep.mubr.msk.bf16.mxu0 %vm1165_vm5, %v5894_v36 }
 0x16f   : > { %5466 = vmatprep.mubr.msk.bf16.mxu1 %vm1165_vm5, %v4991_v54  ;;  %v1936_v11 = vshrl.u32 %v1847_v63, 16  ;;  %v2301_v33 = vld [vmem:[#allocation2 + $0x8] sm:$0xf]  ;;  %846 = vst [vmem:[#allocation2 + $0xb4] sm:$0x1] %v845_v26  ;;  %v1939_v43 = vshll.u32 %v1847_v63, 16 }
 0x170   : > { %v1906_v12 = vsel %vm6963_vm10, %v1901_v39, %v1905_v50  ;;  %v850_v45 = vld [vmem:[#allocation2 + $0xbc] sm:$0x1]  ;;  %v1950_v62 = vshrl.u32 %v1849_v48, 16  ;;  %v1953_v38 = vshll.u32 %v1849_v48, 16  ;;  %v2430_v15 = vld [vmem:[#allocation7 + $0x10] sm:$0x3] }
 0x171   : > { %v4992_v4 = vcombine.low %v1892_v60, %v1906_v12  ;;  %v851_v47 = vsel %vm6756_vm3, %v780_v46, %v850_v45  ;;  %v1927_v17 = vrot.slane %v1925_v23, 5  ;;  %v1938_v2 = vrot.slane %v1936_v11, 4  ;;  %v5895_v8 = vld [vmem:[#allocation2 + $0x60] ss:$8 sps:$4 sm:$0xff]   ;;  %v5898_v18 = vld [vmem:[#allocation2 + $0x70] ss:$8 sps:$4 sm:$0xff]  }
 0x172   : > { %852 = vst [vmem:[#allocation2 + $0xbc] sm:$0x1] %v851_v47  ;;  %v1941_v19 = vrot.slane %v1939_v43, 5  ;;  %v1952_v20 = vrot.slane %v1950_v62, 4  ;;  %v1955_v21 = vrot.slane %v1953_v38, 5  ;;  %v2226_v58 = vsel %vm1178_vm4, %v7028_v61, 0 }
 0x173   : > { %v2302_v22 = vld [vmem:[#allocation2 + $0xc] sm:$0x1]  ;;  %v796_v0 = vrot.slane %v7146_v40, 4  ;;  %5467 = vmatmul.mubr.msk.bf16.vlgmr.msra.gmra.mrb[24].mxu1 %vm1165_vm5, %v4992_v4  ;;  %5485 = vmatpush3.bf16.msra.mxu0 %v2226_v58  ;;  %v963_v10 = vmax.f32 %v955_v5, 0.0  ;;  %v905_v16 = vmax.f32 %v897_v53, 0.0  ;;  %v1914_v46 = vor.u32 %v7176_v57, %v7170_v55 }
 0x174   : > { %5475 = vmatpush3.bf16.msra.mxu1 %v7168_v27  ;;  %v2318_v6 = vshrl.u32 %v2301_v33, 16  ;;  %v2321_v25 = vshll.u32 %v2301_v33, 16  ;;  %v1928_v28 = vor.u32 %v1927_v17, %v1924_v7  ;;  %v1942_v34 = vor.u32 %v1941_v19, %v1938_v2  ;;  %v2303_v27 = vld [vmem:[#allocation2 + $0x10] sm:$0xf]  ;;  %v2305_v56 = vld [vmem:[#allocation2 + $0x18] sm:$0xf] }
 0x175   : > { %v856_v24 = vld [vmem:[#allocation2 + $0xc4] sm:$0x1]  ;;  %5751 = vmatprep.subr.msk.bf16.mxu1 %vm1178_vm4, %v2430_v15  ;;  %v5187_v61 = vpack.c.bf16 %v963_v10, %v963_v10  ;;  %v913_v29 = vpack.c.bf16 %v905_v16, %v905_v16  ;;  %v862_v30 = vld [vmem:[#allocation2 + $0xcc] sm:$0x1]  ;;  %v1956_v35 = vor.u32 %v1955_v21, %v1952_v20  ;;  %v2327_v51 = vshll.u32 %v2302_v22, 16 }
 0x176   : > { %v857_v40 = vsel %vm6756_vm3, %v788_v52, %v856_v24  ;;  %v1844_v36 = vld [vmem:[#allocation2 + $0xb4] sm:$0x1]  ;;  %v863_v49 = vsel %vm6756_vm3, %v796_v0, %v862_v30  ;;  %5487 = vmatmul.mubr.msk.bf16.vlgmr.msra.gmra.mrb[8].mxu0 %vm1165_vm5, %v5895_v8  ;;  %v1915_v9 = vrot.slane %v1914_v46, 4  ;;  %v1119_v52 = vld [vmem:[#allocation2 + $0x40] sm:$0xf]  ;;  %v2320_v42 = vrot.slane %v2318_v6, 4 }
 0x177   : > { %858 = vst [vmem:[#allocation2 + $0xc4] sm:$0x1] %v857_v40  ;;  %v1053_v39 = vshrl.u32 %v5187_v61, 16  ;;  %v1056_v55 = vshll.u32 %v5187_v61, 16  ;;  %922 = vst.msk [vmem:[#allocation2 + $0x88] sm:$0xf] %vm423_vm0, %v913_v29  ;;  %5490 = vmatprep.mubr.msk.bf16.mxu0 %vm1165_vm5, %v5898_v18 }
 0x178   : > { %v1917_v23 = vshll.u32 %v1844_v36, 16  ;;  %864 = vst [vmem:[#allocation2 + $0xcc] sm:$0x1] %v863_v49  ;;  %v2323_v41 = vrot.slane %v2321_v25, 5  ;;  %v2307_v32 = vld [vmem:[#allocation2 + $0x20] sm:$0xf] }
 0x179   : > { %v1846_v44 = vld [vmem:[#allocation2 + $0xbc] sm:$0x1]  ;;  %v1929_v63 = vrot.slane %v1928_v28, 4  ;;  %v7216_v31 = vrot.slane %v1053_v39, 7  ;;  %v2332_v54 = vshrl.u32 %v2303_v27, 16  ;;  %v2335_v57 = vshll.u32 %v2303_v27, 16 }
 0x17a   : > { %v1919_v59 = vrot.slane %v1917_v23, 5  ;;  %v1931_v60 = vshll.u32 %v1846_v44, 16  ;;  %v1943_v50 = vrot.slane %v1942_v34, 4  ;;  %v7219_v3 = vsel %vm1178_vm4, %v2430_v15, 0  ;;  %v2304_v37 = vld [vmem:[#allocation2 + $0x14] sm:$0x1] }
 0x17b   : > { %v1957_v48 = vrot.slane %v1956_v35, 4  ;;  %v1058_v5 = vor.u32 %v1056_v55, %v7216_v31  ;;  %v7222_v26 = vrot.slane %v2327_v51, 5  ;;  %v2346_v7 = vshrl.u32 %v2305_v56, 16  ;;  %v2309_v15 = vld [vmem:[#allocation2 + $0x28] sm:$0xf] }
 0x17c   : > { %v1920_v11 = vsel %vm6963_vm10, %v1915_v9, %v1919_v59  ;;  %v1933_v53 = vrot.slane %v1931_v60, 5  ;;  %v2324_v33 = vor.u32 %v2323_v41, %v2320_v42  ;;  %v2349_v12 = vshll.u32 %v2305_v56, 16  ;;  %v2306_v21 = vld [vmem:[#allocation2 + $0x1c] sm:$0x1]  ;;  %v2311_v10 = vld [vmem:[#allocation2 + $0x30] sm:$0xf] }
 0x17d   : > { %v1120_v45 = vsel %vm6877_vm7, %v1058_v5, %v1119_v52  ;;  %v2334_v43 = vrot.slane %v2332_v54, 4  ;;  %v2337_v62 = vrot.slane %v2335_v57, 5  ;;  %v2360_v38 = vshrl.u32 %v2307_v32, 16  ;;  %v2310_v28 = vld [vmem:[#allocation2 + $0x2c] sm:$0x1] }
 0x17e   : > { %v1934_v4 = vsel %vm6963_vm10, %v1929_v63, %v1933_v53  ;;  %v1848_v47 = vld [vmem:[#allocation2 + $0xc4] sm:$0x1]  ;;  %1121 = vst [vmem:[#allocation2 + $0x40] sm:$0xf] %v1120_v45  ;;  %v5899_v17 = vld [vmem:[#allocation2 + $0x80] ss:$8 sps:$4 sm:$0xff]  }
 0x17f   : > { %v4993_v2 = vcombine.low %v1920_v11, %v1934_v4  ;;  %v1850_v8 = vld [vmem:[#allocation2 + $0xcc] sm:$0x1]  ;;  %v1945_v19 = vshll.u32 %v1848_v47, 16  ;;  %v2341_v20 = vshll.u32 %v2304_v37, 16  ;;  %5491 = vmatmul.mubr.msk.bf16.gmra.mrb[12].mxu0 %vm1165_vm5, %v5899_v17  ;;  %v2348_v18 = vrot.slane %v2346_v7, 4 }
 0x180   : > { %v1959_v58 = vshll.u32 %v1850_v8, 16  ;;  %v2351_v22 = vrot.slane %v2349_v12, 5  ;;  %v2363_v0 = vshll.u32 %v2307_v32, 16  ;;  %v1059_v46 = vrot.slane %v7216_v31, 4  ;;  %v5892_v61 = vld [vmem:[#allocation2 + $0x8] ss:$8 sps:$4 sm:$0xff]  }
 0x181   : > { %5470 = vmatprep.mubr.msk.bf16.mxu1 %vm1165_vm5, %v4993_v2  ;;  %v1947_v16 = vrot.slane %v1945_v19, 5  ;;  %v7233_v6 = vrot.slane %v2324_v33, 4  ;;  %v2338_v25 = vor.u32 %v2337_v62, %v2334_v43  ;;  %v2362_v29 = vrot.slane %v2360_v38, 4  ;;  %v2312_v30 = vld [vmem:[#allocation2 + $0x34] sm:$0x1] }
 0x182   : > { %v1961_v24 = vrot.slane %v1959_v58, 5  ;;  %v2365_v40 = vrot.slane %v2363_v0, 5  ;;  %v2374_v34 = vshrl.u32 %v2309_v15, 16  ;;  %v460_v35 = vld [vmem:[#allocation2 + $0x44] sm:$0x1]  ;;  %v2343_v56 = vrot.slane %v2341_v20, 5 }
 0x183   : > { %v1948_v27 = vsel %vm6963_vm10, %v1943_v50, %v1947_v16  ;;  %v2377_v36 = vshll.u32 %v2309_v15, 16  ;;  %v2313_v49 = vld [vmem:[#allocation2 + $0x38] sm:$0xf]  ;;  %v2352_v55 = vor.u32 %v2351_v22, %v2348_v18  ;;  %v2355_v51 = vshll.u32 %v2306_v21, 16  ;;  %v2314_v54 = vld [vmem:[#allocation2 + $0x3c] sm:$0x1] }
 0x184   : > { %v1962_v39 = vsel %vm6963_vm10, %v1957_v48, %v1961_v24  ;;  %v2376_v9 = vrot.slane %v2374_v34, 4  ;;  %v2369_v52 = vshll.u32 %v2308_v13, 16  ;;  %v2388_v41 = vshrl.u32 %v2311_v10, 16  ;;  %v5893_v11 = vld [vmem:[#allocation2 + $0x18] ss:$8 sps:$4 sm:$0xff]  }
 0x185   : > { %v4994_v23 = vcombine.low %v1948_v27, %v1962_v39  ;;  %v2379_v42 = vrot.slane %v2377_v36, 5  ;;  %v2339_v32 = vrot.slane %v2338_v25, 4  ;;  %v2366_v44 = vor.u32 %v2365_v40, %v2362_v29  ;;  %v2315_v12 = vld [vmem:[#allocation2 + $0x40] sm:$0xf]  ;;  %v5896_v45 = vld [vmem:[#allocation2 + $0x28] ss:$8 sps:$4 sm:$0xff]  }
 0x186   : > { %v2383_v63 = vshll.u32 %v2310_v28, 16  ;;  %v2391_v31 = vshll.u32 %v2311_v10, 16  ;;  %v2390_v59 = vrot.slane %v2388_v41, 4  ;;  %v2397_v60 = vshll.u32 %v2312_v30, 16  ;;  %v5897_v0 = vld [vmem:[#allocation2 + $0x38] ss:$8 sps:$4 sm:$0xff]  }
 0x187   : > { %5471 = vmatmul.mubr.msk.bf16.gmra.mrb[28].mxu1 %vm1165_vm5, %v4994_v23  ;;  %v2380_v57 = vor.u32 %v2379_v42, %v2376_v9  ;;  %v461_v50 = vsel %vm6756_vm3, 0, %v460_v35  ;;  %v2357_v37 = vrot.slane %v2355_v51, 5  ;;  %v2402_v5 = vshrl.u32 %v2313_v49, 16  ;;  %v5901_v9 = vld [vmem:[#allocation9 + $0x8] sm:$0xff]   ;;  %v5903_v42 = vld [vmem:[#allocation9 + $0x40] sm:$0xff]  }
 0x188   : > { %5476 = vmatprep.mubr.msk.bf16.mxu1 %vm1165_vm5, %v5892_v61  ;;  %v2393_v48 = vrot.slane %v2391_v31, 5  ;;  %462 = vst [vmem:[#allocation2 + $0x44] sm:$0x1] %v461_v50  ;;  %v2405_v7 = vshll.u32 %v2313_v49, 16  ;;  %v2353_v53 = vrot.slane %v2352_v55, 4  ;;  %v2371_v33 = vrot.slane %v2369_v52, 5 }
 0x189   : > { %v2367_v43 = vrot.slane %v2366_v44, 4  ;;  %v2385_v62 = vrot.slane %v2383_v63, 5  ;;  %v2411_v15 = vshll.u32 %v2314_v54, 16  ;;  %v2381_v4 = vrot.slane %v2380_v57, 4  ;;  %v5900_v49 = vld [vmem:[#allocation9] sm:$0xff]   ;;  %v5902_v52 = vld [vmem:[#allocation9 + $0x10] sm:$0xff]  }
 0x18a   : > { %v2394_v38 = vor.u32 %v2393_v48, %v2390_v59  ;;  %v2399_v47 = vrot.slane %v2397_v60, 5  ;;  %v2404_v17 = vrot.slane %v2402_v5, 4  ;;  %v2407_v2 = vrot.slane %v2405_v7, 5  ;;  %5504 = vmatprep.subr.bf16.mxu0 %v5900_v49  ;;  %v5904_v31 = vld [vmem:[#allocation9 + $0x18] sm:$0xff]   ;;  %v5905_v54 = vld [vmem:[#allocation9 + $0x48] sm:$0xff]   ;;  %v5906_v57 = vld [vmem:[#allocation9 + $0x20] sm:$0xff]  }
 0x18b   : > { %v2416_v8 = vshrl.u32 %v2315_v12, 16  ;;  %v2419_v19 = vshll.u32 %v2315_v12, 16  ;;  %v2413_v21 = vrot.slane %v2411_v15, 5  ;;  %v2330_v10 = vsel %vm6963_vm10, %v7233_v6, %v7222_v26  ;;  %5505 = vmatpush3.bf16.msra.mxu0 %v5900_v49  ;;  %v5907_v59 = vld [vmem:[#allocation9 + $0x50] sm:$0xff]   ;;  %v5908_v50 = vld [vmem:[#allocation9 + $0x28] sm:$0xff]   ;;  %v5909_v5 = vld [vmem:[#allocation9 + $0x58] sm:$0xff]  }
 0x18c   : > { %v2395_v20 = vrot.slane %v2394_v38, 4  ;;  %v2344_v16 = vsel %vm6963_vm10, %v2339_v32, %v2343_v56  ;;  %v2408_v28 = vor.u32 %v2407_v2, %v2404_v17  ;;  %v2358_v1 = vsel %vm6963_vm10, %v2353_v53, %v2357_v37  ;;  %5506 = vmatprep.subr.bf16.mxu0 %v5901_v9  ;;  %v5911_v53 = vld [vmem:[#allocation9 + $0x60] sm:$0xff]   ;;  %v5913_v12 = vld [vmem:[#allocation9 + $0x68] sm:$0xff]   ;;  %v5917_v38 = vld [vmem:[#allocation9 + $0x70] sm:$0xff]  }
 0x18d   : > { %v2418_v18 = vrot.slane %v2416_v8, 4  ;;  %v2421_v22 = vrot.slane %v2419_v19, 5  ;;  %v5015_v25 = vcombine.low %v2330_v10, %v2344_v16  ;;  %v2386_v26 = vsel %vm6963_vm10, %v2381_v4, %v2385_v62  ;;  %v5919_v4 = vld [vmem:[#allocation9 + $0x78] sm:$0xff]   ;;  %v7298_v17 = vld [vmem:[#allocation9 + $0xc0] sm:$0xff]  }
 0x18e   : > { %v2400_v6 = vsel %vm6963_vm10, %v2395_v20, %v2399_v47  ;;  %v2409_v61 = vrot.slane %v2408_v28, 4  ;;  %vm2680_vm11 = vcmask 1043456   ;;  %vm2685_vm12 = vcmask 1040384  }
 0x18f   : > { %5477 = vmatmul.mubr.msk.bf16.vlgmr.msra.gmra.mrb[32].mxu1 %vm1165_vm5, %v5893_v11  ;;  %v1122_v58 = vld [vmem:[#allocation2 + $0x44] sm:$0x1]  ;;  %v5017_v35 = vcombine.low %v2386_v26, %v2400_v6  ;;  %5507 = vmatpush3.bf16.msra.mxu0 %v5901_v9  ;;  %v5910_v11 = vld [vmem:[#allocation9 + $0x30] sm:$0xff]   ;;  %vm7346_vm13 = vmand %vm2680_vm11, %vm815_vm6  ;;  %vm3207_vm15 = vcmask 1042432   ;;  %vm3208_vm0 = vcmask 1046532  }
 0x190   : > { %5495 = vmatpush3.bf16.msra.mxu1 %v7219_v3  ;;  %5480 = vmatprep.mubr.msk.bf16.mxu1 %vm1165_vm5, %v5896_v45  ;;  %v1123_v13 = vsel %vm6756_vm3, %v1059_v46, %v1122_v58  ;;  %v2422_v3 = vor.u32 %v2421_v22, %v2418_v18  ;;  %v2372_v46 = vsel %vm6963_vm10, %v2367_v43, %v2371_v33  ;;  %v5912_v33 = vld [vmem:[#allocation9 + $0x38] sm:$0xff]   ;;  %v7291_v43 = vld [vmem:[#allocation9 + $0x80] sm:$0xff]   ;;  %vm7353_vm14 = vmand %vm2685_vm12, %vm426_vm2 }
 0x191   : > { %1124 = vst [vmem:[#allocation2 + $0x44] sm:$0x1] %v1123_v13  ;;  %v5016_v40 = vcombine.low %v2358_v1, %v2372_v46  ;;  %v2414_v27 = vsel %vm6963_vm10, %v2409_v61, %v2413_v21  ;;  %5508 = vmatprep.subr.bf16.mxu0 %v5902_v52  ;;  %5528 = vmatprep.subr.bf16.mxu1 %v5903_v42  ;;  %vm7430_vm1 = vmor %vm3207_vm15, %vm3208_vm0 }
 0x192   : > { %v2423_v30 = vrot.slane %v2422_v3, 4 }
 0x193   : > { %5509 = vmatpush3.bf16.msra.mxu0 %v5902_v52 }
 0x194   : > { %5510 = vmatprep.subr.bf16.mxu0 %v5904_v31 }
 0x197   : > { %5481 = vmatmul.mubr.msk.bf16.gmra.mrb[36].mxu1 %vm1165_vm5, %v5897_v0  ;;  %5511 = vmatpush3.bf16.msra.mxu0 %v5904_v31 }
 0x198   : > { %5496 = vmatprep.mubr.msk.bf16.mxu1 %vm1165_vm5, %v5015_v25  ;;  %v2316_v24 = vld [vmem:[#allocation2 + $0x44] sm:$0x1]  ;;  %5512 = vmatprep.subr.bf16.mxu0 %v5906_v57 }
 0x199   : > { %v2425_v29 = vshll.u32 %v2316_v24, 16 }
 0x19b   : > { %v2427_v34 = vrot.slane %v2425_v29, 5  ;;  %5513 = vmatpush3.bf16.msra.mxu0 %v5906_v57 }
 0x19c   : > { %5514 = vmatprep.subr.bf16.mxu0 %v5908_v50 }
 0x19d   : > { %v2428_v56 = vsel %vm6963_vm10, %v2423_v30, %v2427_v34 }
 0x19e   : > { %v5018_v36 = vcombine.low %v2414_v27, %v2428_v56 }
 0x19f   : > { %5497 = vmatmul.mubr.msk.bf16.vlgmr.msra.gmra.mrb[40].mxu1 %vm1165_vm5, %v5016_v40  ;;  %5515 = vmatpush3.bf16.msra.mxu0 %v5908_v50 }
 0x1a0   : > { %5500 = vmatprep.mubr.msk.bf16.mxu1 %vm1165_vm5, %v5017_v35  ;;  %5529 = vmatpush3.bf16.msra.mxu1 %v5903_v42 }
 0x1a1   : > { %5530 = vmatprep.subr.bf16.mxu1 %v5905_v54  ;;  %5516 = vmatprep.subr.bf16.mxu0 %v5910_v11 }
 0x1a3   : > { %5517 = vmatpush3.bf16.msra.mxu0 %v5910_v11 }
 0x1a4   : > { %5531 = vmatpush3.bf16.msra.mxu1 %v5905_v54  ;;  %5518 = vmatprep.subr.bf16.mxu0 %v5912_v33 }
 0x1a5   : > { %5532 = vmatprep.subr.bf16.mxu1 %v5907_v59 }
 0x1a7   : > { %5501 = vmatmul.mubr.msk.bf16.gmra.mrb[44].mxu1 %vm1165_vm5, %v5018_v36  ;;  %5519 = vmatpush3.bf16.msra.mxu0 %v5912_v33 }
 0x1a8   : > { %5533 = vmatpush3.bf16.msra.mxu1 %v5907_v59  ;;  %5552 = vmatprep.subr.bf16.mxu0 %v7291_v43 }
 0x1a9   : > { %5534 = vmatprep.subr.bf16.mxu1 %v5909_v5 }
 0x1ac   : > { %5535 = vmatpush3.bf16.msra.mxu1 %v5909_v5 }
 0x1ad   : > { %5536 = vmatprep.subr.bf16.mxu1 %v5911_v53 }
 0x1b0   : > { %5537 = vmatpush3.bf16.msra.mxu1 %v5911_v53 }
 0x1b1   : > { %5538 = vmatprep.subr.bf16.mxu1 %v5913_v12 }
 0x1b4   : > { %5539 = vmatpush3.bf16.msra.mxu1 %v5913_v12 }
 0x1b5   : > { %5540 = vmatprep.subr.bf16.mxu1 %v5917_v38 }
 0x1b8   : > { %5541 = vmatpush3.bf16.msra.mxu1 %v5917_v38 }
 0x1b9   : > { %5542 = vmatprep.subr.bf16.mxu1 %v5919_v4 }
 0x1bc   : > { %5543 = vmatpush3.bf16.msra.mxu1 %v5919_v4 }
 0x1bd   : > { %5576 = vmatprep.subr.bf16.mxu1 %v7298_v17 }
 0x1ee   : > { %v7271_v39 = vpop.f32.mrb[0].mxu1 }
 0x1ef   : > { %v7273_v55 = vpop.f32.mrb[1].mxu1 }
 0x1f0   : > { %v7275_v51 = vpop.f32.mrb[2].mxu1 }
 0x1f1   : > { %v7277_v23 = vpop.f32.mrb[3].mxu1 }
 0x1f6   : > { %v7279_v41 = vpop.f32.mrb[4].mxu1 }
 0x1f7   : > { %v7281_v32 = vpop.f32.mrb[5].mxu1 }
 0x1f8   : > { %v7283_v44 = vpop.f32.mrb[6].mxu1 }
 0x1f9   : > { %v7285_v63 = vpop.f32.mrb[7].mxu1 }
 0x207   : > { %v1788_v60 = vpop.f32.mrb[8].mxu1 }
 0x208   : > { %v7287_v37 = vpop.f32.mrb[9].mxu1 }
 0x209   : > { %v1792_v48 = vpop.f32.mrb[10].mxu1 }
 0x20a   : > { %v7289_v7 = vpop.f32.mrb[11].mxu1 }
 0x213   : > { %v1798_v45 = vpop.f32.mrb[12].mxu1 }
 0x214   : > { %v7293_v62 = vpop.f32.mrb[13].mxu1 }
 0x215   : > { %v1802_v15 = vpop.f32.mrb[14].mxu1 }
 0x216   : > { %v7296_v47 = vpop.f32.mrb[15].mxu1 }
 0x21e   : > { %v1808_v2 = vpop.f32.mrb[16].mxu1 }
 0x21f   : > { %v7300_v8 = vpop.f32.mrb[17].mxu1 }
 0x220   : > { %v1812_v19 = vpop.f32.mrb[18].mxu1 }
 0x221   : > { %v7303_v20 = vpop.f32.mrb[19].mxu1 }
 0x22e   : > { %v1818_v21 = vpop.f32.mrb[20].mxu1 }
 0x22f   : > { %v5458_v58 = vpop.f32.mrb[0].mxu0  ;;  %v7305_v13 = vpop.f32.mrb[21].mxu1 }
 0x230   : > { %v5720_v18 = vadd.f32 %v5458_v58, %v7271_v39  ;;  %v1659_v22 = vpop.f32.mrb[1].mxu0  ;;  %v1822_v0 = vpop.f32.mrb[22].mxu1 }
 0x231   : > { %v5721_v10 = vadd.f32 %v1659_v22, %v7273_v55  ;;  %v5459_v16 = vpop.f32.mrb[2].mxu0  ;;  %v7309_v25 = vpop.f32.mrb[23].mxu1 }
 0x232   : > { %v5722_v28 = vadd.f32 %v5459_v16, %v7275_v51  ;;  %v1662_v3 = vpop.f32.mrb[3].mxu0  ;;  %v1829_v1 = vadd.f32 %v5720_v18, %v1798_v45 }
 0x233   : > { %v5723_v46 = vadd.f32 %v1662_v3, %v7277_v23  ;;  %v1827_v24 = vadd.f32 %v5721_v10, %v1788_v60 }
 0x234   : > { %v1830_v26 = vadd.f32 %v5722_v28, %v1802_v15 }
 0x235   : > { %v1828_v6 = vadd.f32 %v5723_v46, %v1792_v48 }
 0x240   : > { %v5462_v61 = vpop.f32.mrb[4].mxu0 }
 0x241   : > { %v5724_v29 = vadd.f32 %v5462_v61, %v7279_v41  ;;  %v1675_v40 = vpop.f32.mrb[5].mxu0 }
 0x242   : > { %v5725_v30 = vadd.f32 %v1675_v40, %v7281_v32  ;;  %v5463_v34 = vpop.f32.mrb[6].mxu0 }
 0x243   : > { %v5726_v35 = vadd.f32 %v5463_v34, %v7283_v44  ;;  %v1678_v27 = vpop.f32.mrb[7].mxu0  ;;  %v1833_v56 = vadd.f32 %v5724_v29, %v1818_v21 }
 0x244   : > { %v5727_v49 = vadd.f32 %v1678_v27, %v7285_v63  ;;  %v1831_v39 = vadd.f32 %v5725_v30, %v1808_v2 }
 0x245   : > { %v1834_v9 = vadd.f32 %v5726_v35, %v1822_v0 }
 0x246   : > { %v5468_v36 = vpop.f32.mrb[24].mxu1  ;;  %v1832_v42 = vadd.f32 %v5727_v49, %v1812_v19 }
 0x247   : > { %v2059_v55 = vadd.f32 %v5468_v36, %v1829_v1  ;;  %v2026_v51 = vpop.f32.mrb[25].mxu1  ;;  %v7321_v36 = vld [vmem:[#allocation13] ss:$0 sm:$0xff] }
 0x248   : > { %v2057_v23 = vadd.f32 %v2026_v51, %v1827_v24  ;;  %v5469_v52 = vpop.f32.mrb[26].mxu1  ;;  %v7323_v51 = vld [vmem:[#allocation15] ss:$0 sm:$0xff] }
 0x249   : > { %v2060_v31 = vadd.f32 %v5469_v52, %v1830_v26  ;;  %v2029_v41 = vpop.f32.mrb[27].mxu1  ;;  %v5488_v57 = vpop.f32.mrb[8].mxu0 }
 0x24a   : > { %v2058_v54 = vadd.f32 %v2029_v41, %v1828_v6  ;;  %v2262_v32 = vpop.f32.mrb[9].mxu0 }
 0x24b   : > { %v5489_v59 = vpop.f32.mrb[10].mxu0 }
 0x24c   : > { %v2265_v60 = vpop.f32.mrb[11].mxu0 }
 0x252   : > { %v5492_v44 = vpop.f32.mrb[12].mxu0 }
 0x253   : > { %v2278_v50 = vpop.f32.mrb[13].mxu0 }
 0x254   : > { %v5493_v48 = vpop.f32.mrb[14].mxu0 }
 0x255   : > { %v2281_v5 = vpop.f32.mrb[15].mxu0 }
 0x25a   : > { %v5472_v11 = vpop.f32.mrb[28].mxu1 }
 0x25b   : > { %v2063_v63 = vadd.f32 %v5472_v11, %v1833_v56  ;;  %v2042_v53 = vpop.f32.mrb[29].mxu1  ;;  %v2901_v56 = vld [vmem:[#allocation3] sm:$0xf] }
 0x25c   : > { %v2061_v33 = vadd.f32 %v2042_v53, %v1831_v39  ;;  %v5473_v12 = vpop.f32.mrb[30].mxu1  ;;  %v2918_v52 = vshrl.u32 %v2901_v56, 16 }
 0x25d   : > { %v2064_v45 = vadd.f32 %v5473_v12, %v1834_v9  ;;  %v2045_v38 = vpop.f32.mrb[31].mxu1 }
 0x25e   : > { %v2062_v15 = vadd.f32 %v2045_v38, %v1832_v42  ;;  %v2921_v42 = vshll.u32 %v2901_v56, 16 }
 0x262   : > { %v5478_v4 = vpop.f32.mrb[32].mxu1 }
 0x263   : > { %v2177_v2 = vadd.f32 %v5478_v4, %v2059_v55  ;;  %v2144_v19 = vpop.f32.mrb[33].mxu1 }
 0x264   : > { %v2175_v21 = vadd.f32 %v2144_v19, %v2057_v23  ;;  %v5479_v58 = vpop.f32.mrb[34].mxu1 }
 0x265   : > { %v2178_v18 = vadd.f32 %v5479_v58, %v2060_v31  ;;  %v2295_v22 = vadd.f32 %v5488_v57, %v2177_v2  ;;  %v2147_v0 = vpop.f32.mrb[35].mxu1 }
 0x266   : > { %v2176_v10 = vadd.f32 %v2147_v0, %v2058_v54  ;;  %v2293_v16 = vadd.f32 %v2262_v32, %v2175_v21 }
 0x267   : > { %v2296_v28 = vadd.f32 %v5489_v59, %v2178_v18 }
 0x268   : > { %v2294_v3 = vadd.f32 %v2265_v60, %v2176_v10 }
 0x26a   : > { %v5482_v1 = vpop.f32.mrb[36].mxu1 }
 0x26b   : > { %v2181_v46 = vadd.f32 %v5482_v1, %v2063_v63  ;;  %v2160_v24 = vpop.f32.mrb[37].mxu1 }
 0x26c   : > { %v2179_v26 = vadd.f32 %v2160_v24, %v2061_v33  ;;  %v5483_v6 = vpop.f32.mrb[38].mxu1  ;;  %v2699_v24 = vld [vmem:[#allocation3 + $0x1c] sm:$0x1] }
 0x26d   : > { %v2182_v61 = vadd.f32 %v5483_v6, %v2064_v45  ;;  %v2299_v29 = vadd.f32 %v5492_v44, %v2181_v46  ;;  %v2163_v40 = vpop.f32.mrb[39].mxu1  ;;  %v7337_v45 = vld [vmem:[#allocation3 + $0x4] sm:$0x1]  ;;  %v2696_v46 = vld [vmem:[#allocation3 + $0x18] sm:$0xf] }
 0x26e   : > { %v2180_v30 = vadd.f32 %v2163_v40, %v2062_v15  ;;  %v2297_v34 = vadd.f32 %v2278_v50, %v2179_v26  ;;  %v2927_v19 = vshll.u32 %v7337_v45, 16 }
 0x26f   : > { %v7317_v35 = vadd.f32 %v5493_v48, %v2182_v61  ;;  %v7331_v48 = vrot.slane %v2918_v52, 4 }
 0x270   : > { %v7319_v27 = vadd.f32 %v2281_v5, %v2180_v30  ;;  %v7333_v5 = vrot.slane %v2921_v42, 5 }
 0x272   : > { %v5498_v49 = vpop.f32.mrb[40].mxu1  ;;  %v2924_v0 = vor.u32 %v7333_v5, %v7331_v48 }
 0x273   : > { %v2525_v39 = vadd.f32 %v5498_v49, %v2295_v22  ;;  %v2492_v55 = vpop.f32.mrb[41].mxu1 }
 0x274   : > { %v2523_v9 = vadd.f32 %v2492_v55, %v2293_v16  ;;  %v5499_v23 = vpop.f32.mrb[42].mxu1 }
 0x275   : > { %v2539_v31 = vmul.f32 %v7321_v36, %v2525_v39  ;;  %v2526_v41 = vadd.f32 %v5499_v23, %v2296_v28  ;;  %v2495_v54 = vpop.f32.mrb[43].mxu1  ;;  %v2687_v23 = vld [vmem:[#allocation3 + $0xc] sm:$0x1] }
 0x276   : > { %v2537_v57 = vmul.f32 %v7321_v36, %v2523_v9  ;;  %v2524_v32 = vadd.f32 %v2495_v54, %v2294_v3 }
 0x277   : > { %v2553_v59 = vadd.f32 %v7323_v51, %v2539_v31  ;;  %v2540_v60 = vmul.f32 %v7321_v36, %v2526_v41 }
 0x278   : > { %v2551_v44 = vadd.f32 %v7323_v51, %v2537_v57  ;;  %v2538_v50 = vmul.f32 %v7321_v36, %v2524_v32  ;;  %v2702_v32 = vld [vmem:[#allocation3 + $0x20] sm:$0xf] }
 0x279   : > { %v2561_v11 = vmax.f32 %v2553_v59, 0.0  ;;  %v2554_v63 = vadd.f32 %v7323_v51, %v2540_v60 }
 0x27a   : > { %v2559_v53 = vmax.f32 %v2551_v44, 0.0  ;;  %v2552_v33 = vadd.f32 %v7323_v51, %v2538_v50  ;;  %v5502_v12 = vpop.f32.mrb[44].mxu1  ;;  %v2705_v50 = vld [vmem:[#allocation3 + $0x24] sm:$0x1] }
 0x27b   : > { %v5190_v38 = vpack.c.bf16 %v2561_v11, %v2561_v11  ;;  %v2562_v15 = vmax.f32 %v2554_v63, 0.0  ;;  %v2529_v4 = vadd.f32 %v5502_v12, %v2299_v29  ;;  %v2508_v2 = vpop.f32.mrb[45].mxu1 }
 0x27c   : > { %v5188_v21 = vpack.c.bf16 %v2559_v53, %v2559_v53  ;;  %v2560_v58 = vmax.f32 %v2552_v33, 0.0  ;;  %v2527_v18 = vadd.f32 %v2508_v2, %v2297_v34  ;;  %v5503_v22 = vpop.f32.mrb[46].mxu1  ;;  %v2682_v34 = vld [vmem:[#allocation3 + $0x8] sm:$0xf] }
 0x27d   : > { %v2616_v10 = vshrl.u32 %v5190_v38, 16  ;;  %v2619_v16 = vshll.u32 %v5190_v38, 16  ;;  %v5191_v28 = vpack.c.bf16 %v2562_v15, %v2562_v15  ;;  %v2543_v3 = vmul.f32 %v7321_v36, %v2529_v4  ;;  %v2511_v1 = vpop.f32.mrb[47].mxu1  ;;  %v2690_v15 = vld [vmem:[#allocation3 + $0x10] sm:$0xf] }
 0x27e   : > { %v2600_v26 = vshrl.u32 %v5188_v21, 16  ;;  %v2603_v6 = vshll.u32 %v5188_v21, 16  ;;  %v5189_v61 = vpack.c.bf16 %v2560_v58, %v2560_v58  ;;  %v2541_v29 = vmul.f32 %v7321_v36, %v2527_v18  ;;  %v2693_v4 = vld [vmem:[#allocation3 + $0x14] sm:$0x1] }
 0x27f   : > { %v2618_v40 = vrot.slane %v2616_v10, 7  ;;  %v2624_v56 = vshrl.u32 %v5191_v28, 16  ;;  %v2627_v49 = vshll.u32 %v5191_v28, 16  ;;  %v2557_v39 = vadd.f32 %v7323_v51, %v2543_v3 }
 0x280   : > { %v2602_v9 = vrot.slane %v2600_v26, 7  ;;  %v2608_v52 = vshrl.u32 %v5189_v61, 16  ;;  %v2611_v42 = vshll.u32 %v5189_v61, 16  ;;  %v2555_v31 = vadd.f32 %v7323_v51, %v2541_v29 }
 0x281   : > { %v2621_v41 = vor.u32 %v2619_v16, %v2618_v40  ;;  %v2622_v54 = vrot.slane %v2618_v40, 4  ;;  %v2626_v57 = vrot.slane %v2624_v56, 7  ;;  %v2565_v59 = vmax.f32 %v2557_v39, 0.0 }
 0x282   : > { %v2605_v60 = vor.u32 %v2603_v6, %v2602_v9  ;;  %v2606_v44 = vrot.slane %v2602_v9, 4  ;;  %v2610_v11 = vrot.slane %v2608_v52, 7  ;;  %v2563_v63 = vmax.f32 %v2555_v31, 0.0 }
 0x283   : > { %v2697_v53 = vsel %vm7346_vm13, %v2621_v41, %v2696_v46  ;;  %v2700_v33 = vsel %vm7353_vm14, %v2622_v54, %v2699_v24  ;;  %v2629_v12 = vor.u32 %v2627_v49, %v2626_v57  ;;  %v2630_v38 = vrot.slane %v2626_v57, 4  ;;  %v7370_v46 = vld [vmem:[#allocation3] sm:$0xe] }
 0x284   : > { %2698 = vst [vmem:[#allocation3 + $0x18] sm:$0xf] %v2697_v53  ;;  %2701 = vst [vmem:[#allocation3 + $0x1c] sm:$0x1] %v2700_v33  ;;  %v2683_v2 = vsel %vm7346_vm13, %v2605_v60, %v2682_v34  ;;  %v2688_v21 = vsel %vm7353_vm14, %v2606_v44, %v2687_v23  ;;  %v2613_v58 = vor.u32 %v2611_v42, %v2610_v11  ;;  %v2614_v18 = vrot.slane %v2610_v11, 4  ;;  %v5918_v53 = vld [vmem:[#allocation9 + $0x88] sm:$0xff]  }
 0x285   : > { %2684 = vst [vmem:[#allocation3 + $0x8] sm:$0xf] %v2683_v2  ;;  %2689 = vst [vmem:[#allocation3 + $0xc] sm:$0x1] %v2688_v21  ;;  %v2703_v10 = vsel %vm7346_vm13, %v2629_v12, %v2702_v32  ;;  %v2706_v16 = vsel %vm7353_vm14, %v2630_v38, %v2705_v50  ;;  %v5194_v28 = vpack.c.bf16 %v2565_v59, %v2565_v59  ;;  %v2720_v34 = vld [vmem:[#allocation3 + $0x38] sm:$0xf] }
 0x286   : > { %v5192_v3 = vpack.c.bf16 %v2563_v63, %v2563_v63  ;;  %2704 = vst [vmem:[#allocation3 + $0x20] sm:$0xf] %v2703_v10  ;;  %2707 = vst [vmem:[#allocation3 + $0x24] sm:$0x1] %v2706_v16  ;;  %v2691_v24 = vsel %vm7346_vm13, %v2613_v58, %v2690_v15  ;;  %v2694_v26 = vsel %vm7353_vm14, %v2614_v18, %v2693_v4  ;;  %v5057_v39 = vrot.slane %v7370_v46, 9 }
 0x287   : > { %v2530_v6 = vadd.f32 %v5503_v22, %v7317_v35  ;;  %v2528_v61 = vadd.f32 %v2511_v1, %v7319_v27  ;;  %2692 = vst [vmem:[#allocation3 + $0x10] sm:$0xf] %v2691_v24  ;;  %2695 = vst [vmem:[#allocation3 + $0x14] sm:$0x1] %v2694_v26  ;;  %v2648_v29 = vshrl.u32 %v5194_v28, 16  ;;  %v3212_v9 = vrot.slane %v7337_v45, 5 }
 0x288   : > { %v2632_v40 = vshrl.u32 %v5192_v3, 16  ;;  %v2651_v52 = vshll.u32 %v5194_v28, 16  ;;  %v2723_v42 = vld [vmem:[#allocation3 + $0x3c] sm:$0x1]  ;;  %v2635_v35 = vshll.u32 %v5192_v3, 16  ;;  %v7387_v54 = vrot.slane %v2924_v0, 4 }
 0x289   : > { %v2544_v56 = vmul.f32 %v7321_v36, %v2530_v6  ;;  %v2542_v49 = vmul.f32 %v7321_v36, %v2528_v61  ;;  %v2650_v23 = vrot.slane %v2648_v29, 7  ;;  %v2708_v22 = vld [vmem:[#allocation3 + $0x28] sm:$0xf]  ;;  %v2711_v27 = vld [vmem:[#allocation3 + $0x2c] sm:$0x1]  ;;  %v7391_v36 = vrot.slane %v2927_v19, 5 }
 0x28a   : > { %v2634_v31 = vrot.slane %v2632_v40, 7  ;;  %v2726_v26 = vld [vmem:[#allocation3 + $0x40] sm:$0xf]  ;;  %v2729_v6 = vld [vmem:[#allocation3 + $0x44] sm:$0x1] }
 0x28b   : > { %v2558_v1 = vadd.f32 %v7323_v51, %v2544_v56  ;;  %v2556_v41 = vadd.f32 %v7323_v51, %v2542_v49  ;;  %v2653_v57 = vor.u32 %v2651_v52, %v2650_v23  ;;  %v2654_v32 = vrot.slane %v2650_v23, 4  ;;  %v7393_v44 = vld [vmem:[#allocation3 + $0x18] sm:$0xf]  ;;  %v2714_v61 = vld [vmem:[#allocation3 + $0x30] sm:$0xf] }
 0x28c   : > { %v2637_v59 = vor.u32 %v2635_v35, %v2634_v31  ;;  %v2638_v60 = vrot.slane %v2634_v31, 4  ;;  %v5914_v63 = vld [vmem:[#allocation3] ss:$8 sps:$4 sm:$0xff]   ;;  %v7403_v33 = vld [vmem:[#allocation3 + $0xc] sm:$0x1]  ;;  %v2960_v10 = vshrl.u32 %v7393_v44, 16 }
 0x28d   : > { %v2566_v50 = vmax.f32 %v2558_v1, 0.0  ;;  %v2564_v11 = vmax.f32 %v2556_v41, 0.0  ;;  %v2721_v51 = vsel %vm7346_vm13, %v2653_v57, %v2720_v34  ;;  %v2724_v48 = vsel %vm7353_vm14, %v2654_v32, %v2723_v42  ;;  %v2903_v0 = vld [vmem:[#allocation3 + $0x8] sm:$0xf]  ;;  %5520 = vmatprep.mubr.bf16.mxu0 %v5914_v63  ;;  %v2717_v29 = vld [vmem:[#allocation3 + $0x34] sm:$0x1] }
 0x28e   : > { %v2709_v5 = vsel %vm7346_vm13, %v2637_v59, %v2708_v22  ;;  %v2712_v19 = vsel %vm7353_vm14, %v2638_v60, %v2711_v27  ;;  %2722 = vst [vmem:[#allocation3 + $0x38] sm:$0xf] %v2721_v51  ;;  %2725 = vst [vmem:[#allocation3 + $0x3c] sm:$0x1] %v2724_v48  ;;  %v5916_v15 = vld [vmem:[#allocation3 + $0x10] ss:$8 sps:$4 sm:$0xff]   ;;  %v2930_v63 = vsel %vm6963_vm10, %v7387_v54, %v7391_v36 }
 0x28f   : > { %2710 = vst [vmem:[#allocation3 + $0x28] sm:$0xf] %v2709_v5  ;;  %2713 = vst [vmem:[#allocation3 + $0x2c] sm:$0x1] %v2712_v19  ;;  %v5195_v12 = vpack.c.bf16 %v2566_v50, %v2566_v50  ;;  %v5193_v38 = vpack.c.bf16 %v2564_v11, %v2564_v11  ;;  %v2932_v4 = vshrl.u32 %v2903_v0, 16  ;;  %v2935_v2 = vshll.u32 %v2903_v0, 16  ;;  %5521 = vmatmul.mubr.bf16.vlgmr.msra.gmra.mrb[16].mxu0 %v5916_v15 }
 0x290   : > { %v2941_v21 = vshll.u32 %v7403_v33, 16  ;;  %v2905_v58 = vld [vmem:[#allocation3 + $0x10] sm:$0xf]  ;;  %v7406_v18 = vld [vmem:[#allocation3 + $0x14] sm:$0x1]  ;;  %5553 = vmatpush3.bf16.msra.mxu0 %v7291_v43  ;;  %v2962_v41 = vrot.slane %v2960_v10, 4 }
 0x291   : > { %v2656_v16 = vshrl.u32 %v5195_v12, 16  ;;  %v2659_v28 = vshll.u32 %v5195_v12, 16  ;;  %v2640_v3 = vshrl.u32 %v5193_v38, 16  ;;  %v2643_v24 = vshll.u32 %v5193_v38, 16  ;;  %5554 = vmatprep.subr.bf16.mxu0 %v5918_v53  ;;  %v5921_v42 = vld [vmem:[#allocation9 + $0x90] sm:$0xff]   ;;  %v5924_v0 = vld [vmem:[#allocation9 + $0x98] sm:$0xff]  }
 0x292   : > { %v2934_v40 = vrot.slane %v2932_v4, 4  ;;  %v2937_v34 = vrot.slane %v2935_v2, 5  ;;  %v2943_v56 = vrot.slane %v2941_v21, 5  ;;  %v2946_v49 = vshrl.u32 %v2905_v58, 16  ;;  %v7411_v27 = vld [vmem:[#allocation3 + $0x1c] sm:$0x1] }
 0x293   : > { %v2658_v23 = vrot.slane %v2656_v16, 7  ;;  %v2642_v52 = vrot.slane %v2640_v3, 7  ;;  %v2949_v31 = vshll.u32 %v2905_v58, 16  ;;  %v2955_v35 = vshll.u32 %v7406_v18, 16  ;;  %v3184_v32 = vld [vmem:[#allocation3 + $0x8] sm:$0xe] }
 0x294   : > { %v2938_v22 = vor.u32 %v2937_v34, %v2934_v40  ;;  %v2948_v1 = vrot.slane %v2946_v49, 4  ;;  %v2963_v57 = vshll.u32 %v7393_v44, 16  ;;  %5555 = vmatpush3.bf16.msra.mxu0 %v5918_v53  ;;  %v2909_v12 = vld [vmem:[#allocation3 + $0x20] sm:$0xf]  ;;  %v2969_v2 = vshll.u32 %v7411_v27, 16 }
 0x295   : > { %v2661_v43 = vor.u32 %v2659_v28, %v2658_v23  ;;  %v2662_v59 = vrot.slane %v2658_v23, 4  ;;  %v2645_v60 = vor.u32 %v2643_v24, %v2642_v52  ;;  %v2646_v50 = vrot.slane %v2642_v52, 4  ;;  %5556 = vmatprep.subr.bf16.mxu0 %v5921_v42  ;;  %v7436_v28 = vld [vmem:[#allocation3 + $0x24] sm:$0x1]  ;;  %v2915_v40 = vld [vmem:[#allocation3 + $0x38] sm:$0xf] }
 0x296   : > { %v5920_v11 = vld [vmem:[#allocation3 + $0x20] ss:$8 sps:$4 sm:$0xff]   ;;  %v2939_v51 = vrot.slane %v2938_v22, 4  ;;  %v2951_v48 = vrot.slane %v2949_v31, 5  ;;  %v2957_v38 = vrot.slane %v2955_v35, 5  ;;  %v2965_v15 = vrot.slane %v2963_v57, 5 }
 0x297   : > { %v2727_v5 = vsel %vm7346_vm13, %v2661_v43, %v2726_v26  ;;  %v2730_v44 = vsel %vm7353_vm14, %v2662_v59, %v2729_v6  ;;  %v2715_v19 = vsel %vm7346_vm13, %v2645_v60, %v2714_v61  ;;  %v2718_v53 = vsel %vm7353_vm14, %v2646_v50, %v2717_v29  ;;  %5524 = vmatprep.mubr.bf16.mxu0 %v5920_v11  ;;  %v2911_v55 = vld [vmem:[#allocation3 + $0x28] sm:$0xf]  ;;  %v7444_v29 = vld [vmem:[#allocation3 + $0x2c] sm:$0x1]  ;;  %v7451_v31 = vld [vmem:[#allocation3 + $0x3c] sm:$0x1] }
 0x298   : > { %2728 = vst [vmem:[#allocation3 + $0x40] sm:$0xf] %v2727_v5  ;;  %2731 = vst [vmem:[#allocation3 + $0x44] sm:$0x1] %v2730_v44  ;;  %v2944_v54 = vsel %vm6963_vm10, %v2939_v51, %v2943_v56  ;;  %v2952_v36 = vor.u32 %v2951_v48, %v2948_v1  ;;  %v5058_v21 = vrot.slane %v3184_v32, 9  ;;  %v3216_v58 = vrot.slane %v7403_v33, 5  ;;  %5557 = vmatpush3.bf16.msra.mxu0 %v5921_v42 }
 0x299   : > { %2716 = vst [vmem:[#allocation3 + $0x30] sm:$0xf] %v2715_v19  ;;  %2719 = vst [vmem:[#allocation3 + $0x34] sm:$0x1] %v2718_v53  ;;  %v5045_v4 = vcombine.low %v2930_v63, %v2944_v54  ;;  %v2966_v16 = vor.u32 %v2965_v15, %v2962_v41  ;;  %v2974_v3 = vshrl.u32 %v2909_v12, 16  ;;  %v2977_v24 = vshll.u32 %v2909_v12, 16  ;;  %5558 = vmatprep.subr.bf16.mxu0 %v5924_v0 }
 0x29a   : > { %v2953_v10 = vrot.slane %v2952_v36, 4  ;;  %v5926_v26 = vld [vmem:[#allocation9 + $0xa0] sm:$0xff]   ;;  %v2971_v6 = vrot.slane %v2969_v2, 5  ;;  %v3213_v61 = vsel %vm7430_vm1, %v5057_v39, %v3212_v9  ;;  %v2988_v33 = vshrl.u32 %v2911_v55, 16  ;;  %v5925_v57 = vld [vmem:[#allocation9 + $0xc8] sm:$0xff]   ;;  %v5927_v36 = vld [vmem:[#allocation9 + $0xd0] sm:$0xff]  }
 0x29b   : > { %5544 = vmatprep.mubr.bf16.mxu1 %v5045_v4  ;;  %v2967_v56 = vrot.slane %v2966_v16, 4  ;;  %v3217_v49 = vsel %vm7430_vm1, %v5058_v21, %v3216_v58  ;;  %v2976_v23 = vrot.slane %v2974_v3, 4  ;;  %v2979_v52 = vrot.slane %v2977_v24, 5  ;;  %v5929_v63 = vld [vmem:[#allocation9 + $0xa8] sm:$0xff]   ;;  %v5931_v2 = vld [vmem:[#allocation9 + $0xb0] sm:$0xff]  }
 0x29c   : > { %v2958_v34 = vsel %vm6963_vm10, %v2953_v10, %v2957_v38  ;;  %v2983_v45 = vshll.u32 %v7436_v28, 16  ;;  %v2990_v46 = vrot.slane %v2988_v33, 4  ;;  %v2991_v42 = vshll.u32 %v2911_v55, 16  ;;  %5559 = vmatpush3.bf16.msra.mxu0 %v5924_v0  ;;  %v5930_v10 = vld [vmem:[#allocation9 + $0xd8] sm:$0xff]   ;;  %v3185_v16 = vld [vmem:[#allocation3 + $0x10] sm:$0xe] }
 0x29d   : > { %v2972_v39 = vsel %vm6963_vm10, %v2967_v56, %v2971_v6  ;;  %v2997_v9 = vshll.u32 %v7444_v29, 16  ;;  %v3016_v35 = vshrl.u32 %v2915_v40, 16  ;;  %v3019_v22 = vshll.u32 %v2915_v40, 16  ;;  %5560 = vmatprep.subr.bf16.mxu0 %v5926_v26  ;;  %v3186_v3 = vld [vmem:[#allocation3 + $0x18] sm:$0xe] }
 0x29e   : > { %v5046_v41 = vcombine.low %v2958_v34, %v2972_v39  ;;  %v2980_v32 = vor.u32 %v2979_v52, %v2976_v23  ;;  %v2993_v43 = vrot.slane %v2991_v42, 5  ;;  %v5065_v59 = vcombine.low %v3213_v61, %v3217_v49  ;;  %v5933_v61 = vld [vmem:[#allocation9 + $0xb8] sm:$0xff]   ;;  %v3188_v40 = vld [vmem:[#allocation3 + $0x28] sm:$0xe] }
 0x29f   : > { %v3018_v11 = vrot.slane %v3016_v35, 4  ;;  %v2985_v19 = vrot.slane %v2983_v45, 5  ;;  %v2999_v53 = vrot.slane %v2997_v9, 5  ;;  %v3021_v0 = vrot.slane %v3019_v22, 5  ;;  %v3187_v33 = vld [vmem:[#allocation3 + $0x20] sm:$0xe] }
 0x2a0   : > { %v5922_v1 = vld [vmem:[#allocation3 + $0x30] ss:$8 sps:$4 sm:$0xff]   ;;  %v7456_v50 = vld [vmem:[#allocation3 + $0x34] sm:$0x1]  ;;  %5545 = vmatmul.mubr.bf16.vlgmr.msra.gmra.mrb[48].mxu1 %v5046_v41  ;;  %v2981_v51 = vrot.slane %v2980_v32, 4  ;;  %v2994_v48 = vor.u32 %v2993_v43, %v2990_v46  ;;  %v3025_v12 = vshll.u32 %v7451_v31, 16  ;;  %5561 = vmatpush3.bf16.msra.mxu0 %v5926_v26 }
 0x2a1   : > { %v2913_v60 = vld [vmem:[#allocation3 + $0x30] sm:$0xf]  ;;  %5525 = vmatmul.mubr.bf16.gmra.mrb[20].mxu0 %v5922_v1  ;;  %5577 = vmatpush3.bf16.msra.mxu1 %v7298_v17  ;;  %v3011_v55 = vshll.u32 %v7456_v50, 16  ;;  %v3022_v4 = vor.u32 %v3021_v0, %v3018_v11  ;;  %v3566_v49 = vld [vmem:[#allocation3 + $0x8] sm:$0xf]  ;;  %v5059_v23 = vrot.slane %v3185_v16, 9 }
 0x2a2   : > { %v3002_v5 = vshrl.u32 %v2913_v60, 16  ;;  %v3005_v44 = vshll.u32 %v2913_v60, 16  ;;  %5568 = vmatprep.mubr.bf16.mxu0 %v5065_v59  ;;  %5578 = vmatprep.subr.bf16.mxu1 %v5925_v57  ;;  %v2995_v54 = vrot.slane %v2994_v48, 4  ;;  %v2986_v21 = vsel %vm6963_vm10, %v2981_v51, %v2985_v19  ;;  %v3568_v45 = vld [vmem:[#allocation3 + $0x10] sm:$0xf]  ;;  %v5935_v11 = vld [vmem:[#allocation9 + $0x100] sm:$0xff]  }
 0x2a3   : > { %5562 = vmatprep.subr.bf16.mxu0 %v5929_v63  ;;  %v3023_v26 = vrot.slane %v3022_v4, 4  ;;  %v3027_v6 = vrot.slane %v3025_v12, 5  ;;  %v3013_v56 = vrot.slane %v3011_v55, 5  ;;  %v3220_v52 = vrot.slane %v7406_v18, 5  ;;  %v5932_v18 = vld [vmem:[#allocation9 + $0xe0] sm:$0xff]   ;;  %v5934_v12 = vld [vmem:[#allocation9 + $0xe8] sm:$0xff]  }
 0x2a4   : > { %v3004_v38 = vrot.slane %v3002_v5, 4  ;;  %v3007_v15 = vrot.slane %v3005_v44, 5  ;;  %v3000_v17 = vsel %vm6963_vm10, %v2995_v54, %v2999_v53  ;;  %5563 = vmatpush3.bf16.msra.mxu0 %v5929_v63  ;;  %v5060_v39 = vrot.slane %v3186_v3, 9  ;;  %v3189_v53 = vld [vmem:[#allocation3 + $0x30] sm:$0xe] }
 0x2a5   : > { %5579 = vmatpush3.bf16.msra.mxu1 %v5925_v57  ;;  %v5047_v24 = vcombine.low %v2986_v21, %v3000_v17  ;;  %5564 = vmatprep.subr.bf16.mxu0 %v5931_v2  ;;  %v3028_v42 = vsel %vm6963_vm10, %v3023_v26, %v3027_v6  ;;  %v3224_v9 = vrot.slane %v7411_v27, 5  ;;  %v5062_v22 = vrot.slane %v3188_v40, 9  ;;  %v5928_v57 = vld [vmem:[#allocation3 + $0x8] ss:$8 sps:$4 sm:$0xff]   ;;  %v7481_v54 = vld [vmem:[#allocation3 + $0xc] sm:$0x1] }
 0x2a6   : > { %v3008_v58 = vor.u32 %v3007_v15, %v3004_v38  ;;  %5580 = vmatprep.subr.bf16.mxu1 %v5927_v36  ;;  %v3232_v1 = vrot.slane %v7444_v29, 5  ;;  %v3583_v41 = vshrl.u32 %v3566_v49, 16  ;;  %v5061_v32 = vrot.slane %v3187_v33, 9  ;;  %v7475_v29 = vld [vmem:[#allocation3 + $0x14] sm:$0x1]  ;;  %v5937_v21 = vld [vmem:[#allocation9 + $0x108] sm:$0xff]  }
 0x2a7   : > { %5548 = vmatprep.mubr.bf16.mxu1 %v5047_v24  ;;  %v3586_v43 = vshll.u32 %v3566_v49, 16  ;;  %v3597_v59 = vshrl.u32 %v3568_v45, 16  ;;  %v3221_v60 = vsel %vm7430_vm1, %v5059_v23, %v3220_v52  ;;  %v3228_v27 = vrot.slane %v7436_v28, 5  ;;  %v3190_v38 = vld [vmem:[#allocation3 + $0x38] sm:$0xe] }
 0x2a8   : > { %v3009_v34 = vrot.slane %v3008_v58, 4  ;;  %5565 = vmatpush3.bf16.msra.mxu0 %v5931_v2  ;;  %v3585_v63 = vrot.slane %v3583_v41, 4  ;;  %v3600_v51 = vshll.u32 %v3568_v45, 16  ;;  %v3225_v44 = vsel %vm7430_vm1, %v5060_v39, %v3224_v9  ;;  %v5936_v3 = vld [vmem:[#allocation9 + $0xf0] sm:$0xff]   ;;  %v5943_v45 = vld [vmem:[#allocation9 + $0x118] sm:$0xff]   ;;  %v5945_v39 = vld [vmem:[#allocation9 + $0x120] sm:$0xff]  }
 0x2a9   : > { %5581 = vmatpush3.bf16.msra.mxu1 %v5927_v36  ;;  %5566 = vmatprep.subr.bf16.mxu0 %v5933_v61  ;;  %v3588_v48 = vrot.slane %v3586_v43, 5  ;;  %v3599_v5 = vrot.slane %v3597_v59, 4  ;;  %v3233_v19 = vsel %vm7430_vm1, %v5062_v22, %v3232_v1  ;;  %v5066_v28 = vcombine.low %v3221_v60, %v3225_v44  ;;  %v5939_v40 = vld [vmem:[#allocation9 + $0x110] sm:$0xff]   ;;  %v5944_v22 = vld [vmem:[#allocation9 + $0x148] sm:$0xff]  }
 0x2aa   : > { %v3014_v46 = vsel %vm6963_vm10, %v3009_v34, %v3013_v56  ;;  %5582 = vmatprep.subr.bf16.mxu1 %v5930_v10  ;;  %v3602_v0 = vrot.slane %v3600_v51, 5  ;;  %v3229_v36 = vsel %vm7430_vm1, %v5061_v32, %v3228_v27  ;;  %v3606_v4 = vshll.u32 %v7475_v29, 16  ;;  %v5938_v56 = vld [vmem:[#allocation9 + $0xf8] sm:$0xff]   ;;  %v3576_v9 = vld [vmem:[#allocation3 + $0x30] sm:$0xf] }
 0x2ab   : > { %v5048_v35 = vcombine.low %v3014_v46, %v3028_v42  ;;  %v3589_v15 = vor.u32 %v3588_v48, %v3585_v63  ;;  %v5067_v2 = vcombine.low %v3229_v36, %v3233_v19  ;;  %v5063_v17 = vrot.slane %v3189_v53, 9  ;;  %v5941_v46 = vld [vmem:[#allocation9 + $0x140] sm:$0xff]   ;;  %v3849_v1 = vld [vmem:[#allocation3 + $0x10] sm:$0xe]  ;;  %v3570_v41 = vld [vmem:[#allocation3 + $0x18] sm:$0xf] }
 0x2ac   : > { %5567 = vmatpush3.bf16.msra.mxu0 %v5933_v61  ;;  %v3603_v55 = vor.u32 %v3602_v0, %v3599_v5  ;;  %v3236_v58 = vrot.slane %v7456_v50, 5  ;;  %v5064_v24 = vrot.slane %v3190_v38, 9  ;;  %v3240_v26 = vrot.slane %v7451_v31, 5  ;;  %v3572_v42 = vld [vmem:[#allocation3 + $0x20] sm:$0xf]  ;;  %v5948_v5 = vld [vmem:[#allocation9 + $0x128] sm:$0xff]  }
 0x2ad   : > { %5549 = vmatmul.mubr.bf16.gmra.mrb[52].mxu1 %v5048_v35  ;;  %5600 = vmatprep.subr.bf16.mxu0 %v5935_v11  ;;  %v3590_v6 = vrot.slane %v3589_v15, 4  ;;  %v3608_v61 = vrot.slane %v3606_v4, 5  ;;  %v5940_v35 = vld [vmem:[#allocation3 + $0x18] ss:$8 sps:$4 sm:$0xff]   ;;  %v3625_v32 = vshrl.u32 %v3572_v42, 16  ;;  %v3628_v43 = vshll.u32 %v3572_v42, 16 }
 0x2ae   : > { %5592 = vmatprep.mubr.bf16.mxu1 %v5928_v57  ;;  %5583 = vmatpush3.bf16.msra.mxu1 %v5930_v10  ;;  %v3592_v10 = vshll.u32 %v7481_v54, 16  ;;  %v3604_v16 = vrot.slane %v3603_v55, 4  ;;  %v3237_v33 = vsel %vm7430_vm1, %v5063_v17, %v3236_v58  ;;  %v3241_v49 = vsel %vm7430_vm1, %v5064_v24, %v3240_v26  ;;  %v5942_v57 = vld [vmem:[#allocation3 + $0x28] ss:$8 sps:$4 sm:$0xff]   ;;  %v3580_v55 = vld [vmem:[#allocation3 + $0x40] sm:$0xf] }
 0x2af   : > { %5584 = vmatprep.subr.bf16.mxu1 %v5932_v18  ;;  %5569 = vmatmul.mubr.bf16.vlgmr.msra.gmra.mrb[24].mxu0 %v5066_v28  ;;  %v5068_v31 = vcombine.low %v3237_v33, %v3241_v49  ;;  %v3574_v59 = vld [vmem:[#allocation3 + $0x28] sm:$0xf]  ;;  %v3653_v60 = vshrl.u32 %v3576_v9, 16  ;;  %v5102_v27 = vrot.slane %v3849_v1, 9  ;;  %v3878_v63 = vrot.slane %v7475_v29, 5  ;;  %v5947_v36 = vld [vmem:[#allocation9 + $0x150] sm:$0xff]  }
 0x2b0   : > { %5572 = vmatprep.mubr.bf16.mxu0 %v5067_v2  ;;  %5601 = vmatpush3.bf16.msra.mxu0 %v5935_v11  ;;  %v3594_v50 = vrot.slane %v3592_v10, 5  ;;  %v3609_v34 = vsel %vm6963_vm10, %v3604_v16, %v3608_v61  ;;  %v3656_v11 = vshll.u32 %v3576_v9, 16  ;;  %v3611_v51 = vshrl.u32 %v3570_v41, 16  ;;  %v5950_v4 = vld [vmem:[#allocation9 + $0x130] sm:$0xff]   ;;  %v7501_v17 = vld [vmem:[#allocation3 + $0x24] sm:$0x1] }
 0x2b1   : > { %5602 = vmatprep.subr.bf16.mxu0 %v5937_v21  ;;  %v3614_v48 = vshll.u32 %v3570_v41, 16  ;;  %v3639_v44 = vshrl.u32 %v3574_v59, 16  ;;  %v3642_v19 = vshll.u32 %v3574_v59, 16  ;;  %v3874_v0 = vrot.slane %v7481_v54, 5  ;;  %v3578_v54 = vld [vmem:[#allocation3 + $0x38] sm:$0xf] }
 0x2b2   : > { %5585 = vmatpush3.bf16.msra.mxu1 %v5932_v18  ;;  %v3595_v23 = vsel %vm6963_vm10, %v3590_v6, %v3594_v50  ;;  %v3848_v18 = vld [vmem:[#allocation3 + $0x8] sm:$0xe]  ;;  %v3630_v28 = vrot.slane %v3628_v43, 5  ;;  %v3655_v38 = vrot.slane %v3653_v60, 4  ;;  %v3658_v15 = vrot.slane %v3656_v11, 5 }
 0x2b3   : > { %5586 = vmatprep.subr.bf16.mxu1 %v5934_v12  ;;  %v5089_v52 = vcombine.low %v3595_v23, %v3609_v34  ;;  %v5101_v53 = vrot.slane %v3848_v18, 9  ;;  %v3879_v29 = vsel %vm7430_vm1, %v5102_v27, %v3878_v63  ;;  %v3613_v2 = vrot.slane %v3611_v51, 4  ;;  %v7505_v24 = vld [vmem:[#allocation3 + $0x34] sm:$0x1]  ;;  %v5946_v61 = vld [vmem:[#allocation3 + $0x38] ss:$8 sps:$4 sm:$0xff]  }
 0x2b4   : > { %5603 = vmatpush3.bf16.msra.mxu0 %v5937_v21  ;;  %v3616_v21 = vrot.slane %v3614_v48, 5  ;;  %v3641_v58 = vrot.slane %v3639_v44, 4  ;;  %v3644_v10 = vrot.slane %v3642_v19, 5  ;;  %v3681_v26 = vshrl.u32 %v3580_v55, 16  ;;  %v7507_v50 = vld [vmem:[#allocation3 + $0x1c] sm:$0x1] }
 0x2b5   : > { %5604 = vmatprep.subr.bf16.mxu0 %v5939_v40  ;;  %v3875_v16 = vsel %vm7430_vm1, %v5101_v53, %v3874_v0  ;;  %v3684_v6 = vshll.u32 %v3580_v55, 16  ;;  %v3659_v34 = vor.u32 %v3658_v15, %v3655_v38  ;;  %v3634_v49 = vshll.u32 %v7501_v17, 16  ;;  %v5951_v1 = vld [vmem:[#allocation9 + $0x160] sm:$0xff]   ;;  %v5953_v44 = vld [vmem:[#allocation9 + $0x168] sm:$0xff]   ;;  %v7521_v0 = vld [vmem:[#allocation3 + $0x3c] sm:$0x1] }
 0x2b6   : > { %5587 = vmatpush3.bf16.msra.mxu1 %v5934_v12  ;;  %v3627_v12 = vrot.slane %v3625_v32, 4  ;;  %v5109_v33 = vcombine.low %v3875_v16, %v3879_v29  ;;  %v3667_v23 = vshrl.u32 %v3578_v54, 16  ;;  %v3662_v42 = vshll.u32 %v7505_v24, 16  ;;  %v5954_v60 = vld [vmem:[#allocation9 + $0x180] sm:$0xff]   ;;  %v5956_v55 = vld [vmem:[#allocation9 + $0x188] sm:$0xff]   ;;  %v5958_v16 = vld [vmem:[#allocation9 + $0x190] sm:$0xff]  }
 0x2b7   : > { %5588 = vmatprep.subr.bf16.mxu1 %v5936_v3  ;;  %5573 = vmatmul.mubr.bf16.gmra.mrb[28].mxu0 %v5068_v31  ;;  %v7510_v31 = vld [vmem:[#allocation3 + $0x2c] sm:$0x1]  ;;  %v3636_v32 = vrot.slane %v3634_v49, 5  ;;  %v7515_v63 = vld [vmem:[#allocation3 + $0x44] sm:$0x1] }
 0x2b8   : > { %5616 = vmatprep.mubr.bf16.mxu0 %v5089_v52  ;;  %5605 = vmatpush3.bf16.msra.mxu0 %v5939_v40  ;;  %v5949_v40 = vld [vmem:[#allocation9 + $0x158] sm:$0xff]   ;;  %v3670_v52 = vshll.u32 %v3578_v54, 16  ;;  %v3648_v41 = vshll.u32 %v7510_v31, 16  ;;  %v3669_v43 = vrot.slane %v3667_v23, 4  ;;  %v3664_v27 = vrot.slane %v3662_v42, 5 }
 0x2b9   : > { %5606 = vmatprep.subr.bf16.mxu0 %v5943_v45  ;;  %v3850_v49 = vld [vmem:[#allocation3 + $0x18] sm:$0xe]  ;;  %v3886_v42 = vrot.slane %v7501_v17, 5  ;;  %v3890_v17 = vrot.slane %v7510_v31, 5 }
 0x2ba   : > { %5589 = vmatpush3.bf16.msra.mxu1 %v5936_v3  ;;  %v3631_v3 = vor.u32 %v3630_v28, %v3627_v12  ;;  %v3672_v59 = vrot.slane %v3670_v52, 5  ;;  %v3650_v19 = vrot.slane %v3648_v41, 5 }
 0x2bb   : > { %5590 = vmatprep.subr.bf16.mxu1 %v5938_v56 }
 0x2bc   : > { %5607 = vmatpush3.bf16.msra.mxu0 %v5943_v45  ;;  %v5952_v45 = vld [vmem:[#allocation9 + $0x138] sm:$0xff]   ;;  %v3632_v9 = vrot.slane %v3631_v3, 4  ;;  %v3673_v28 = vor.u32 %v3672_v59, %v3669_v43  ;;  %v5960_v59 = vld [vmem:[#allocation9 + $0x1c0] sm:$0xff]  }
 0x2bd   : > { %5608 = vmatprep.subr.bf16.mxu0 %v5945_v39  ;;  %v4231_v3 = vld [vmem:[#allocation3 + $0x18] sm:$0xf] }
 0x2be   : > { %5591 = vmatpush3.bf16.msra.mxu1 %v5938_v56  ;;  %v3617_v56 = vor.u32 %v3616_v21, %v3613_v2  ;;  %v3637_v48 = vsel %vm6963_vm10, %v3632_v9, %v3636_v32  ;;  %v4229_v21 = vld [vmem:[#allocation3 + $0x10] sm:$0xf]  ;;  %v4260_v23 = vshrl.u32 %v4231_v3, 16  ;;  %v4263_v52 = vshll.u32 %v4231_v3, 16 }
 0x2bf   : > { %5624 = vmatprep.subr.bf16.mxu1 %v5941_v46  ;;  %v3882_v32 = vrot.slane %v7507_v50, 5  ;;  %v5959_v43 = vld [vmem:[#allocation3 + $0x10] ss:$8 sps:$4 sm:$0xff]  }
 0x2c0   : > { %5609 = vmatpush3.bf16.msra.mxu0 %v5945_v39  ;;  %v3620_v39 = vshll.u32 %v7507_v50, 16  ;;  %v3618_v18 = vrot.slane %v3617_v56, 4  ;;  %v5957_v56 = vld [vmem:[#allocation9 + $0x178] sm:$0xff]   ;;  %v5963_v50 = vld [vmem:[#allocation9 + $0x1a0] sm:$0xff]  }
 0x2c1   : > { %5593 = vmatmul.mubr.bf16.vlgmr.msra.gmra.mrb[56].mxu1 %v5940_v35  ;;  %5610 = vmatprep.subr.bf16.mxu0 %v5948_v5  ;;  %v3683_v35 = vrot.slane %v3681_v26, 4  ;;  %v3851_v26 = vld [vmem:[#allocation3 + $0x20] sm:$0xe] }
 0x2c2   : > { %5596 = vmatprep.mubr.bf16.mxu1 %v5942_v57  ;;  %5625 = vmatpush3.bf16.msra.mxu1 %v5941_v46  ;;  %v3645_v46 = vor.u32 %v3644_v10, %v3641_v58  ;;  %v3660_v57 = vrot.slane %v3659_v34, 4  ;;  %v3622_v51 = vrot.slane %v3620_v39, 5  ;;  %v5955_v58 = vld [vmem:[#allocation9 + $0x170] sm:$0xff]   ;;  %v3674_v10 = vrot.slane %v3673_v28, 4  ;;  %v3852_v39 = vld [vmem:[#allocation3 + $0x28] sm:$0xe] }
 0x2c3   : > { %5626 = vmatprep.subr.bf16.mxu1 %v5944_v22  ;;  %v5962_v28 = vld [vmem:[#allocation9 + $0x1c8] sm:$0xff]  }
 0x2c4   : > { %5611 = vmatpush3.bf16.msra.mxu0 %v5948_v5  ;;  %v3646_v11 = vrot.slane %v3645_v46, 4  ;;  %v3665_v53 = vsel %vm6963_vm10, %v3660_v57, %v3664_v27  ;;  %v3623_v12 = vsel %vm6963_vm10, %v3618_v18, %v3622_v51  ;;  %v5104_v46 = vrot.slane %v3851_v26, 9 }
 0x2c5   : > { %5612 = vmatprep.subr.bf16.mxu0 %v5950_v4  ;;  %v5090_v38 = vcombine.low %v3623_v12, %v3637_v48  ;;  %v5103_v18 = vrot.slane %v3850_v49, 9  ;;  %v4265_v27 = vrot.slane %v4263_v52, 5  ;;  %v4235_v52 = vld [vmem:[#allocation3 + $0x28] sm:$0xf] }
 0x2c6   : > { %5627 = vmatpush3.bf16.msra.mxu1 %v5944_v22  ;;  %v3686_v22 = vrot.slane %v3684_v6, 5  ;;  %v3651_v15 = vsel %vm6963_vm10, %v3646_v11, %v3650_v19  ;;  %v3853_v6 = vld [vmem:[#allocation3 + $0x30] sm:$0xe]  ;;  %v4262_v11 = vrot.slane %v4260_v23, 4  ;;  %v3887_v51 = vsel %vm7430_vm1, %v5104_v46, %v3886_v42  ;;  %v7545_v19 = vld [vmem:[#allocation3 + $0x1c] sm:$0x1] }
 0x2c7   : > { %5628 = vmatprep.subr.bf16.mxu1 %v5947_v36  ;;  %v5091_v29 = vcombine.low %v3651_v15, %v3665_v53  ;;  %v5106_v9 = vrot.slane %v3853_v6, 9  ;;  %v3883_v31 = vsel %vm7430_vm1, %v5103_v18, %v3882_v32  ;;  %v5969_v23 = vld [vmem:[#allocation9 + $0x1b8] sm:$0xff]   ;;  %v5968_v46 = vld [vmem:[#allocation9 + $0x1e0] sm:$0xff]  }
 0x2c8   : > { %5613 = vmatpush3.bf16.msra.mxu0 %v5950_v4  ;;  %v3687_v5 = vor.u32 %v3686_v22, %v3683_v35  ;;  %v3676_v4 = vshll.u32 %v7521_v0, 16  ;;  %v3894_v22 = vrot.slane %v7505_v24, 5  ;;  %v7539_v24 = vld [vmem:[#allocation3 + $0x14] sm:$0x1]  ;;  %v5110_v53 = vcombine.low %v3883_v31, %v3887_v51  ;;  %v4233_v42 = vld [vmem:[#allocation3 + $0x20] sm:$0xf] }
 0x2c9   : > { %5597 = vmatmul.mubr.bf16.gmra.mrb[60].mxu1 %v5946_v61  ;;  %5614 = vmatprep.subr.bf16.mxu0 %v5952_v45  ;;  %v4246_v61 = vshrl.u32 %v4229_v21, 16  ;;  %v4266_v15 = vor.u32 %v4265_v27, %v4262_v11  ;;  %v4274_v18 = vshrl.u32 %v4233_v42, 16  ;;  %v4277_v32 = vshll.u32 %v4233_v42, 16  ;;  %v5975_v11 = vld [vmem:[#allocation9 + $0x208] sm:$0xff]  }
 0x2ca   : > { %5629 = vmatpush3.bf16.msra.mxu1 %v5947_v36  ;;  %5640 = vmatprep.mubr.bf16.mxu1 %v5109_v33  ;;  %v3690_v36 = vshll.u32 %v7515_v63, 16  ;;  %v3688_v2 = vrot.slane %v3687_v5, 4  ;;  %v4249_v33 = vshll.u32 %v4229_v21, 16  ;;  %v3895_v48 = vsel %vm7430_vm1, %v5106_v9, %v3894_v22  ;;  %v3855_v5 = vld [vmem:[#allocation3 + $0x40] sm:$0xe] }
 0x2cb   : > { %5630 = vmatprep.subr.bf16.mxu1 %v5949_v40  ;;  %v4248_v41 = vrot.slane %v4246_v61, 4  ;;  %v4269_v21 = vshll.u32 %v7545_v19, 16  ;;  %v4267_v26 = vrot.slane %v4266_v15, 4  ;;  %v4291_v9 = vshll.u32 %v4235_v52, 16  ;;  %v4243_v22 = vld [vmem:[#allocation3 + $0x48] sm:$0xf] }
 0x2cc   : > { %5615 = vmatpush3.bf16.msra.mxu0 %v5952_v45  ;;  %v3692_v54 = vrot.slane %v3690_v36, 5  ;;  %v4251_v57 = vrot.slane %v4249_v33, 5  ;;  %v3854_v36 = vld [vmem:[#allocation3 + $0x38] sm:$0xe] }
 0x2cd   : > { %5648 = vmatprep.subr.bf16.mxu0 %v5954_v60  ;;  %v4271_v61 = vrot.slane %v4269_v21, 5  ;;  %v5967_v33 = vld [vmem:[#allocation9 + $0x1b0] sm:$0xff]   ;;  %v4293_v51 = vrot.slane %v4291_v9, 5 }
 0x2ce   : > { %5631 = vmatpush3.bf16.msra.mxu1 %v5949_v40  ;;  %v3678_v40 = vrot.slane %v3676_v4, 5  ;;  %v3693_v34 = vsel %vm6963_vm10, %v3688_v2, %v3692_v54  ;;  %v3902_v4 = vrot.slane %v7515_v63, 5  ;;  %v3898_v54 = vrot.slane %v7521_v0, 5  ;;  %v4512_v15 = vld [vmem:[#allocation3 + $0x18] sm:$0xe] }
 0x2cf   : > { %5632 = vmatprep.subr.bf16.mxu1 %v5951_v1  ;;  %5617 = vmatmul.mubr.bf16.vlgmr.msra.gmra.mrb[32].mxu0 %v5090_v38  ;;  %v4255_v38 = vshll.u32 %v7539_v24, 16  ;;  %v4272_v0 = vsel %vm6963_vm10, %v4267_v26, %v4271_v61  ;;  %v7566_v26 = vld [vmem:[#allocation3 + $0x24] sm:$0x1] }
 0x2d0   : > { %5620 = vmatprep.mubr.bf16.mxu0 %v5091_v29  ;;  %5649 = vmatpush3.bf16.msra.mxu0 %v5954_v60  ;;  %v3679_v45 = vsel %vm6963_vm10, %v3674_v10, %v3678_v40  ;;  %v5105_v60 = vrot.slane %v3852_v39, 9  ;;  %v5108_v29 = vrot.slane %v3855_v5, 9  ;;  %v5107_v10 = vrot.slane %v3854_v36, 9  ;;  %v5971_v5 = vld [vmem:[#allocation3 + $0x20] ss:$8 sps:$4 sm:$0xff]  }
 0x2d1   : > { %5650 = vmatprep.subr.bf16.mxu0 %v5956_v55  ;;  %v5092_v35 = vcombine.low %v3679_v45, %v3693_v34  ;;  %v4257_v3 = vrot.slane %v4255_v38, 5  ;;  %v4237_v45 = vld [vmem:[#allocation3 + $0x30] sm:$0xf]  ;;  %v4288_v39 = vshrl.u32 %v4235_v52, 16  ;;  %v4276_v36 = vrot.slane %v4274_v18, 4 }
 0x2d2   : > { %5633 = vmatpush3.bf16.msra.mxu1 %v5951_v1  ;;  %v5961_v1 = vld [vmem:[#allocation9 + $0x198] sm:$0xff]   ;;  %v3891_v12 = vsel %vm7430_vm1, %v5105_v60, %v3890_v17  ;;  %v3903_v6 = vsel %vm7430_vm1, %v5108_v29, %v3902_v4  ;;  %v3899_v40 = vsel %vm7430_vm1, %v5107_v10, %v3898_v54  ;;  %v4344_v17 = vshrl.u32 %v4243_v22, 16  ;;  %v7564_v10 = vld [vmem:[#allocation3 + $0x34] sm:$0x1] }
 0x2d3   : > { %5634 = vmatprep.subr.bf16.mxu1 %v5953_v44  ;;  %v5112_v34 = vcombine.low %v3899_v40, %v3903_v6  ;;  %v4290_v27 = vrot.slane %v4288_v39, 4  ;;  %v4279_v38 = vrot.slane %v4277_v32, 5  ;;  %v4537_v4 = vrot.slane %v7539_v24, 5  ;;  %v7570_v40 = vld [vmem:[#allocation3 + $0x3c] sm:$0x1] }
 0x2d4   : > { %5651 = vmatpush3.bf16.msra.mxu0 %v5956_v55  ;;  %v5111_v55 = vcombine.low %v3891_v12, %v3895_v48  ;;  %v4511_v48 = vld [vmem:[#allocation3 + $0x10] sm:$0xe]  ;;  %v4241_v12 = vld [vmem:[#allocation3 + $0x40] sm:$0xf]  ;;  %v5146_v6 = vrot.slane %v4512_v15, 9 }
 0x2d5   : > { %5652 = vmatprep.subr.bf16.mxu0 %v5958_v16  ;;  %v5145_v29 = vrot.slane %v4511_v48, 9  ;;  %v4330_v54 = vshrl.u32 %v4241_v12, 16  ;;  %v5977_v39 = vld [vmem:[#allocation3 + $0x40] ss:$8 sps:$4 sm:$0xff]  }
 0x2d6   : > { %5635 = vmatpush3.bf16.msra.mxu1 %v5953_v44  ;;  %v4252_v44 = vor.u32 %v4251_v57, %v4248_v41  ;;  %v4302_v41 = vshrl.u32 %v4237_v45, 16  ;;  %v4305_v57 = vshll.u32 %v4237_v45, 16 }
 0x2d7   : > { %5636 = vmatprep.subr.bf16.mxu1 %v5955_v58  ;;  %5621 = vmatmul.mubr.bf16.gmra.mrb[36].mxu0 %v5092_v35  ;;  %v4239_v35 = vld [vmem:[#allocation3 + $0x38] sm:$0xf] }
 0x2d8   : > { %5653 = vmatpush3.bf16.msra.mxu0 %v5958_v16  ;;  %5664 = vmatprep.mubr.bf16.mxu0 %v5959_v43  ;;  %v4253_v2 = vrot.slane %v4252_v44, 4  ;;  %v5964_v16 = vld [vmem:[#allocation9 + $0x1d0] sm:$0xff]   ;;  %v5970_v43 = vld [vmem:[#allocation9 + $0x1e8] sm:$0xff]   ;;  %v4319_v60 = vshll.u32 %v4239_v35, 16  ;;  %v4304_v31 = vrot.slane %v4302_v41, 4 }
 0x2d9   : > { %5654 = vmatprep.subr.bf16.mxu0 %v5961_v1  ;;  %v5974_v44 = vld [vmem:[#allocation9 + $0x1f0] sm:$0xff]  }
 0x2da   : > { %5637 = vmatpush3.bf16.msra.mxu1 %v5955_v58  ;;  %v5965_v58 = vld [vmem:[#allocation9 + $0x1a8] sm:$0xff]   ;;  %v4258_v63 = vsel %vm6963_vm10, %v4253_v2, %v4257_v3  ;;  %v4321_v21 = vrot.slane %v4319_v60, 5  ;;  %v5978_v3 = vld [vmem:[#allocation9 + $0x210] sm:$0xff]  }
 0x2db   : > { %5638 = vmatprep.subr.bf16.mxu1 %v5957_v56  ;;  %v5133_v49 = vcombine.low %v4258_v63, %v4272_v0  ;;  %v4541_v63 = vrot.slane %v7545_v19, 5  ;;  %v5976_v0 = vld [vmem:[#allocation9 + $0x1f8] sm:$0xff]   ;;  %v4283_v19 = vshll.u32 %v7566_v26, 16  ;;  %v7581_v60 = vld [vmem:[#allocation3 + $0x4c] sm:$0x1] }
 0x2dc   : > { %5655 = vmatpush3.bf16.msra.mxu0 %v5961_v1  ;;  %v5972_v1 = vld [vmem:[#allocation9 + $0x200] sm:$0xff]   ;;  %v4353_v48 = vshll.u32 %v7581_v60, 16 }
 0x2dd   : > { %5656 = vmatprep.subr.bf16.mxu0 %v5963_v50  ;;  %v4542_v9 = vsel %vm7430_vm1, %v5146_v6, %v4541_v63  ;;  %v4515_v6 = vld [vmem:[#allocation3 + $0x30] sm:$0xe]  ;;  %v5983_v63 = vld [vmem:[#allocation9 + $0x238] sm:$0xff]  }
 0x2de   : > { %5639 = vmatpush3.bf16.msra.mxu1 %v5957_v56  ;;  %v5966_v56 = vld [vmem:[#allocation9 + $0x1d8] sm:$0xff]  }
 0x2df   : > { %5672 = vmatprep.subr.bf16.mxu1 %v5960_v59 }
 0x2e0   : > { %5657 = vmatpush3.bf16.msra.mxu0 %v5963_v50  ;;  %v4347_v50 = vshll.u32 %v4243_v22, 16  ;;  %v4325_v22 = vshll.u32 %v7570_v40, 16 }
 0x2e1   : > { %5641 = vmatmul.mubr.bf16.vlgmr.msra.gmra.mrb[64].mxu1 %v5110_v53  ;;  %5658 = vmatprep.subr.bf16.mxu0 %v5965_v58  ;;  %v4307_v53 = vrot.slane %v4305_v57, 5 }
 0x2e2   : > { %5644 = vmatprep.mubr.bf16.mxu1 %v5111_v55  ;;  %5673 = vmatpush3.bf16.msra.mxu1 %v5960_v59  ;;  %v4316_v59 = vshrl.u32 %v4239_v35, 16  ;;  %v7561_v55 = vld [vmem:[#allocation3 + $0x2c] sm:$0x1]  ;;  %v4349_v52 = vrot.slane %v4347_v50, 5 }
 0x2e3   : > { %5674 = vmatprep.subr.bf16.mxu1 %v5962_v28  ;;  %v4308_v61 = vor.u32 %v4307_v53, %v4304_v31  ;;  %v4297_v24 = vshll.u32 %v7561_v55, 16 }
 0x2e4   : > { %5659 = vmatpush3.bf16.msra.mxu0 %v5965_v58  ;;  %v4318_v2 = vrot.slane %v4316_v59, 4  ;;  %v4294_v58 = vor.u32 %v4293_v51, %v4290_v27  ;;  %v7579_v59 = vld [vmem:[#allocation3 + $0x44] sm:$0x1] }
 0x2e5   : > { %5660 = vmatprep.subr.bf16.mxu0 %v5967_v33  ;;  %v4309_v35 = vrot.slane %v4308_v61, 4  ;;  %v4299_v57 = vrot.slane %v4297_v24, 5  ;;  %v4339_v53 = vshll.u32 %v7579_v59, 16  ;;  %v4513_v61 = vld [vmem:[#allocation3 + $0x20] sm:$0xe]  ;;  %v4549_v24 = vrot.slane %v7561_v55, 5 }
 0x2e6   : > { %5675 = vmatpush3.bf16.msra.mxu1 %v5962_v28  ;;  %v5973_v28 = vld [vmem:[#allocation3 + $0x30] ss:$8 sps:$4 sm:$0xff]   ;;  %v4295_v45 = vrot.slane %v4294_v58, 4  ;;  %v5147_v14 = vrot.slane %v4513_v61, 9  ;;  %v4517_v55 = vld [vmem:[#allocation3 + $0x40] sm:$0xe] }
 0x2e7   : > { %5676 = vmatprep.subr.bf16.mxu1 %v5964_v16 }
 0x2e8   : > { %5661 = vmatpush3.bf16.msra.mxu0 %v5967_v33  ;;  %v4280_v33 = vor.u32 %v4279_v38, %v4276_v36  ;;  %v4300_v27 = vsel %vm6963_vm10, %v4295_v45, %v4299_v57  ;;  %v4518_v45 = vld [vmem:[#allocation3 + $0x48] sm:$0xe] }
 0x2e9   : > { %5645 = vmatmul.mubr.bf16.gmra.mrb[68].mxu1 %v5112_v34  ;;  %5662 = vmatprep.subr.bf16.mxu0 %v5969_v23  ;;  %v4346_v34 = vrot.slane %v4344_v17, 4 }
 0x2ea   : > { %5677 = vmatpush3.bf16.msra.mxu1 %v5964_v16  ;;  %5688 = vmatprep.mubr.bf16.mxu1 %v5133_v49  ;;  %v4333_v16 = vshll.u32 %v4241_v12, 16  ;;  %v4311_v49 = vshll.u32 %v7564_v10, 16  ;;  %v4281_v41 = vrot.slane %v4280_v33, 4 }
 0x2eb   : > { %5678 = vmatprep.subr.bf16.mxu1 %v5966_v56  ;;  %v4350_v17 = vor.u32 %v4349_v52, %v4346_v34  ;;  %v4516_v34 = vld [vmem:[#allocation3 + $0x38] sm:$0xe]  ;;  %v4557_v52 = vrot.slane %v7570_v40, 5  ;;  %v4561_v40 = vrot.slane %v7579_v59, 5 }
 0x2ec   : > { %5663 = vmatpush3.bf16.msra.mxu0 %v5969_v23  ;;  %v4322_v23 = vor.u32 %v4321_v21, %v4318_v2  ;;  %v4335_v42 = vrot.slane %v4333_v16, 5  ;;  %v4313_v32 = vrot.slane %v4311_v49, 5  ;;  %v4341_v2 = vrot.slane %v4339_v53, 5 }
 0x2ed   : > { %5696 = vmatprep.subr.bf16.mxu0 %v5972_v1  ;;  %v4351_v15 = vrot.slane %v4350_v17, 4  ;;  %v4545_v49 = vrot.slane %v7566_v26, 5 }
 0x2ee   : > { %5679 = vmatpush3.bf16.msra.mxu1 %v5966_v56  ;;  %v4538_v56 = vsel %vm7430_vm1, %v5145_v29, %v4537_v4  ;;  %v4314_v50 = vsel %vm6963_vm10, %v4309_v35, %v4313_v32  ;;  %v4355_v29 = vrot.slane %v4353_v48, 5  ;;  %v5981_v4 = vld [vmem:[#allocation9 + $0x228] sm:$0xff]   ;;  %v5151_v35 = vrot.slane %v4517_v55, 9 }
 0x2ef   : > { %5680 = vmatprep.subr.bf16.mxu1 %v5968_v46  ;;  %5665 = vmatmul.mubr.bf16.vlgmr.msra.gmra.mrb[40].mxu0 %v5971_v5  ;;  %v5153_v18 = vcombine.low %v4538_v56, %v4542_v9  ;;  %v4327_v5 = vrot.slane %v4325_v22, 5  ;;  %v4553_v56 = vrot.slane %v7564_v10, 5  ;;  %v4546_v10 = vsel %vm7430_vm1, %v5147_v14, %v4545_v49 }
 0x2f0   : > { %5668 = vmatprep.mubr.bf16.mxu0 %v5973_v28  ;;  %5697 = vmatpush3.bf16.msra.mxu0 %v5972_v1  ;;  %v5979_v1 = vld [vmem:[#allocation9 + $0x218] sm:$0xff]   ;;  %v4356_v58 = vsel %vm6963_vm10, %v4351_v15, %v4355_v29  ;;  %v4565_v22 = vrot.slane %v7581_v60, 5 }
 0x2f1   : > { %5698 = vmatprep.subr.bf16.mxu0 %v5975_v11 }
 0x2f2   : > { %5681 = vmatpush3.bf16.msra.mxu1 %v5968_v46  ;;  %v4332_v46 = vrot.slane %v4330_v54, 4  ;;  %v5982_v54 = vld [vmem:[#allocation9 + $0x230] sm:$0xff]  }
 0x2f3   : > { %5682 = vmatprep.subr.bf16.mxu1 %v5970_v43 }
 0x2f4   : > { %5699 = vmatpush3.bf16.msra.mxu0 %v5975_v11  ;;  %v4285_v11 = vrot.slane %v4283_v19, 5  ;;  %v4336_v51 = vor.u32 %v4335_v42, %v4332_v46 }
 0x2f5   : > { %5700 = vmatprep.subr.bf16.mxu0 %v5978_v3 }
 0x2f6   : > { %5683 = vmatpush3.bf16.msra.mxu1 %v5970_v43  ;;  %v4323_v43 = vrot.slane %v4322_v23, 4  ;;  %v4286_v31 = vsel %vm6963_vm10, %v4281_v41, %v4285_v11  ;;  %v4337_v38 = vrot.slane %v4336_v51, 4  ;;  %v5150_v23 = vrot.slane %v4516_v34, 9 }
 0x2f7   : > { %5684 = vmatprep.subr.bf16.mxu1 %v5974_v44  ;;  %5669 = vmatmul.mubr.bf16.gmra.mrb[44].mxu0 %v5977_v39  ;;  %v5134_v12 = vcombine.low %v4286_v31, %v4300_v27  ;;  %v5152_v39 = vrot.slane %v4518_v45, 9 }
 0x2f8   : > { %5701 = vmatpush3.bf16.msra.mxu0 %v5978_v3  ;;  %5712 = vmatprep.mubr.bf16.mxu0 %v5153_v18  ;;  %v4328_v28 = vsel %vm6963_vm10, %v4323_v43, %v4327_v5  ;;  %v4342_v21 = vsel %vm6963_vm10, %v4337_v38, %v4341_v2  ;;  %v4514_v3 = vld [vmem:[#allocation3 + $0x28] sm:$0xe]  ;;  %v4558_v26 = vsel %vm7430_vm1, %v5150_v23, %v4557_v52 }
 0x2f9   : > { %5702 = vmatprep.subr.bf16.mxu0 %v5979_v1  ;;  %v5135_v36 = vcombine.low %v4314_v50, %v4328_v28  ;;  %v5136_v16 = vcombine.low %v4342_v21, %v4356_v58  ;;  %v5148_v33 = vrot.slane %v4514_v3, 9  ;;  %v4566_v41 = vsel %vm7430_vm1, %v5152_v39, %v4565_v22 }
 0x2fa   : > { %5685 = vmatpush3.bf16.msra.mxu1 %v5974_v44  ;;  %v5980_v44 = vld [vmem:[#allocation9 + $0x220] sm:$0xff]  }
 0x2fb   : > { %5686 = vmatprep.subr.bf16.mxu1 %v5976_v0  ;;  %v4550_v19 = vsel %vm7430_vm1, %v5148_v33, %v4549_v24 }
 0x2fc   : > { %5703 = vmatpush3.bf16.msra.mxu0 %v5979_v1  ;;  %v5154_v42 = vcombine.low %v4546_v10, %v4550_v19  ;;  %v4562_v1 = vsel %vm7430_vm1, %v5151_v35, %v4561_v40 }
 0x2fd   : > { %5704 = vmatprep.subr.bf16.mxu0 %v5980_v44  ;;  %v5156_v57 = vcombine.low %v4562_v1, %v4566_v41 }
 0x2fe   : > { %5687 = vmatpush3.bf16.msra.mxu1 %v5976_v0  ;;  %v5149_v0 = vrot.slane %v4515_v6, 9 }
 0x300   : > { %5705 = vmatpush3.bf16.msra.mxu0 %v5980_v44  ;;  %v4554_v46 = vsel %vm7430_vm1, %v5149_v0, %v4553_v56 }
 0x301   : > { %5689 = vmatmul.mubr.bf16.vlgmr.msra.gmra.mrb[72].mxu1 %v5134_v12  ;;  %5706 = vmatprep.subr.bf16.mxu0 %v5981_v4  ;;  %v5155_v9 = vcombine.low %v4554_v46, %v4558_v26 }
 0x302   : > { %5692 = vmatprep.mubr.bf16.mxu1 %v5135_v36 }
 0x304   : > { %5707 = vmatpush3.bf16.msra.mxu0 %v5981_v4 }
 0x305   : > { %5708 = vmatprep.subr.bf16.mxu0 %v5982_v54 }
 0x308   : > { %5709 = vmatpush3.bf16.msra.mxu0 %v5982_v54 }
 0x309   : > { %5693 = vmatmul.mubr.bf16.gmra.mrb[76].mxu1 %v5136_v16  ;;  %5710 = vmatprep.subr.bf16.mxu0 %v5983_v63 }
 0x30c   : > { %5711 = vmatpush3.bf16.msra.mxu0 %v5983_v63 }
 0x30f   : > { %5713 = vmatmul.mubr.bf16.vlgmr.msra.gmra.mrb[48].mxu0 %v5154_v42 }
 0x310   : > { %5716 = vmatprep.mubr.bf16.mxu0 %v5155_v9 }
 0x317   : > { %5717 = vmatmul.mubr.bf16.gmra.mrb[52].mxu0 %v5156_v57 }
 0x362   : > { %v5522_v18 = vpop.f32.mrb[16].mxu0 }
 0x363   : > { %v2895_v32 = vadd.f32 %v5522_v18, %v7293_v62  ;;  %v2862_v43 = vpop.f32.mrb[17].mxu0 }
 0x364   : > { %v2893_v17 = vadd.f32 %v2862_v43, %v7287_v37  ;;  %v5523_v11 = vpop.f32.mrb[18].mxu0 }
 0x365   : > { %v2896_v59 = vadd.f32 %v5523_v11, %v7296_v47  ;;  %v2865_v60 = vpop.f32.mrb[19].mxu0 }
 0x366   : > { %v2894_v27 = vadd.f32 %v2865_v60, %v7289_v7 }
 0x373   : > { %v5546_v48 = vpop.f32.mrb[48].mxu1 }
 0x374   : > { %v5526_v51 = vpop.f32.mrb[20].mxu0  ;;  %v3177_v5 = vadd.f32 %v5546_v48, %v2895_v32  ;;  %v3144_v44 = vpop.f32.mrb[49].mxu1 }
 0x375   : > { %v2899_v50 = vadd.f32 %v5526_v51, %v7305_v13  ;;  %v2878_v30 = vpop.f32.mrb[21].mxu0  ;;  %v3175_v62 = vadd.f32 %v3144_v44, %v2893_v17  ;;  %v5547_v12 = vpop.f32.mrb[50].mxu1 }
 0x376   : > { %v2897_v31 = vadd.f32 %v2878_v30, %v7300_v8  ;;  %v5527_v53 = vpop.f32.mrb[22].mxu0  ;;  %v3178_v36 = vadd.f32 %v5547_v12, %v2896_v59  ;;  %v3147_v47 = vpop.f32.mrb[51].mxu1 }
 0x377   : > { %v2900_v37 = vadd.f32 %v5527_v53, %v7309_v25  ;;  %v2881_v28 = vpop.f32.mrb[23].mxu0  ;;  %v3176_v7 = vadd.f32 %v3147_v47, %v2894_v27 }
 0x378   : > { %v2898_v38 = vadd.f32 %v2881_v28, %v7303_v20 }
 0x380   : > { %v5550_v15 = vpop.f32.mrb[52].mxu1 }
 0x381   : > { %v3181_v29 = vadd.f32 %v5550_v15, %v2899_v50  ;;  %v3160_v4 = vpop.f32.mrb[53].mxu1 }
 0x382   : > { %v3179_v13 = vadd.f32 %v3160_v4, %v2897_v31  ;;  %v5551_v2 = vpop.f32.mrb[54].mxu1  ;;  %v5570_v8 = vpop.f32.mrb[24].mxu0 }
 0x383   : > { %v3182_v21 = vadd.f32 %v5551_v2, %v2900_v37  ;;  %v3163_v58 = vpop.f32.mrb[55].mxu1  ;;  %v3390_v16 = vadd.f32 %v5570_v8, %v3177_v5  ;;  %v3357_v3 = vpop.f32.mrb[25].mxu0 }
 0x384   : > { %v3180_v54 = vadd.f32 %v3163_v58, %v2898_v38  ;;  %v3388_v6 = vadd.f32 %v3357_v3, %v3175_v62  ;;  %v5571_v63 = vpop.f32.mrb[26].mxu0 }
 0x385   : > { %v3391_v25 = vadd.f32 %v5571_v63, %v3178_v36  ;;  %v3360_v61 = vpop.f32.mrb[27].mxu0 }
 0x386   : > { %v3389_v33 = vadd.f32 %v3360_v61, %v3176_v7 }
 0x38a   : > { %v5574_v24 = vpop.f32.mrb[28].mxu0 }
 0x38b   : > { %v3394_v34 = vadd.f32 %v5574_v24, %v3181_v29  ;;  %v3373_v20 = vpop.f32.mrb[29].mxu0 }
 0x38c   : > { %v3392_v0 = vadd.f32 %v3373_v20, %v3179_v13  ;;  %v5575_v56 = vpop.f32.mrb[30].mxu0 }
 0x38d   : > { %v3395_v14 = vadd.f32 %v5575_v56, %v3182_v21  ;;  %v3376_v49 = vpop.f32.mrb[31].mxu0 }
 0x38e   : > { %v3393_v23 = vadd.f32 %v3376_v49, %v3180_v54 }
 0x394   : > { %v5594_v52 = vpop.f32.mrb[56].mxu1 }
 0x395   : > { %v3560_v19 = vadd.f32 %v5594_v52, %v3390_v16  ;;  %v3527_v45 = vpop.f32.mrb[57].mxu1 }
 0x396   : > { %v3558_v46 = vadd.f32 %v3527_v45, %v3388_v6  ;;  %v5595_v55 = vpop.f32.mrb[58].mxu1 }
 0x397   : > { %v3561_v10 = vadd.f32 %v5595_v55, %v3391_v25  ;;  %v3530_v42 = vpop.f32.mrb[59].mxu1 }
 0x398   : > { %v3559_v26 = vadd.f32 %v3530_v42, %v3389_v33 }
 0x39c   : > { %v5598_v39 = vpop.f32.mrb[60].mxu1 }
 0x39d   : > { %v3564_v9 = vadd.f32 %v5598_v39, %v3394_v34  ;;  %v3543_v35 = vpop.f32.mrb[61].mxu1 }
 0x39e   : > { %v3562_v40 = vadd.f32 %v3543_v35, %v3392_v0  ;;  %v5599_v22 = vpop.f32.mrb[62].mxu1 }
 0x39f   : > { %v3565_v1 = vadd.f32 %v5599_v22, %v3395_v14  ;;  %v3546_v41 = vpop.f32.mrb[63].mxu1 }
 0x3a0   : > { %v3563_v57 = vadd.f32 %v3546_v41, %v3393_v23 }
 0x3a2   : > { %v5618_v18 = vpop.f32.mrb[32].mxu0 }
 0x3a3   : > { %v3842_v32 = vadd.f32 %v5618_v18, %v3560_v19  ;;  %v3809_v43 = vpop.f32.mrb[33].mxu0 }
 0x3a4   : > { %v3840_v17 = vadd.f32 %v3809_v43, %v3558_v46  ;;  %v5619_v11 = vpop.f32.mrb[34].mxu0 }
 0x3a5   : > { %v3843_v59 = vadd.f32 %v5619_v11, %v3561_v10  ;;  %v3812_v60 = vpop.f32.mrb[35].mxu0 }
 0x3a6   : > { %v3841_v27 = vadd.f32 %v3812_v60, %v3559_v26 }
 0x3aa   : > { %v5622_v51 = vpop.f32.mrb[36].mxu0 }
 0x3ab   : > { %v3846_v48 = vadd.f32 %v5622_v51, %v3564_v9  ;;  %v3825_v50 = vpop.f32.mrb[37].mxu0 }
 0x3ac   : > { %v3844_v30 = vadd.f32 %v3825_v50, %v3562_v40  ;;  %v5623_v5 = vpop.f32.mrb[38].mxu0 }
 0x3ad   : > { %v3847_v44 = vadd.f32 %v5623_v5, %v3565_v1  ;;  %v3828_v31 = vpop.f32.mrb[39].mxu0 }
 0x3ae   : > { %v3845_v53 = vadd.f32 %v3828_v31, %v3563_v57 }
 0x3b4   : > { %v5642_v62 = vpop.f32.mrb[64].mxu1 }
 0x3b5   : > { %v4052_v12 = vadd.f32 %v5642_v62, %v3842_v32  ;;  %v4019_v37 = vpop.f32.mrb[65].mxu1 }
 0x3b6   : > { %v4050_v28 = vadd.f32 %v4019_v37, %v3840_v17  ;;  %v5643_v36 = vpop.f32.mrb[66].mxu1 }
 0x3b7   : > { %v4053_v47 = vadd.f32 %v5643_v36, %v3843_v59  ;;  %v4022_v38 = vpop.f32.mrb[67].mxu1 }
 0x3b8   : > { %v4051_v7 = vadd.f32 %v4022_v38, %v3841_v27 }
 0x3bc   : > { %v5646_v15 = vpop.f32.mrb[68].mxu1 }
 0x3bd   : > { %v4056_v29 = vadd.f32 %v5646_v15, %v3846_v48  ;;  %v4035_v4 = vpop.f32.mrb[69].mxu1 }
 0x3be   : > { %v4054_v13 = vadd.f32 %v4035_v4, %v3844_v30  ;;  %v5647_v2 = vpop.f32.mrb[70].mxu1 }
 0x3bf   : > { %v4057_v21 = vadd.f32 %v5647_v2, %v3847_v44  ;;  %v4038_v58 = vpop.f32.mrb[71].mxu1 }
 0x3c0   : > { %v4055_v54 = vadd.f32 %v4038_v58, %v3845_v53 }
 0x3c2   : > { %v5666_v8 = vpop.f32.mrb[40].mxu0 }
 0x3c3   : > { %v4223_v16 = vadd.f32 %v5666_v8, %v4052_v12  ;;  %v4190_v3 = vpop.f32.mrb[41].mxu0 }
 0x3c4   : > { %v4221_v6 = vadd.f32 %v4190_v3, %v4050_v28  ;;  %v5667_v63 = vpop.f32.mrb[42].mxu0 }
 0x3c5   : > { %v4224_v25 = vadd.f32 %v5667_v63, %v4053_v47  ;;  %v4193_v61 = vpop.f32.mrb[43].mxu0 }
 0x3c6   : > { %v4222_v33 = vadd.f32 %v4193_v61, %v4051_v7 }
 0x3ca   : > { %v5670_v24 = vpop.f32.mrb[44].mxu0 }
 0x3cb   : > { %v4227_v34 = vadd.f32 %v5670_v24, %v4056_v29  ;;  %v4206_v20 = vpop.f32.mrb[45].mxu0 }
 0x3cc   : > { %v4225_v0 = vadd.f32 %v4206_v20, %v4054_v13  ;;  %v5671_v56 = vpop.f32.mrb[46].mxu0 }
 0x3cd   : > { %v4228_v14 = vadd.f32 %v5671_v56, %v4057_v21  ;;  %v4209_v49 = vpop.f32.mrb[47].mxu0 }
 0x3ce   : > { %v4226_v23 = vadd.f32 %v4209_v49, %v4055_v54 }
 0x3d4   : > { %v5690_v52 = vpop.f32.mrb[72].mxu1 }
 0x3d5   : > { %v4505_v19 = vadd.f32 %v5690_v52, %v4223_v16  ;;  %v4472_v45 = vpop.f32.mrb[73].mxu1 }
 0x3d6   : > { %v4503_v46 = vadd.f32 %v4472_v45, %v4221_v6  ;;  %v5691_v55 = vpop.f32.mrb[74].mxu1 }
 0x3d7   : > { %v4506_v10 = vadd.f32 %v5691_v55, %v4224_v25  ;;  %v4475_v42 = vpop.f32.mrb[75].mxu1 }
 0x3d8   : > { %v4504_v26 = vadd.f32 %v4475_v42, %v4222_v33 }
 0x3dc   : > { %v5694_v39 = vpop.f32.mrb[76].mxu1 }
 0x3dd   : > { %v4509_v9 = vadd.f32 %v5694_v39, %v4227_v34  ;;  %v4488_v35 = vpop.f32.mrb[77].mxu1 }
 0x3de   : > { %v4507_v40 = vadd.f32 %v4488_v35, %v4225_v0  ;;  %v5695_v22 = vpop.f32.mrb[78].mxu1 }
 0x3df   : > { %v4510_v1 = vadd.f32 %v5695_v22, %v4228_v14  ;;  %v4491_v41 = vpop.f32.mrb[79].mxu1 }
 0x3e0   : > { %v4508_v57 = vadd.f32 %v4491_v41, %v4226_v23 }
 0x3e2   : > { %v5714_v18 = vpop.f32.mrb[48].mxu0 }
 0x3e3   : > { %v4715_v32 = vadd.f32 %v5714_v18, %v4505_v19  ;;  %v4682_v43 = vpop.f32.mrb[49].mxu0 }
 0x3e4   : > { %v4713_v17 = vadd.f32 %v4682_v43, %v4503_v46  ;;  %v5715_v11 = vpop.f32.mrb[50].mxu0 }
 0x3e5   : > { %4723 = vst [vmem:[%s416_s14 + $0x10] sm:$0xff] %v4715_v32  ;;  %v4716_v59 = vadd.f32 %v5715_v11, %v4506_v10  ;;  %v4685_v60 = vpop.f32.mrb[51].mxu0 }
 0x3e6   : > { %4721 = vst [vmem:[%s416_s14] sm:$0xff] %v4713_v17  ;;  %v4714_v27 = vadd.f32 %v4685_v60, %v4504_v26 }
 0x3e7   : > { %4724 = vst [vmem:[%s416_s14 + $0x18] sm:$0xff] %v4716_v59 }
 0x3e8   : > { %4722 = vst [vmem:[%s416_s14 + $0x8] sm:$0xff] %v4714_v27 }
 0x3ea   : > { %v5718_v51 = vpop.f32.mrb[52].mxu0 }
 0x3eb   : > { %v4719_v48 = vadd.f32 %v5718_v51, %v4509_v9  ;;  %v4698_v50 = vpop.f32.mrb[53].mxu0 }
 0x3ec   : > { %v4717_v30 = vadd.f32 %v4698_v50, %v4507_v40  ;;  %v5719_v5 = vpop.f32.mrb[54].mxu0 }
 0x3ed   : > { %4727 = vst [vmem:[%s416_s14 + $0x30] sm:$0xff] %v4719_v48  ;;  %v4720_v44 = vadd.f32 %v5719_v5, %v4510_v1  ;;  %v4701_v31 = vpop.f32.mrb[55].mxu0 }
 0x3ee   : > { %4725 = vst [vmem:[%s416_s14 + $0x20] sm:$0xff] %v4717_v30  ;;  %v4718_v53 = vadd.f32 %v4701_v31, %v4508_v57 }
 0x3ef   : > { %4728 = vst [vmem:[%s416_s14 + $0x38] sm:$0xff] %v4720_v44 }
 0x3f0   : > { %4726 = vst [vmem:[%s416_s14 + $0x28] sm:$0xff] %v4718_v53 }
 0x3f1   : > { %6226 = shalt.err (!%p6223_p10)
}
 0x3f2   : > { %s6227_s13 = scalar_lea.hbm %s7630_s19, 1024  ;;  %s6231_s21 = scalar_lea.hbm %s7682_s8, 2048 }
 0x3f3   : > { %p6228_p11 = scmp.ne.s32.totalorder %s7630_s19, %s6227_s13  ;;  %p6232_p9 = scmp.lt.u32.totalorder %s7630_s19, %s7682_s8 }
 0x3f4   : > { %p6233_p7 = scmp.lt.u32.totalorder %s6231_s21, %s6227_s13  ;;  %p6235_p12 = scmp.lt.u32.totalorder %s6227_s13, %s7630_s19 }
 0x3f5   : > { %p6229_p3 = pnand %p6228_p11, %p7719_p1 }
 0x3f6   : > { %p6234_p4 = por %p6233_p7, %p6232_p9 }
 0x3f7   : > { %p6230_p5 = pneg %p6229_p3 }
 0x3f8   : > { %p6236_p13 = por %p6235_p12, %p6234_p4 }
 0x3fa   : > { %p6237_p0 = pnand %p6236_p13, %p6230_p5 }
 0x3fc   : > { %6240 = shalt.err (!%p6237_p0)
}
 0x3fd   : > { %s6311_s26 = smov 128   ;;  %s6312_s20 = smov 8  }
 0x3fe   : > { %5782 = dma.vmem_to_hbm [thread:$0]  (%p7719_p1), %s7625_s10, 1024, %s7630_s19, %s4730_s11, %s6311_s26, %s6311_s26, %s6312_s20  }
 0x3ff PF: > { %s4758_s16 = sand.u32 1, %s6283_s27   ;;  %p7720_p2 = scmp.ne.s32.totalorder %s7694_s9, 0 }
 0x400   : > { %p7721_p8 = scmp.ge.s32.totalorder %s6295_s30, 2  ;;  %s4759_s18 = scalar_lea.sflag [#allocation6], %s4758_s16 }
 0x402   : > { %p5811_p6 = pnand %p7721_p8, %p7720_p2 }
 0x404   : > { %6278 = dma.done.wait (!%p5811_p6), %s4759_s18, 1024  }
 0x405   : > { %6280 = vsyncadd (!%p5811_p6), %s4759_s18, 4294966272  ;;  %p25_p10 = scmp.ge.s32.totalorder %s6565_s15, 4   ;;  %s7722_s27 = smov %s6287_s28 }
 0x406   : > { %s7723_s28 = smov %s6291_s29  ;;  %s7724_s29 = smov %s6577_s17 }
 0x407   : > { %s7725_s30 = smov %s6565_s15  ;;  %27 = sbr.rel (!%p25_p10) target bundleno = 9 (0x9), region = 150 }
 0x40e   :  { %4764 = vsyncpa [#allocation5], 1 }
 0x40f   :  { %4766 = vsyncpa [#allocation5 + $0x1], 1 }
 0x410   :  { %4767 = vsyncpa [#allocation8], 1 }
 0x411   :  { %4768 = vsyncpa [#allocation11], 1 }
 0x412   :  { %4769 = vsyncpa [#allocation14], 1 }
 0x413   :  { %4770 = vsyncpa [#allocation17], 1 }
 0x414   :  { %4771 = vsyncpa [#allocation6], 1 }
 0x415   :  { %4773 = vsyncpa [#allocation6 + $0x1], 1 }

</bundles_post_ra>
